<compile_context>
chip_gen: v7x
topology: tpu7x:2x2x1
jax: 0.10.0
libtpu: 0.0.40
codegen_flags: <defaults>
</compile_context>

<pallas_src>
import functools
import math

import jax
import jax.numpy as jnp
from jax.experimental import pallas as pl
from jax.experimental.pallas import tpu as pltpu


# ============================================================================
# Tiling helpers
# ============================================================================

def _pick_tile(n, preferred, align):
    """Largest tile <= preferred that divides n and is `align`-aligned.

    Falls back to the full dimension (always a legal block size) when the dim
    is already small or no aligned divisor exists.
    """
    if n <= preferred:
        return n
    t = (preferred // align) * align
    while t >= align:
        if n % t == 0:
            return t
        t -= align
    return n


# Explicit scoped-VMEM cap: >= the default on v5e/v6e, below v7x's 64 MiB physical.
_VMEM_LIMIT = 32 * 1024 * 1024

_MM_COMPILER_PARAMS = pltpu.CompilerParams(
    # M and N tiles are independent -> shard across v7x's two TensorCores;
    # K is the accumulation axis -> "arbitrary".
    dimension_semantics=("parallel", "parallel", "arbitrary"),
    vmem_limit_bytes=_VMEM_LIMIT,
)


# ============================================================================
# Tiled matmul (+bias, + optional fused residual) kernel
# ============================================================================

def _make_matmul_kernel(has_residual):
    def _body(a_ref, w_ref, b_ref, r_ref, o_ref, acc_ref):
        k = pl.program_id(2)

        @pl.when(k == 0)
        def _init():
            acc_ref[...] = jnp.zeros_like(acc_ref)

        acc_ref[...] += jnp.dot(a_ref[...], w_ref[...],
                                preferred_element_type=jnp.float32)

        @pl.when(k == pl.num_programs(2) - 1)
        def _finalize():
            y = acc_ref[...] + b_ref[...].astype(jnp.float32)
            if r_ref is not None:
                y = y + r_ref[...].astype(jnp.float32)
            o_ref[...] = y.astype(o_ref.dtype)

    if has_residual:
        def kernel(a_ref, w_ref, b_ref, r_ref, o_ref, acc_ref):
            _body(a_ref, w_ref, b_ref, r_ref, o_ref, acc_ref)
    else:
        def kernel(a_ref, w_ref, b_ref, o_ref, acc_ref):
            _body(a_ref, w_ref, b_ref, None, o_ref, acc_ref)
    return kernel


def _matmul_bias(a, w, bias, residual=None,
                 tm_pref=512, tn_pref=256, tk_pref=512):
    """out = a @ w + bias (+ residual).  a:(M,K), w:(K,N), bias:(N,)."""
    M, K = a.shape
    K2, N = w.shape
    assert K == K2
    TM = _pick_tile(M, tm_pref, 8)      # sublane-aligned rows
    TN = _pick_tile(N, tn_pref, 128)    # lane-dense output tiles
    TK = _pick_tile(K, tk_pref, 128)
    grid = (M // TM, N // TN, K // TK)

    in_specs = [
        pl.BlockSpec((TM, TK), lambda i, j, k: (i, k)),
        pl.BlockSpec((TK, TN), lambda i, j, k: (k, j)),
        pl.BlockSpec((1, TN), lambda i, j, k: (0, j)),
    ]
    args = [a, w, bias.reshape(1, N)]
    if residual is not None:
        in_specs.append(pl.BlockSpec((TM, TN), lambda i, j, k: (i, j)))
        args.append(residual)

    bytes_accessed = 4 * (M * K + K * N + M * N * (2 if residual is not None else 1))
    cost = pl.CostEstimate(flops=2 * M * K * N, transcendentals=0,
                           bytes_accessed=bytes_accessed)

    return pl.pallas_call(
        _make_matmul_kernel(residual is not None),
        out_shape=jax.ShapeDtypeStruct((M, N), jnp.float32),
        grid_spec=pltpu.PrefetchScalarGridSpec(
            num_scalar_prefetch=0,
            grid=grid,
            in_specs=in_specs,
            out_specs=pl.BlockSpec((TM, TN), lambda i, j, k: (i, j)),
            scratch_shapes=[pltpu.VMEM((TM, TN), jnp.float32)],
        ),
        compiler_params=_MM_COMPILER_PARAMS,
        cost_estimate=cost,
    )(*args)


# ============================================================================
# Fused LayerNorm + matmul (+bias) kernel
#   out = LayerNorm(x) @ w + bias, with the normalized row tile cached in a
#   VMEM scratch (computed once per row block, reused for every output tile).
# ============================================================================

def _ln_matmul_kernel(x_ref, g_ref, b_ref, w_ref, bias_ref, o_ref, h_sc):
    j = pl.program_id(1)

    @pl.when(j == 0)
    def _ln():
        x = x_ref[...].astype(jnp.float32)
        mean = jnp.mean(x, axis=-1, keepdims=True)
        var = jnp.mean(jnp.square(x - mean), axis=-1, keepdims=True)
        h_sc[...] = ((x - mean) * jax.lax.rsqrt(var + 1e-5)
                     * g_ref[...] + b_ref[...])

    y = jnp.dot(h_sc[...], w_ref[...], preferred_element_type=jnp.float32)
    o_ref[...] = (y + bias_ref[...].astype(jnp.float32)).astype(o_ref.dtype)


def _ln_matmul_bias(x, gamma, beta, w, bias, tm_pref=256, tn_pref=512):
    """out = LayerNorm(x; gamma, beta) @ w + bias.  x:(M,C), w:(C,N), bias:(N,)."""
    M, C = x.shape
    C2, N = w.shape
    assert C == C2
    # Keep the (TM, C) activation tile + scratch a small fraction of scoped VMEM
    # so the (C, TN) weight tiles and the output stay resident too.
    tm_cap = max(8, (_VMEM_LIMIT // 8) // (4 * C))
    TM = _pick_tile(M, min(tm_pref, tm_cap), 8)
    TN = _pick_tile(N, tn_pref, 128)
    grid = (M // TM, N // TN)

    cost = pl.CostEstimate(flops=2 * M * C * N + 8 * M * C,
                           transcendentals=M,
                           bytes_accessed=4 * (M * C + C * N + M * N))

    return pl.pallas_call(
        _ln_matmul_kernel,
        out_shape=jax.ShapeDtypeStruct((M, N), jnp.float32),
        grid_spec=pltpu.PrefetchScalarGridSpec(
            num_scalar_prefetch=0,
            grid=grid,
            in_specs=[
                pl.BlockSpec((TM, C), lambda i, j: (i, 0)),   # same block across j
                pl.BlockSpec((1, C), lambda i, j: (0, 0)),
                pl.BlockSpec((1, C), lambda i, j: (0, 0)),
                pl.BlockSpec((C, TN), lambda i, j: (0, j)),
                pl.BlockSpec((1, TN), lambda i, j: (0, j)),
            ],
            out_specs=pl.BlockSpec((TM, TN), lambda i, j: (i, j)),
            scratch_shapes=[pltpu.VMEM((TM, C), jnp.float32)],
        ),
        compiler_params=pltpu.CompilerParams(
            # The LN scratch is carried across the N-tile axis -> "arbitrary".
            dimension_semantics=("parallel", "arbitrary"),
            vmem_limit_bytes=_VMEM_LIMIT,
        ),
        cost_estimate=cost,
    )(x, gamma.reshape(1, C), beta.reshape(1, C), w, bias.reshape(1, N))


# ============================================================================
# Fused flash-style attention core (online softmax)
# ============================================================================

def _flash_attn_kernel(q_ref, k_ref, v_ref, o_ref, m_sc, l_sc, acc_sc, *, scale):
    ki = pl.program_id(2)

    @pl.when(ki == 0)
    def _init():
        m_sc[...] = jnp.full_like(m_sc, -jnp.inf)
        l_sc[...] = jnp.zeros_like(l_sc)
        acc_sc[...] = jnp.zeros_like(acc_sc)

    s = jnp.einsum("bqd,bkd->bqk", q_ref[...], k_ref[...],
                   preferred_element_type=jnp.float32) * scale
    m_prev = m_sc[...]
    m_new = jnp.maximum(m_prev, s.max(axis=-1, keepdims=True))
    alpha = jnp.exp(m_prev - m_new)
    p = jnp.exp(s - m_new)
    l_sc[...] = alpha * l_sc[...] + p.sum(axis=-1, keepdims=True)
    acc_sc[...] = alpha * acc_sc[...] + jnp.einsum(
        "bqk,bkd->bqd", p.astype(v_ref.dtype), v_ref[...],
        preferred_element_type=jnp.float32)
    m_sc[...] = m_new

    @pl.when(ki == pl.num_programs(2) - 1)
    def _finalize():
        o_ref[...] = (acc_sc[...] / l_sc[...]).astype(o_ref.dtype)


def _attention_core(q, k, v, scale, tq_pref=256, tk_pref=256):
    # q, k, v: (B*num_heads, N, head_dim)
    BH, N, hd = q.shape
    TQ = _pick_tile(N, tq_pref, 8)
    TK = _pick_tile(N, tk_pref, 8)
    grid = (BH, N // TQ, N // TK)
    return pl.pallas_call(
        functools.partial(_flash_attn_kernel, scale=scale),
        out_shape=jax.ShapeDtypeStruct((BH, N, hd), jnp.float32),
        grid_spec=pltpu.PrefetchScalarGridSpec(
            num_scalar_prefetch=0,
            grid=grid,
            in_specs=[
                pl.BlockSpec((1, TQ, hd), lambda b, qi, ki: (b, qi, 0)),
                pl.BlockSpec((1, TK, hd), lambda b, qi, ki: (b, ki, 0)),
                pl.BlockSpec((1, TK, hd), lambda b, qi, ki: (b, ki, 0)),
            ],
            out_specs=pl.BlockSpec((1, TQ, hd), lambda b, qi, ki: (b, qi, 0)),
            scratch_shapes=[
                pltpu.VMEM((1, TQ, 1), jnp.float32),
                pltpu.VMEM((1, TQ, 1), jnp.float32),
                pltpu.VMEM((1, TQ, hd), jnp.float32),
            ],
        ),
        compiler_params=pltpu.CompilerParams(
            dimension_semantics=("parallel", "parallel", "arbitrary"),
            vmem_limit_bytes=_VMEM_LIMIT,
        ),
    )(q, k, v)


# ============================================================================
# Depthwise 3x3 conv (+bias) kernel (DWConv inside PVT2FFN), channel-tiled
# ============================================================================

def _dwconv3x3_kernel(x_ref, w_ref, b_ref, o_ref, *, H, W):
    # x: (1, H+2, W+2, TC) zero-padded feature map; w: (9, TC); b: (1, TC)
    x = x_ref[...].astype(jnp.float32)
    y = x[:, 0:H, 0:W, :] * w_ref[0, :]
    for t in range(1, 9):
        kh, kw = divmod(t, 3)
        y = y + x[:, kh:kh + H, kw:kw + W, :] * w_ref[t, :]
    o_ref[...] = (y + b_ref[...]).astype(o_ref.dtype)


def _dwconv3x3(x_bhwc, w9c, bias, tc_pref=256):
    B, H, W, C = x_bhwc.shape
    TC = _pick_tile(C, tc_pref, 128)    # lane-aligned channel tiles
    xp = jnp.pad(x_bhwc, ((0, 0), (1, 1), (1, 1), (0, 0)))
    return pl.pallas_call(
        functools.partial(_dwconv3x3_kernel, H=H, W=W),
        out_shape=jax.ShapeDtypeStruct((B, H, W, C), jnp.float32),
        grid_spec=pltpu.PrefetchScalarGridSpec(
            num_scalar_prefetch=0,
            grid=(B, C // TC),
            in_specs=[
                pl.BlockSpec((1, H + 2, W + 2, TC), lambda b, c: (b, 0, 0, c)),
                pl.BlockSpec((9, TC), lambda b, c: (0, c)),
                pl.BlockSpec((1, TC), lambda b, c: (0, c)),
            ],
            out_specs=pl.BlockSpec((1, H, W, TC), lambda b, c: (b, 0, 0, c)),
        ),
        compiler_params=pltpu.CompilerParams(
            dimension_semantics=("parallel", "parallel"),
            vmem_limit_bytes=_VMEM_LIMIT,
        ),
    )(xp, w9c, bias.reshape(1, C))


# ============================================================================
# Block forward (std_att branch), parameters, pure-JAX reference
# ============================================================================

@functools.partial(jax.jit, static_argnames=("H", "W", "num_heads"))
def block_forward(params, x, *, H, W, num_heads):
    """Block.forward(x, H, W) with block_type='std_att' and drop_path=0 (Identity)."""
    B, N, C = x.shape
    assert N == H * W and C % num_heads == 0
    hd = C // num_heads
    x2d = x.reshape(B * N, C)

    # ---- x = x + Attention(LayerNorm1(x)) --------------------------------
    att = params["attn"]
    # Fuse LayerNorm1 with a merged q|kv projection: one pass over x2d.
    wqkv = jnp.concatenate([att["wq"], att["wkv"]], axis=1)       # (C, 3C)
    bqkv = jnp.concatenate([att["bq"], att["bkv"]], axis=0)       # (3C,)
    qkv = _ln_matmul_bias(x2d, params["norm1_g"], params["norm1_b"], wqkv, bqkv)

    qkv = qkv.reshape(B, N, 3 * C)
    q = qkv[..., :C].reshape(B, N, num_heads, hd).transpose(0, 2, 1, 3)
    q = q.reshape(B * num_heads, N, hd)
    kv = qkv[..., C:].reshape(B, N, 2, num_heads, hd).transpose(2, 0, 3, 1, 4)
    k = kv[0].reshape(B * num_heads, N, hd)
    v = kv[1].reshape(B * num_heads, N, hd)

    o = _attention_core(q, k, v, scale=float(hd) ** -0.5)
    o = o.reshape(B, num_heads, N, hd).transpose(0, 2, 1, 3).reshape(B * N, C)
    # proj linear with the residual add fused into the matmul epilogue
    x2d = _matmul_bias(o, att["wproj"], att["bproj"], residual=x2d)

    # ---- x = x + PVT2FFN(LayerNorm2(x)) ----------------------------------
    mlp = params["mlp"]
    hidden = mlp["w1"].shape[1]
    # Fuse LayerNorm2 with fc1: one pass over x2d.
    h = _ln_matmul_bias(x2d, params["norm2_g"], params["norm2_b"],
                        mlp["w1"], mlp["b1"])
    h = _dwconv3x3(h.reshape(B, H, W, hidden), mlp["dw_w"], mlp["dw_b"])
    # Exact (erf) GELU matching nn.GELU(); applied as XLA glue between kernels.
    h = jax.nn.gelu(h, approximate=False).reshape(B * N, hidden)
    x2d = _matmul_bias(h, mlp["w2"], mlp["b2"], residual=x2d)    # fc2 + residual

    return x2d.reshape(B, N, C)


def init_block_params(key, dim, num_heads, mlp_ratio):
    assert dim % num_heads == 0
    hidden = int(dim * mlp_ratio)
    ks = jax.random.split(key, 6)

    def trunc(k, shape):
        return 0.02 * jax.random.truncated_normal(k, -2.0, 2.0, shape, jnp.float32)

    return {
        "norm1_g": jnp.ones((dim,), jnp.float32),
        "norm1_b": jnp.zeros((dim,), jnp.float32),
        "norm2_g": jnp.ones((dim,), jnp.float32),
        "norm2_b": jnp.zeros((dim,), jnp.float32),
        "attn": {
            # nn.Linear weights stored transposed, i.e. (in, out), so y = x @ w + b.
            "wq": trunc(ks[0], (dim, dim)),
            "bq": jnp.zeros((dim,), jnp.float32),
            "wkv": trunc(ks[1], (dim, 2 * dim)),
            "bkv": jnp.zeros((2 * dim,), jnp.float32),
            "wproj": trunc(ks[2], (dim, dim)),
            "bproj": jnp.zeros((dim,), jnp.float32),
        },
        "mlp": {
            "w1": trunc(ks[3], (dim, hidden)),
            "b1": jnp.zeros((hidden,), jnp.float32),
            # Depthwise 3x3 weight: dw_w[kh*3+kw, c] == torch weight[c, 0, kh, kw];
            # conv init: normal(0, sqrt(2 / fan_out)), fan_out = 9*C/groups = 9.
            "dw_w": math.sqrt(2.0 / 9.0)
                    * jax.random.normal(ks[4], (9, hidden), jnp.float32),
            "dw_b": jnp.zeros((hidden,), jnp.float32),
            "w2": trunc(ks[5], (hidden, dim)),
            "b2": jnp.zeros((dim,), jnp.float32),
        },
    }


# ---- pure-JAX reference (for a correctness sanity check) --------------------

def _ref_layernorm(x, g, b):
    m = jnp.mean(x, axis=-1, keepdims=True)
    v = jnp.mean(jnp.square(x - m), axis=-1, keepdims=True)
    return (x - m) * jax.lax.rsqrt(v + 1e-5) * g + b


def _ref_block(params, x, H, W, num_heads):
    B, N, C = x.shape
    hd = C // num_heads
    att, mlp = params["attn"], params["mlp"]
    x2 = x.reshape(B * N, C)

    h = _ref_layernorm(x2, params["norm1_g"], params["norm1_b"])
    q = (h @ att["wq"] + att["bq"]).reshape(B, N, num_heads, hd).transpose(0, 2, 1, 3)
    kv = (h @ att["wkv"] + att["bkv"]).reshape(B, N, 2, num_heads, hd)
    kv = kv.transpose(2, 0, 3, 1, 4)
    k, v = kv[0], kv[1]
    a = jax.nn.softmax((q @ jnp.swapaxes(k, -1, -2)) * (float(hd) ** -0.5), axis=-1)
    o = (a @ v).transpose(0, 2, 1, 3).reshape(B * N, C)
    x2 = x2 + (o @ att["wproj"] + att["bproj"])

    h = _ref_layernorm(x2, params["norm2_g"], params["norm2_b"])
    hidden = mlp["w1"].shape[1]
    h = (h @ mlp["w1"] + mlp["b1"]).reshape(B, H, W, hidden)
    hp = jnp.pad(h, ((0, 0), (1, 1), (1, 1), (0, 0)))
    y = jnp.zeros_like(h)
    for t in range(9):
        kh, kw = divmod(t, 3)
        y = y + hp[:, kh:kh + H, kw:kw + W, :] * mlp["dw_w"][t]
    y = jax.nn.gelu(y + mlp["dw_b"], approximate=False).reshape(B * N, hidden)
    x2 = x2 + (y @ mlp["w2"] + mlp["b2"])
    return x2.reshape(B, N, C)


if __name__ == "__main__":
    key = jax.random.PRNGKey(0)
    kp, kx = jax.random.split(key)

    dim, num_heads, mlp_ratio = 64, 4, 4.0
    B, H, W = 2, 8, 8
    N = H * W

    params = init_block_params(kp, dim, num_heads, mlp_ratio)
    x = jax.random.normal(kx, (B, N, dim), dtype=jnp.float32)

    out = block_forward(params, x, H=H, W=W, num_heads=num_heads)
    out = jax.block_until_ready(out)

    assert out.shape == (B, N, dim), out.shape
    assert bool(jnp.all(jnp.isfinite(out)))
    ref = _ref_block(params, x, H, W, num_heads)
    assert bool(jnp.allclose(out, ref, rtol=5e-3, atol=5e-3)), (
        float(jnp.max(jnp.abs(out - ref))))
    print("KERNEL_OK")
</pallas_src>

<mosaic_0001>
module attributes {stable_mosaic.version = 11 : i64} {
  func.func @_ln_matmul_kernel(%arg0: i32, %arg1: i32, %arg2: memref<128x64xf32, #tpu.memory_space<vmem>>, %arg3: memref<1x64xf32, #tpu.memory_space<vmem>>, %arg4: memref<1x64xf32, #tpu.memory_space<vmem>>, %arg5: memref<64x192xf32, #tpu.memory_space<vmem>>, %arg6: memref<1x192xf32, #tpu.memory_space<vmem>>, %arg7: memref<128x192xf32, #tpu.memory_space<vmem>>, %arg8: memref<128x64xf32, #tpu.memory_space<vmem>>) attributes {dimension_semantics = [#tpu.dimension_semantics<parallel>, #tpu.dimension_semantics<arbitrary>], iteration_bounds = array<i64: 1, 1>, scalar_prefetch = 0 : i64, scratch_operands = 1 : i64, tpu.core_type = #tpu.core_type<tc>, window_params = [{transform_indices = @transform_0, window_bounds = array<i64: 128, 64>}, {pipeline_mode = #tpu.pipeline_mode<synchronous>, transform_indices = @transform_1, window_bounds = array<i64: 1, 64>}, {pipeline_mode = #tpu.pipeline_mode<synchronous>, transform_indices = @transform_2, window_bounds = array<i64: 1, 64>}, {transform_indices = @transform_3, window_bounds = array<i64: 64, 192>}, {transform_indices = @transform_4, window_bounds = array<i64: 1, 192>}, {transform_indices = @transform_5, window_bounds = array<i64: 128, 192>}]} {
    %c0_i32 = arith.constant 0 : i32
    %0 = arith.cmpi eq, %arg1, %c0_i32 : i32
    %1 = arith.extui %0 : i1 to i32
    %c0_i32_0 = arith.constant 0 : i32
    %2 = arith.cmpi ne, %1, %c0_i32_0 : i32
    scf.if %2 {
      %c0_8 = arith.constant 0 : index
      %c0_9 = arith.constant 0 : index
      %10 = vector.load %arg2[%c0_8, %c0_9] : memref<128x64xf32, #tpu.memory_space<vmem>>, vector<128x64xf32>
      %cst_10 = arith.constant dense<0.000000e+00> : vector<128xf32>
      %11 = vector.multi_reduction <add>, %10, %cst_10 [1] : vector<128x64xf32> to vector<128xf32>
      %12 = vector.shape_cast %11 : vector<128xf32> to vector<128x1xf32>
      %cst_11 = arith.constant 6.400000e+01 : f32
      %13 = vector.broadcast %cst_11 : f32 to vector<128x1xf32>
      %14 = arith.divf %12, %13 : vector<128x1xf32>
      %15 = vector.broadcast %14 : vector<128x1xf32> to vector<128x64xf32>
      %16 = arith.subf %10, %15 : vector<128x64xf32>
      %17 = arith.mulf %16, %16 : vector<128x64xf32>
      %cst_12 = arith.constant dense<0.000000e+00> : vector<128xf32>
      %18 = vector.multi_reduction <add>, %17, %cst_12 [1] : vector<128x64xf32> to vector<128xf32>
      %19 = vector.shape_cast %18 : vector<128xf32> to vector<128x1xf32>
      %cst_13 = arith.constant 6.400000e+01 : f32
      %20 = vector.broadcast %cst_13 : f32 to vector<128x1xf32>
      %21 = arith.divf %19, %20 : vector<128x1xf32>
      %22 = vector.broadcast %14 : vector<128x1xf32> to vector<128x64xf32>
      %23 = arith.subf %10, %22 : vector<128x64xf32>
      %cst_14 = arith.constant 9.99999974E-6 : f32
      %24 = vector.broadcast %cst_14 : f32 to vector<128x1xf32>
      %25 = arith.addf %21, %24 : vector<128x1xf32>
      %26 = math.rsqrt %25 : vector<128x1xf32>
      %27 = vector.broadcast %26 : vector<128x1xf32> to vector<128x64xf32>
      %28 = arith.mulf %23, %27 : vector<128x64xf32>
      %c0_15 = arith.constant 0 : index
      %c0_16 = arith.constant 0 : index
      %29 = vector.load %arg3[%c0_15, %c0_16] : memref<1x64xf32, #tpu.memory_space<vmem>>, vector<1x64xf32>
      %30 = vector.broadcast %29 : vector<1x64xf32> to vector<128x64xf32>
      %31 = arith.mulf %28, %30 : vector<128x64xf32>
      %c0_17 = arith.constant 0 : index
      %c0_18 = arith.constant 0 : index
      %32 = vector.load %arg4[%c0_17, %c0_18] : memref<1x64xf32, #tpu.memory_space<vmem>>, vector<1x64xf32>
      %33 = vector.broadcast %32 : vector<1x64xf32> to vector<128x64xf32>
      %34 = arith.addf %31, %33 : vector<128x64xf32>
      %c0_19 = arith.constant 0 : index
      %c0_20 = arith.constant 0 : index
      %35 = vector.load %arg8[%c0_19, %c0_20] : memref<128x64xf32, #tpu.memory_space<vmem>>, vector<128x64xf32>
      tpu.vector_store %arg8[%c0_19, %c0_20], %34 {strides = array<i32>} : memref<128x64xf32, #tpu.memory_space<vmem>>, vector<128x64xf32>,
    } else {
    }
    %c0 = arith.constant 0 : index
    %c0_1 = arith.constant 0 : index
    %3 = vector.load %arg8[%c0, %c0_1] : memref<128x64xf32, #tpu.memory_space<vmem>>, vector<128x64xf32>
    %c0_2 = arith.constant 0 : index
    %c0_3 = arith.constant 0 : index
    %4 = vector.load %arg5[%c0_2, %c0_3] : memref<64x192xf32, #tpu.memory_space<vmem>>, vector<64x192xf32>
    %cst = arith.constant dense<0.000000e+00> : vector<128x192xf32>
    %5 = tpu.matmul %3, %4, %cst {dimension_numbers = #tpu.dot_dimension_numbers<[1], [0], [0], [1], [0, 0, 1, 1], [], []>} : vector<128x64xf32>, vector<64x192xf32>, vector<128x192xf32> -> vector<128x192xf32>
    %c0_4 = arith.constant 0 : index
    %c0_5 = arith.constant 0 : index
    %6 = vector.load %arg6[%c0_4, %c0_5] : memref<1x192xf32, #tpu.memory_space<vmem>>, vector<1x192xf32>
    %7 = vector.broadcast %6 : vector<1x192xf32> to vector<128x192xf32>
    %8 = arith.addf %5, %7 : vector<128x192xf32>
    %c0_6 = arith.constant 0 : index
    %c0_7 = arith.constant 0 : index
    %9 = vector.load %arg7[%c0_6, %c0_7] : memref<128x192xf32, #tpu.memory_space<vmem>>, vector<128x192xf32>
    tpu.vector_store %arg7[%c0_6, %c0_7], %8 {strides = array<i32>} : memref<128x192xf32, #tpu.memory_space<vmem>>, vector<128x192xf32>,
    return
  }
  func.func @transform_0(%arg0: i32, %arg1: i32) -> (i32, i32) {
    %c0_i32 = arith.constant 0 : i32
    %c0_i32_0 = arith.constant 0 : i32
    return %arg0, %c0_i32 : i32, i32
  }
  func.func @transform_1(%arg0: i32, %arg1: i32) -> (i32, i32) {
    %c0_i32 = arith.constant 0 : i32
    %c0_i32_0 = arith.constant 0 : i32
    %c0_i32_1 = arith.constant 0 : i32
    return %c0_i32, %c0_i32_0 : i32, i32
  }
  func.func @transform_2(%arg0: i32, %arg1: i32) -> (i32, i32) {
    %c0_i32 = arith.constant 0 : i32
    %c0_i32_0 = arith.constant 0 : i32
    %c0_i32_1 = arith.constant 0 : i32
    return %c0_i32, %c0_i32_0 : i32, i32
  }
  func.func @transform_3(%arg0: i32, %arg1: i32) -> (i32, i32) {
    %c0_i32 = arith.constant 0 : i32
    %c0_i32_0 = arith.constant 0 : i32
    return %c0_i32, %arg1 : i32, i32
  }
  func.func @transform_4(%arg0: i32, %arg1: i32) -> (i32, i32) {
    %c0_i32 = arith.constant 0 : i32
    %c0_i32_0 = arith.constant 0 : i32
    return %c0_i32, %arg1 : i32, i32
  }
  func.func @transform_5(%arg0: i32, %arg1: i32) -> (i32, i32) {
    %c0_i32 = arith.constant 0 : i32
    return %arg0, %arg1 : i32, i32
  }
}

module attributes {stable_mosaic.version = 11 : i64} {
  func.func @_flash_attn_kernel(%arg0: i32, %arg1: i32, %arg2: i32, %arg3: memref<1x64x16xf32, #tpu.memory_space<vmem>>, %arg4: memref<1x64x16xf32, #tpu.memory_space<vmem>>, %arg5: memref<1x64x16xf32, #tpu.memory_space<vmem>>, %arg6: memref<1x64x16xf32, #tpu.memory_space<vmem>>, %arg7: memref<1x64x1xf32, #tpu.memory_space<vmem>>, %arg8: memref<1x64x1xf32, #tpu.memory_space<vmem>>, %arg9: memref<1x64x16xf32, #tpu.memory_space<vmem>>) attributes {dimension_semantics = [#tpu.dimension_semantics<parallel>, #tpu.dimension_semantics<parallel>, #tpu.dimension_semantics<arbitrary>], iteration_bounds = array<i64: 8, 1, 1>, scalar_prefetch = 0 : i64, scratch_operands = 3 : i64, tpu.core_type = #tpu.core_type<tc>, window_params = [{transform_indices = @transform_0, window_bounds = array<i64: 1, 64, 16>}, {transform_indices = @transform_1, window_bounds = array<i64: 1, 64, 16>}, {transform_indices = @transform_2, window_bounds = array<i64: 1, 64, 16>}, {transform_indices = @transform_3, window_bounds = array<i64: 1, 64, 16>}]} {
    %c0_i32 = arith.constant 0 : i32
    %0 = arith.cmpi eq, %arg2, %c0_i32 : i32
    %1 = arith.extui %0 : i1 to i32
    %c0_i32_0 = arith.constant 0 : i32
    %2 = arith.cmpi ne, %1, %c0_i32_0 : i32
    scf.if %2 {
      %cst_33 = arith.constant 0xFF800000 : f32
      %34 = vector.broadcast %cst_33 : f32 to vector<1x64x1xf32>
      %c0_34 = arith.constant 0 : index
      %c0_35 = arith.constant 0 : index
      %c0_36 = arith.constant 0 : index
      %35 = vector.load %arg7[%c0_34, %c0_35, %c0_36] : memref<1x64x1xf32, #tpu.memory_space<vmem>>, vector<1x64x1xf32>
      tpu.vector_store %arg7[%c0_34, %c0_35, %c0_36], %34 {strides = array<i32>} : memref<1x64x1xf32, #tpu.memory_space<vmem>>, vector<1x64x1xf32>,
      %cst_37 = arith.constant 0.000000e+00 : f32
      %36 = vector.broadcast %cst_37 : f32 to vector<1x64x1xf32>
      %c0_38 = arith.constant 0 : index
      %c0_39 = arith.constant 0 : index
      %c0_40 = arith.constant 0 : index
      %37 = vector.load %arg8[%c0_38, %c0_39, %c0_40] : memref<1x64x1xf32, #tpu.memory_space<vmem>>, vector<1x64x1xf32>
      tpu.vector_store %arg8[%c0_38, %c0_39, %c0_40], %36 {strides = array<i32>} : memref<1x64x1xf32, #tpu.memory_space<vmem>>, vector<1x64x1xf32>,
      %cst_41 = arith.constant 0.000000e+00 : f32
      %38 = vector.broadcast %cst_41 : f32 to vector<1x64x16xf32>
      %c0_42 = arith.constant 0 : index
      %c0_43 = arith.constant 0 : index
      %c0_44 = arith.constant 0 : index
      %39 = vector.load %arg9[%c0_42, %c0_43, %c0_44] : memref<1x64x16xf32, #tpu.memory_space<vmem>>, vector<1x64x16xf32>
      tpu.vector_store %arg9[%c0_42, %c0_43, %c0_44], %38 {strides = array<i32>} : memref<1x64x16xf32, #tpu.memory_space<vmem>>, vector<1x64x16xf32>,
    } else {
    }
    %c0 = arith.constant 0 : index
    %c0_1 = arith.constant 0 : index
    %c0_2 = arith.constant 0 : index
    %3 = vector.load %arg3[%c0, %c0_1, %c0_2] : memref<1x64x16xf32, #tpu.memory_space<vmem>>, vector<1x64x16xf32>
    %c0_3 = arith.constant 0 : index
    %c0_4 = arith.constant 0 : index
    %c0_5 = arith.constant 0 : index
    %4 = vector.load %arg4[%c0_3, %c0_4, %c0_5] : memref<1x64x16xf32, #tpu.memory_space<vmem>>, vector<1x64x16xf32>
    "tpu.trace_start"() <{level = 10 : i32, message = "bqd,bkd->bqk"}> : () -> ()
    %cst = arith.constant dense<0.000000e+00> : vector<1x64x64xf32>
    %5 = tpu.matmul %3, %4, %cst {dimension_numbers = #tpu.dot_dimension_numbers<[2], [2], [1], [1], [0, 0, 0, 1, 1, 1], [0], [0]>} : vector<1x64x16xf32>, vector<1x64x16xf32>, vector<1x64x64xf32> -> vector<1x64x64xf32>
    "tpu.trace_stop"() : () -> ()
    %cst_6 = arith.constant 2.500000e-01 : f32
    %6 = vector.broadcast %cst_6 : f32 to vector<1x64x64xf32>
    %7 = arith.mulf %5, %6 : vector<1x64x64xf32>
    %c0_7 = arith.constant 0 : index
    %c0_8 = arith.constant 0 : index
    %c0_9 = arith.constant 0 : index
    %8 = vector.load %arg7[%c0_7, %c0_8, %c0_9] : memref<1x64x1xf32, #tpu.memory_space<vmem>>, vector<1x64x1xf32>
    %cst_10 = arith.constant dense<0xFF800000> : vector<1x64xf32>
    %9 = vector.multi_reduction <maximumf>, %7, %cst_10 [2] : vector<1x64x64xf32> to vector<1x64xf32>
    %10 = vector.shape_cast %9 : vector<1x64xf32> to vector<1x64x1xf32>
    %11 = arith.maximumf %8, %10 : vector<1x64x1xf32>
    %12 = arith.subf %8, %11 : vector<1x64x1xf32>
    %13 = math.exp %12 : vector<1x64x1xf32>
    %14 = vector.broadcast %11 : vector<1x64x1xf32> to vector<1x64x64xf32>
    %15 = arith.subf %7, %14 : vector<1x64x64xf32>
    %16 = math.exp %15 : vector<1x64x64xf32>
    %c0_11 = arith.constant 0 : index
    %c0_12 = arith.constant 0 : index
    %c0_13 = arith.constant 0 : index
    %17 = vector.load %arg8[%c0_11, %c0_12, %c0_13] : memref<1x64x1xf32, #tpu.memory_space<vmem>>, vector<1x64x1xf32>
    %18 = arith.mulf %13, %17 : vector<1x64x1xf32>
    %cst_14 = arith.constant dense<0.000000e+00> : vector<1x64xf32>
    %19 = vector.multi_reduction <add>, %16, %cst_14 [2] : vector<1x64x64xf32> to vector<1x64xf32>
    %20 = vector.shape_cast %19 : vector<1x64xf32> to vector<1x64x1xf32>
    %21 = arith.addf %18, %20 : vector<1x64x1xf32>
    %c0_15 = arith.constant 0 : index
    %c0_16 = arith.constant 0 : index
    %c0_17 = arith.constant 0 : index
    %22 = vector.load %arg8[%c0_15, %c0_16, %c0_17] : memref<1x64x1xf32, #tpu.memory_space<vmem>>, vector<1x64x1xf32>
    tpu.vector_store %arg8[%c0_15, %c0_16, %c0_17], %21 {strides = array<i32>} : memref<1x64x1xf32, #tpu.memory_space<vmem>>, vector<1x64x1xf32>,
    %c0_18 = arith.constant 0 : index
    %c0_19 = arith.constant 0 : index
    %c0_20 = arith.constant 0 : index
    %23 = vector.load %arg9[%c0_18, %c0_19, %c0_20] : memref<1x64x16xf32, #tpu.memory_space<vmem>>, vector<1x64x16xf32>
    %24 = vector.broadcast %13 : vector<1x64x1xf32> to vector<1x64x16xf32>
    %25 = arith.mulf %24, %23 : vector<1x64x16xf32>
    %c0_21 = arith.constant 0 : index
    %c0_22 = arith.constant 0 : index
    %c0_23 = arith.constant 0 : index
    %26 = vector.load %arg5[%c0_21, %c0_22, %c0_23] : memref<1x64x16xf32, #tpu.memory_space<vmem>>, vector<1x64x16xf32>
    "tpu.trace_start"() <{level = 10 : i32, message = "bqk,bkd->bqd"}> : () -> ()
    %cst_24 = arith.constant dense<0.000000e+00> : vector<1x64x16xf32>
    %27 = tpu.matmul %16, %26, %cst_24 {dimension_numbers = #tpu.dot_dimension_numbers<[2], [1], [1], [2], [0, 0, 0, 1, 1, 2], [0], [0]>} : vector<1x64x64xf32>, vector<1x64x16xf32>, vector<1x64x16xf32> -> vector<1x64x16xf32>
    "tpu.trace_stop"() : () -> ()
    %28 = arith.addf %25, %27 : vector<1x64x16xf32>
    %c0_25 = arith.constant 0 : index
    %c0_26 = arith.constant 0 : index
    %c0_27 = arith.constant 0 : index
    %29 = vector.load %arg9[%c0_25, %c0_26, %c0_27] : memref<1x64x16xf32, #tpu.memory_space<vmem>>, vector<1x64x16xf32>
    tpu.vector_store %arg9[%c0_25, %c0_26, %c0_27], %28 {strides = array<i32>} : memref<1x64x16xf32, #tpu.memory_space<vmem>>, vector<1x64x16xf32>,
    %c0_28 = arith.constant 0 : index
    %c0_29 = arith.constant 0 : index
    %c0_30 = arith.constant 0 : index
    %30 = vector.load %arg7[%c0_28, %c0_29, %c0_30] : memref<1x64x1xf32, #tpu.memory_space<vmem>>, vector<1x64x1xf32>
    tpu.vector_store %arg7[%c0_28, %c0_29, %c0_30], %11 {strides = array<i32>} : memref<1x64x1xf32, #tpu.memory_space<vmem>>, vector<1x64x1xf32>,
    %c0_i32_31 = arith.constant 0 : i32
    %31 = arith.cmpi eq, %arg2, %c0_i32_31 : i32
    %32 = arith.extui %31 : i1 to i32
    %c0_i32_32 = arith.constant 0 : i32
    %33 = arith.cmpi ne, %32, %c0_i32_32 : i32
    scf.if %33 {
      %c0_33 = arith.constant 0 : index
      %c0_34 = arith.constant 0 : index
      %c0_35 = arith.constant 0 : index
      %34 = vector.load %arg9[%c0_33, %c0_34, %c0_35] : memref<1x64x16xf32, #tpu.memory_space<vmem>>, vector<1x64x16xf32>
      %c0_36 = arith.constant 0 : index
      %c0_37 = arith.constant 0 : index
      %c0_38 = arith.constant 0 : index
      %35 = vector.load %arg8[%c0_36, %c0_37, %c0_38] : memref<1x64x1xf32, #tpu.memory_space<vmem>>, vector<1x64x1xf32>
      %36 = vector.broadcast %35 : vector<1x64x1xf32> to vector<1x64x16xf32>
      %37 = arith.divf %34, %36 : vector<1x64x16xf32>
      %c0_39 = arith.constant 0 : index
      %c0_40 = arith.constant 0 : index
      %c0_41 = arith.constant 0 : index
      %38 = vector.load %arg6[%c0_39, %c0_40, %c0_41] : memref<1x64x16xf32, #tpu.memory_space<vmem>>, vector<1x64x16xf32>
      tpu.vector_store %arg6[%c0_39, %c0_40, %c0_41], %37 {strides = array<i32>} : memref<1x64x16xf32, #tpu.memory_space<vmem>>, vector<1x64x16xf32>,
    } else {
    }
    return
  }
  func.func @transform_0(%arg0: i32, %arg1: i32, %arg2: i32) -> (i32, i32, i32) {
    %c0_i32 = arith.constant 0 : i32
    %c0_i32_0 = arith.constant 0 : i32
    return %arg0, %arg1, %c0_i32 : i32, i32, i32
  }
  func.func @transform_1(%arg0: i32, %arg1: i32, %arg2: i32) -> (i32, i32, i32) {
    %c0_i32 = arith.constant 0 : i32
    %c0_i32_0 = arith.constant 0 : i32
    return %arg0, %arg2, %c0_i32 : i32, i32, i32
  }
  func.func @transform_2(%arg0: i32, %arg1: i32, %arg2: i32) -> (i32, i32, i32) {
    %c0_i32 = arith.constant 0 : i32
    %c0_i32_0 = arith.constant 0 : i32
    return %arg0, %arg2, %c0_i32 : i32, i32, i32
  }
  func.func @transform_3(%arg0: i32, %arg1: i32, %arg2: i32) -> (i32, i32, i32) {
    %c0_i32 = arith.constant 0 : i32
    %c0_i32_0 = arith.constant 0 : i32
    return %arg0, %arg1, %c0_i32 : i32, i32, i32
  }
}

module attributes {stable_mosaic.version = 11 : i64} {
  func.func @kernel(%arg0: i32, %arg1: i32, %arg2: i32, %arg3: memref<128x64xf32, #tpu.memory_space<vmem>>, %arg4: memref<64x64xf32, #tpu.memory_space<vmem>>, %arg5: memref<1x64xf32, #tpu.memory_space<vmem>>, %arg6: memref<128x64xf32, #tpu.memory_space<vmem>>, %arg7: memref<128x64xf32, #tpu.memory_space<vmem>>, %arg8: memref<128x64xf32, #tpu.memory_space<vmem>>) attributes {dimension_semantics = [#tpu.dimension_semantics<parallel>, #tpu.dimension_semantics<parallel>, #tpu.dimension_semantics<arbitrary>], iteration_bounds = array<i64: 1, 1, 1>, scalar_prefetch = 0 : i64, scratch_operands = 1 : i64, tpu.core_type = #tpu.core_type<tc>, window_params = [{transform_indices = @transform_0, window_bounds = array<i64: 128, 64>}, {transform_indices = @transform_1, window_bounds = array<i64: 64, 64>}, {transform_indices = @transform_2, window_bounds = array<i64: 1, 64>}, {transform_indices = @transform_3, window_bounds = array<i64: 128, 64>}, {transform_indices = @transform_4, window_bounds = array<i64: 128, 64>}]} {
    %c0_i32 = arith.constant 0 : i32
    %0 = arith.cmpi eq, %arg2, %c0_i32 : i32
    %1 = arith.extui %0 : i1 to i32
    %c0_i32_0 = arith.constant 0 : i32
    %2 = arith.cmpi ne, %1, %c0_i32_0 : i32
    scf.if %2 {
      %cst_10 = arith.constant 0.000000e+00 : f32
      %12 = vector.broadcast %cst_10 : f32 to vector<128x64xf32>
      %c0_11 = arith.constant 0 : index
      %c0_12 = arith.constant 0 : index
      %13 = vector.load %arg8[%c0_11, %c0_12] : memref<128x64xf32, #tpu.memory_space<vmem>>, vector<128x64xf32>
      tpu.vector_store %arg8[%c0_11, %c0_12], %12 {strides = array<i32>} : memref<128x64xf32, #tpu.memory_space<vmem>>, vector<128x64xf32>,
    } else {
    }
    %c0 = arith.constant 0 : index
    %c0_1 = arith.constant 0 : index
    %3 = vector.load %arg8[%c0, %c0_1] : memref<128x64xf32, #tpu.memory_space<vmem>>, vector<128x64xf32>
    %c0_2 = arith.constant 0 : index
    %c0_3 = arith.constant 0 : index
    %4 = vector.load %arg3[%c0_2, %c0_3] : memref<128x64xf32, #tpu.memory_space<vmem>>, vector<128x64xf32>
    %c0_4 = arith.constant 0 : index
    %c0_5 = arith.constant 0 : index
    %5 = vector.load %arg4[%c0_4, %c0_5] : memref<64x64xf32, #tpu.memory_space<vmem>>, vector<64x64xf32>
    %cst = arith.constant dense<0.000000e+00> : vector<128x64xf32>
    %6 = tpu.matmul %4, %5, %cst {dimension_numbers = #tpu.dot_dimension_numbers<[1], [0], [0], [1], [0, 0, 1, 1], [], []>} : vector<128x64xf32>, vector<64x64xf32>, vector<128x64xf32> -> vector<128x64xf32>
    %7 = arith.addf %3, %6 : vector<128x64xf32>
    %c0_6 = arith.constant 0 : index
    %c0_7 = arith.constant 0 : index
    %8 = vector.load %arg8[%c0_6, %c0_7] : memref<128x64xf32, #tpu.memory_space<vmem>>, vector<128x64xf32>
    tpu.vector_store %arg8[%c0_6, %c0_7], %7 {strides = array<i32>} : memref<128x64xf32, #tpu.memory_space<vmem>>, vector<128x64xf32>,
    %c0_i32_8 = arith.constant 0 : i32
    %9 = arith.cmpi eq, %arg2, %c0_i32_8 : i32
    %10 = arith.extui %9 : i1 to i32
    %c0_i32_9 = arith.constant 0 : i32
    %11 = arith.cmpi ne, %10, %c0_i32_9 : i32
    scf.if %11 {
      %c0_10 = arith.constant 0 : index
      %c0_11 = arith.constant 0 : index
      %12 = vector.load %arg8[%c0_10, %c0_11] : memref<128x64xf32, #tpu.memory_space<vmem>>, vector<128x64xf32>
      %c0_12 = arith.constant 0 : index
      %c0_13 = arith.constant 0 : index
      %13 = vector.load %arg5[%c0_12, %c0_13] : memref<1x64xf32, #tpu.memory_space<vmem>>, vector<1x64xf32>
      %14 = vector.broadcast %13 : vector<1x64xf32> to vector<128x64xf32>
      %15 = arith.addf %12, %14 : vector<128x64xf32>
      %c0_14 = arith.constant 0 : index
      %c0_15 = arith.constant 0 : index
      %16 = vector.load %arg6[%c0_14, %c0_15] : memref<128x64xf32, #tpu.memory_space<vmem>>, vector<128x64xf32>
      %17 = arith.addf %15, %16 : vector<128x64xf32>
      %c0_16 = arith.constant 0 : index
      %c0_17 = arith.constant 0 : index
      %18 = vector.load %arg7[%c0_16, %c0_17] : memref<128x64xf32, #tpu.memory_space<vmem>>, vector<128x64xf32>
      tpu.vector_store %arg7[%c0_16, %c0_17], %17 {strides = array<i32>} : memref<128x64xf32, #tpu.memory_space<vmem>>, vector<128x64xf32>,
    } else {
    }
    return
  }
  func.func @transform_0(%arg0: i32, %arg1: i32, %arg2: i32) -> (i32, i32) {
    %c0_i32 = arith.constant 0 : i32
    return %arg0, %arg2 : i32, i32
  }
  func.func @transform_1(%arg0: i32, %arg1: i32, %arg2: i32) -> (i32, i32) {
    %c0_i32 = arith.constant 0 : i32
    return %arg2, %arg1 : i32, i32
  }
  func.func @transform_2(%arg0: i32, %arg1: i32, %arg2: i32) -> (i32, i32) {
    %c0_i32 = arith.constant 0 : i32
    %c0_i32_0 = arith.constant 0 : i32
    return %c0_i32, %arg1 : i32, i32
  }
  func.func @transform_3(%arg0: i32, %arg1: i32, %arg2: i32) -> (i32, i32) {
    %c0_i32 = arith.constant 0 : i32
    return %arg0, %arg1 : i32, i32
  }
  func.func @transform_4(%arg0: i32, %arg1: i32, %arg2: i32) -> (i32, i32) {
    %c0_i32 = arith.constant 0 : i32
    return %arg0, %arg1 : i32, i32
  }
}

module attributes {stable_mosaic.version = 11 : i64} {
  func.func @_ln_matmul_kernel(%arg0: i32, %arg1: i32, %arg2: memref<128x64xf32, #tpu.memory_space<vmem>>, %arg3: memref<1x64xf32, #tpu.memory_space<vmem>>, %arg4: memref<1x64xf32, #tpu.memory_space<vmem>>, %arg5: memref<64x256xf32, #tpu.memory_space<vmem>>, %arg6: memref<1x256xf32, #tpu.memory_space<vmem>>, %arg7: memref<128x256xf32, #tpu.memory_space<vmem>>, %arg8: memref<128x64xf32, #tpu.memory_space<vmem>>) attributes {dimension_semantics = [#tpu.dimension_semantics<parallel>, #tpu.dimension_semantics<arbitrary>], iteration_bounds = array<i64: 1, 1>, scalar_prefetch = 0 : i64, scratch_operands = 1 : i64, tpu.core_type = #tpu.core_type<tc>, window_params = [{transform_indices = @transform_0, window_bounds = array<i64: 128, 64>}, {pipeline_mode = #tpu.pipeline_mode<synchronous>, transform_indices = @transform_1, window_bounds = array<i64: 1, 64>}, {pipeline_mode = #tpu.pipeline_mode<synchronous>, transform_indices = @transform_2, window_bounds = array<i64: 1, 64>}, {transform_indices = @transform_3, window_bounds = array<i64: 64, 256>}, {transform_indices = @transform_4, window_bounds = array<i64: 1, 256>}, {transform_indices = @transform_5, window_bounds = array<i64: 128, 256>}]} {
    %c0_i32 = arith.constant 0 : i32
    %0 = arith.cmpi eq, %arg1, %c0_i32 : i32
    %1 = arith.extui %0 : i1 to i32
    %c0_i32_0 = arith.constant 0 : i32
    %2 = arith.cmpi ne, %1, %c0_i32_0 : i32
    scf.if %2 {
      %c0_8 = arith.constant 0 : index
      %c0_9 = arith.constant 0 : index
      %10 = vector.load %arg2[%c0_8, %c0_9] : memref<128x64xf32, #tpu.memory_space<vmem>>, vector<128x64xf32>
      %cst_10 = arith.constant dense<0.000000e+00> : vector<128xf32>
      %11 = vector.multi_reduction <add>, %10, %cst_10 [1] : vector<128x64xf32> to vector<128xf32>
      %12 = vector.shape_cast %11 : vector<128xf32> to vector<128x1xf32>
      %cst_11 = arith.constant 6.400000e+01 : f32
      %13 = vector.broadcast %cst_11 : f32 to vector<128x1xf32>
      %14 = arith.divf %12, %13 : vector<128x1xf32>
      %15 = vector.broadcast %14 : vector<128x1xf32> to vector<128x64xf32>
      %16 = arith.subf %10, %15 : vector<128x64xf32>
      %17 = arith.mulf %16, %16 : vector<128x64xf32>
      %cst_12 = arith.constant dense<0.000000e+00> : vector<128xf32>
      %18 = vector.multi_reduction <add>, %17, %cst_12 [1] : vector<128x64xf32> to vector<128xf32>
      %19 = vector.shape_cast %18 : vector<128xf32> to vector<128x1xf32>
      %cst_13 = arith.constant 6.400000e+01 : f32
      %20 = vector.broadcast %cst_13 : f32 to vector<128x1xf32>
      %21 = arith.divf %19, %20 : vector<128x1xf32>
      %22 = vector.broadcast %14 : vector<128x1xf32> to vector<128x64xf32>
      %23 = arith.subf %10, %22 : vector<128x64xf32>
      %cst_14 = arith.constant 9.99999974E-6 : f32
      %24 = vector.broadcast %cst_14 : f32 to vector<128x1xf32>
      %25 = arith.addf %21, %24 : vector<128x1xf32>
      %26 = math.rsqrt %25 : vector<128x1xf32>
      %27 = vector.broadcast %26 : vector<128x1xf32> to vector<128x64xf32>
      %28 = arith.mulf %23, %27 : vector<128x64xf32>
      %c0_15 = arith.constant 0 : index
      %c0_16 = arith.constant 0 : index
      %29 = vector.load %arg3[%c0_15, %c0_16] : memref<1x64xf32, #tpu.memory_space<vmem>>, vector<1x64xf32>
      %30 = vector.broadcast %29 : vector<1x64xf32> to vector<128x64xf32>
      %31 = arith.mulf %28, %30 : vector<128x64xf32>
      %c0_17 = arith.constant 0 : index
      %c0_18 = arith.constant 0 : index
      %32 = vector.load %arg4[%c0_17, %c0_18] : memref<1x64xf32, #tpu.memory_space<vmem>>, vector<1x64xf32>
      %33 = vector.broadcast %32 : vector<1x64xf32> to vector<128x64xf32>
      %34 = arith.addf %31, %33 : vector<128x64xf32>
      %c0_19 = arith.constant 0 : index
      %c0_20 = arith.constant 0 : index
      %35 = vector.load %arg8[%c0_19, %c0_20] : memref<128x64xf32, #tpu.memory_space<vmem>>, vector<128x64xf32>
      tpu.vector_store %arg8[%c0_19, %c0_20], %34 {strides = array<i32>} : memref<128x64xf32, #tpu.memory_space<vmem>>, vector<128x64xf32>,
    } else {
    }
    %c0 = arith.constant 0 : index
    %c0_1 = arith.constant 0 : index
    %3 = vector.load %arg8[%c0, %c0_1] : memref<128x64xf32, #tpu.memory_space<vmem>>, vector<128x64xf32>
    %c0_2 = arith.constant 0 : index
    %c0_3 = arith.constant 0 : index
    %4 = vector.load %arg5[%c0_2, %c0_3] : memref<64x256xf32, #tpu.memory_space<vmem>>, vector<64x256xf32>
    %cst = arith.constant dense<0.000000e+00> : vector<128x256xf32>
    %5 = tpu.matmul %3, %4, %cst {dimension_numbers = #tpu.dot_dimension_numbers<[1], [0], [0], [1], [0, 0, 1, 1], [], []>} : vector<128x64xf32>, vector<64x256xf32>, vector<128x256xf32> -> vector<128x256xf32>
    %c0_4 = arith.constant 0 : index
    %c0_5 = arith.constant 0 : index
    %6 = vector.load %arg6[%c0_4, %c0_5] : memref<1x256xf32, #tpu.memory_space<vmem>>, vector<1x256xf32>
    %7 = vector.broadcast %6 : vector<1x256xf32> to vector<128x256xf32>
    %8 = arith.addf %5, %7 : vector<128x256xf32>
    %c0_6 = arith.constant 0 : index
    %c0_7 = arith.constant 0 : index
    %9 = vector.load %arg7[%c0_6, %c0_7] : memref<128x256xf32, #tpu.memory_space<vmem>>, vector<128x256xf32>
    tpu.vector_store %arg7[%c0_6, %c0_7], %8 {strides = array<i32>} : memref<128x256xf32, #tpu.memory_space<vmem>>, vector<128x256xf32>,
    return
  }
  func.func @transform_0(%arg0: i32, %arg1: i32) -> (i32, i32) {
    %c0_i32 = arith.constant 0 : i32
    %c0_i32_0 = arith.constant 0 : i32
    return %arg0, %c0_i32 : i32, i32
  }
  func.func @transform_1(%arg0: i32, %arg1: i32) -> (i32, i32) {
    %c0_i32 = arith.constant 0 : i32
    %c0_i32_0 = arith.constant 0 : i32
    %c0_i32_1 = arith.constant 0 : i32
    return %c0_i32, %c0_i32_0 : i32, i32
  }
  func.func @transform_2(%arg0: i32, %arg1: i32) -> (i32, i32) {
    %c0_i32 = arith.constant 0 : i32
    %c0_i32_0 = arith.constant 0 : i32
    %c0_i32_1 = arith.constant 0 : i32
    return %c0_i32, %c0_i32_0 : i32, i32
  }
  func.func @transform_3(%arg0: i32, %arg1: i32) -> (i32, i32) {
    %c0_i32 = arith.constant 0 : i32
    %c0_i32_0 = arith.constant 0 : i32
    return %c0_i32, %arg1 : i32, i32
  }
  func.func @transform_4(%arg0: i32, %arg1: i32) -> (i32, i32) {
    %c0_i32 = arith.constant 0 : i32
    %c0_i32_0 = arith.constant 0 : i32
    return %c0_i32, %arg1 : i32, i32
  }
  func.func @transform_5(%arg0: i32, %arg1: i32) -> (i32, i32) {
    %c0_i32 = arith.constant 0 : i32
    return %arg0, %arg1 : i32, i32
  }
}

module attributes {stable_mosaic.version = 11 : i64} {
  func.func @_dwconv3x3_kernel(%arg0: i32, %arg1: i32, %arg2: memref<1x10x10x256xf32, #tpu.memory_space<vmem>>, %arg3: memref<9x256xf32, #tpu.memory_space<vmem>>, %arg4: memref<1x256xf32, #tpu.memory_space<vmem>>, %arg5: memref<1x8x8x256xf32, #tpu.memory_space<vmem>>) attributes {dimension_semantics = [#tpu.dimension_semantics<parallel>, #tpu.dimension_semantics<parallel>], iteration_bounds = array<i64: 2, 1>, scalar_prefetch = 0 : i64, scratch_operands = 0 : i64, tpu.core_type = #tpu.core_type<tc>, window_params = [{transform_indices = @transform_0, window_bounds = array<i64: 1, 10, 10, 256>}, {transform_indices = @transform_1, window_bounds = array<i64: 9, 256>}, {transform_indices = @transform_2, window_bounds = array<i64: 1, 256>}, {transform_indices = @transform_3, window_bounds = array<i64: 1, 8, 8, 256>}]} {
    %c0 = arith.constant 0 : index
    %c0_0 = arith.constant 0 : index
    %c0_1 = arith.constant 0 : index
    %c0_2 = arith.constant 0 : index
    %0 = vector.load %arg2[%c0, %c0_0, %c0_1, %c0_2] : memref<1x10x10x256xf32, #tpu.memory_space<vmem>>, vector<1x10x10x256xf32>
    %1 = vector.extract_strided_slice %0 {offsets = [0, 0, 0, 0], sizes = [1, 8, 8, 256], strides = [1, 1, 1, 1]} : vector<1x10x10x256xf32> to vector<1x8x8x256xf32>
    %c0_3 = arith.constant 0 : index
    %c0_4 = arith.constant 0 : index
    %2 = vector.load %arg3[%c0_3, %c0_4] : memref<9x256xf32, #tpu.memory_space<vmem>>, vector<1x256xf32>
    %3 = vector.shape_cast %2 : vector<1x256xf32> to vector<256xf32>
    %4 = vector.shape_cast %3 : vector<256xf32> to vector<1x1x1x256xf32>
    %5 = vector.broadcast %4 : vector<1x1x1x256xf32> to vector<1x8x8x256xf32>
    %6 = arith.mulf %1, %5 : vector<1x8x8x256xf32>
    %7 = vector.extract_strided_slice %0 {offsets = [0, 0, 1, 0], sizes = [1, 8, 8, 256], strides = [1, 1, 1, 1]} : vector<1x10x10x256xf32> to vector<1x8x8x256xf32>
    %c1 = arith.constant 1 : index
    %c0_5 = arith.constant 0 : index
    %8 = vector.load %arg3[%c1, %c0_5] : memref<9x256xf32, #tpu.memory_space<vmem>>, vector<1x256xf32>
    %9 = vector.shape_cast %8 : vector<1x256xf32> to vector<256xf32>
    %10 = vector.shape_cast %9 : vector<256xf32> to vector<1x1x1x256xf32>
    %11 = vector.broadcast %10 : vector<1x1x1x256xf32> to vector<1x8x8x256xf32>
    %12 = arith.mulf %7, %11 : vector<1x8x8x256xf32>
    %13 = arith.addf %6, %12 : vector<1x8x8x256xf32>
    %14 = vector.extract_strided_slice %0 {offsets = [0, 0, 2, 0], sizes = [1, 8, 8, 256], strides = [1, 1, 1, 1]} : vector<1x10x10x256xf32> to vector<1x8x8x256xf32>
    %c2 = arith.constant 2 : index
    %c0_6 = arith.constant 0 : index
    %15 = vector.load %arg3[%c2, %c0_6] : memref<9x256xf32, #tpu.memory_space<vmem>>, vector<1x256xf32>
    %16 = vector.shape_cast %15 : vector<1x256xf32> to vector<256xf32>
    %17 = vector.shape_cast %16 : vector<256xf32> to vector<1x1x1x256xf32>
    %18 = vector.broadcast %17 : vector<1x1x1x256xf32> to vector<1x8x8x256xf32>
    %19 = arith.mulf %14, %18 : vector<1x8x8x256xf32>
    %20 = arith.addf %13, %19 : vector<1x8x8x256xf32>
    %21 = vector.extract_strided_slice %0 {offsets = [0, 1, 0, 0], sizes = [1, 8, 8, 256], strides = [1, 1, 1, 1]} : vector<1x10x10x256xf32> to vector<1x8x8x256xf32>
    %c3 = arith.constant 3 : index
    %c0_7 = arith.constant 0 : index
    %22 = vector.load %arg3[%c3, %c0_7] : memref<9x256xf32, #tpu.memory_space<vmem>>, vector<1x256xf32>
    %23 = vector.shape_cast %22 : vector<1x256xf32> to vector<256xf32>
    %24 = vector.shape_cast %23 : vector<256xf32> to vector<1x1x1x256xf32>
    %25 = vector.broadcast %24 : vector<1x1x1x256xf32> to vector<1x8x8x256xf32>
    %26 = arith.mulf %21, %25 : vector<1x8x8x256xf32>
    %27 = arith.addf %20, %26 : vector<1x8x8x256xf32>
    %28 = vector.extract_strided_slice %0 {offsets = [0, 1, 1, 0], sizes = [1, 8, 8, 256], strides = [1, 1, 1, 1]} : vector<1x10x10x256xf32> to vector<1x8x8x256xf32>
    %c4 = arith.constant 4 : index
    %c0_8 = arith.constant 0 : index
    %29 = vector.load %arg3[%c4, %c0_8] : memref<9x256xf32, #tpu.memory_space<vmem>>, vector<1x256xf32>
    %30 = vector.shape_cast %29 : vector<1x256xf32> to vector<256xf32>
    %31 = vector.shape_cast %30 : vector<256xf32> to vector<1x1x1x256xf32>
    %32 = vector.broadcast %31 : vector<1x1x1x256xf32> to vector<1x8x8x256xf32>
    %33 = arith.mulf %28, %32 : vector<1x8x8x256xf32>
    %34 = arith.addf %27, %33 : vector<1x8x8x256xf32>
    %35 = vector.extract_strided_slice %0 {offsets = [0, 1, 2, 0], sizes = [1, 8, 8, 256], strides = [1, 1, 1, 1]} : vector<1x10x10x256xf32> to vector<1x8x8x256xf32>
    %c5 = arith.constant 5 : index
    %c0_9 = arith.constant 0 : index
    %36 = vector.load %arg3[%c5, %c0_9] : memref<9x256xf32, #tpu.memory_space<vmem>>, vector<1x256xf32>
    %37 = vector.shape_cast %36 : vector<1x256xf32> to vector<256xf32>
    %38 = vector.shape_cast %37 : vector<256xf32> to vector<1x1x1x256xf32>
    %39 = vector.broadcast %38 : vector<1x1x1x256xf32> to vector<1x8x8x256xf32>
    %40 = arith.mulf %35, %39 : vector<1x8x8x256xf32>
    %41 = arith.addf %34, %40 : vector<1x8x8x256xf32>
    %42 = vector.extract_strided_slice %0 {offsets = [0, 2, 0, 0], sizes = [1, 8, 8, 256], strides = [1, 1, 1, 1]} : vector<1x10x10x256xf32> to vector<1x8x8x256xf32>
    %c6 = arith.constant 6 : index
    %c0_10 = arith.constant 0 : index
    %43 = vector.load %arg3[%c6, %c0_10] : memref<9x256xf32, #tpu.memory_space<vmem>>, vector<1x256xf32>
    %44 = vector.shape_cast %43 : vector<1x256xf32> to vector<256xf32>
    %45 = vector.shape_cast %44 : vector<256xf32> to vector<1x1x1x256xf32>
    %46 = vector.broadcast %45 : vector<1x1x1x256xf32> to vector<1x8x8x256xf32>
    %47 = arith.mulf %42, %46 : vector<1x8x8x256xf32>
    %48 = arith.addf %41, %47 : vector<1x8x8x256xf32>
    %49 = vector.extract_strided_slice %0 {offsets = [0, 2, 1, 0], sizes = [1, 8, 8, 256], strides = [1, 1, 1, 1]} : vector<1x10x10x256xf32> to vector<1x8x8x256xf32>
    %c7 = arith.constant 7 : index
    %c0_11 = arith.constant 0 : index
    %50 = vector.load %arg3[%c7, %c0_11] : memref<9x256xf32, #tpu.memory_space<vmem>>, vector<1x256xf32>
    %51 = vector.shape_cast %50 : vector<1x256xf32> to vector<256xf32>
    %52 = vector.shape_cast %51 : vector<256xf32> to vector<1x1x1x256xf32>
    %53 = vector.broadcast %52 : vector<1x1x1x256xf32> to vector<1x8x8x256xf32>
    %54 = arith.mulf %49, %53 : vector<1x8x8x256xf32>
    %55 = arith.addf %48, %54 : vector<1x8x8x256xf32>
    %56 = vector.extract_strided_slice %0 {offsets = [0, 2, 2, 0], sizes = [1, 8, 8, 256], strides = [1, 1, 1, 1]} : vector<1x10x10x256xf32> to vector<1x8x8x256xf32>
    %c8 = arith.constant 8 : index
    %c0_12 = arith.constant 0 : index
    %57 = vector.load %arg3[%c8, %c0_12] : memref<9x256xf32, #tpu.memory_space<vmem>>, vector<1x256xf32>
    %58 = vector.shape_cast %57 : vector<1x256xf32> to vector<256xf32>
    %59 = vector.shape_cast %58 : vector<256xf32> to vector<1x1x1x256xf32>
    %60 = vector.broadcast %59 : vector<1x1x1x256xf32> to vector<1x8x8x256xf32>
    %61 = arith.mulf %56, %60 : vector<1x8x8x256xf32>
    %62 = arith.addf %55, %61 : vector<1x8x8x256xf32>
    %c0_13 = arith.constant 0 : index
    %c0_14 = arith.constant 0 : index
    %63 = vector.load %arg4[%c0_13, %c0_14] : memref<1x256xf32, #tpu.memory_space<vmem>>, vector<1x256xf32>
    %64 = vector.shape_cast %63 : vector<1x256xf32> to vector<1x1x1x256xf32>
    %65 = vector.broadcast %64 : vector<1x1x1x256xf32> to vector<1x8x8x256xf32>
    %66 = arith.addf %62, %65 : vector<1x8x8x256xf32>
    %c0_15 = arith.constant 0 : index
    %c0_16 = arith.constant 0 : index
    %c0_17 = arith.constant 0 : index
    %c0_18 = arith.constant 0 : index
    %67 = vector.load %arg5[%c0_15, %c0_16, %c0_17, %c0_18] : memref<1x8x8x256xf32, #tpu.memory_space<vmem>>, vector<1x8x8x256xf32>
    tpu.vector_store %arg5[%c0_15, %c0_16, %c0_17, %c0_18], %66 {strides = array<i32>} : memref<1x8x8x256xf32, #tpu.memory_space<vmem>>, vector<1x8x8x256xf32>,
    return
  }
  func.func @transform_0(%arg0: i32, %arg1: i32) -> (i32, i32, i32, i32) {
    %c0_i32 = arith.constant 0 : i32
    %c0_i32_0 = arith.constant 0 : i32
    %c0_i32_1 = arith.constant 0 : i32
    return %arg0, %c0_i32, %c0_i32_0, %arg1 : i32, i32, i32, i32
  }
  func.func @transform_1(%arg0: i32, %arg1: i32) -> (i32, i32) {
    %c0_i32 = arith.constant 0 : i32
    %c0_i32_0 = arith.constant 0 : i32
    return %c0_i32, %arg1 : i32, i32
  }
  func.func @transform_2(%arg0: i32, %arg1: i32) -> (i32, i32) {
    %c0_i32 = arith.constant 0 : i32
    %c0_i32_0 = arith.constant 0 : i32
    return %c0_i32, %arg1 : i32, i32
  }
  func.func @transform_3(%arg0: i32, %arg1: i32) -> (i32, i32, i32, i32) {
    %c0_i32 = arith.constant 0 : i32
    %c0_i32_0 = arith.constant 0 : i32
    %c0_i32_1 = arith.constant 0 : i32
    return %arg0, %c0_i32, %c0_i32_0, %arg1 : i32, i32, i32, i32
  }
}

module attributes {stable_mosaic.version = 11 : i64} {
  func.func @kernel(%arg0: i32, %arg1: i32, %arg2: i32, %arg3: memref<128x256xf32, #tpu.memory_space<vmem>>, %arg4: memref<256x64xf32, #tpu.memory_space<vmem>>, %arg5: memref<1x64xf32, #tpu.memory_space<vmem>>, %arg6: memref<128x64xf32, #tpu.memory_space<vmem>>, %arg7: memref<128x64xf32, #tpu.memory_space<vmem>>, %arg8: memref<128x64xf32, #tpu.memory_space<vmem>>) attributes {dimension_semantics = [#tpu.dimension_semantics<parallel>, #tpu.dimension_semantics<parallel>, #tpu.dimension_semantics<arbitrary>], iteration_bounds = array<i64: 1, 1, 1>, scalar_prefetch = 0 : i64, scratch_operands = 1 : i64, tpu.core_type = #tpu.core_type<tc>, window_params = [{transform_indices = @transform_0, window_bounds = array<i64: 128, 256>}, {transform_indices = @transform_1, window_bounds = array<i64: 256, 64>}, {transform_indices = @transform_2, window_bounds = array<i64: 1, 64>}, {transform_indices = @transform_3, window_bounds = array<i64: 128, 64>}, {transform_indices = @transform_4, window_bounds = array<i64: 128, 64>}]} {
    %c0_i32 = arith.constant 0 : i32
    %0 = arith.cmpi eq, %arg2, %c0_i32 : i32
    %1 = arith.extui %0 : i1 to i32
    %c0_i32_0 = arith.constant 0 : i32
    %2 = arith.cmpi ne, %1, %c0_i32_0 : i32
    scf.if %2 {
      %cst_10 = arith.constant 0.000000e+00 : f32
      %12 = vector.broadcast %cst_10 : f32 to vector<128x64xf32>
      %c0_11 = arith.constant 0 : index
      %c0_12 = arith.constant 0 : index
      %13 = vector.load %arg8[%c0_11, %c0_12] : memref<128x64xf32, #tpu.memory_space<vmem>>, vector<128x64xf32>
      tpu.vector_store %arg8[%c0_11, %c0_12], %12 {strides = array<i32>} : memref<128x64xf32, #tpu.memory_space<vmem>>, vector<128x64xf32>,
    } else {
    }
    %c0 = arith.constant 0 : index
    %c0_1 = arith.constant 0 : index
    %3 = vector.load %arg8[%c0, %c0_1] : memref<128x64xf32, #tpu.memory_space<vmem>>, vector<128x64xf32>
    %c0_2 = arith.constant 0 : index
    %c0_3 = arith.constant 0 : index
    %4 = vector.load %arg3[%c0_2, %c0_3] : memref<128x256xf32, #tpu.memory_space<vmem>>, vector<128x256xf32>
    %c0_4 = arith.constant 0 : index
    %c0_5 = arith.constant 0 : index
    %5 = vector.load %arg4[%c0_4, %c0_5] : memref<256x64xf32, #tpu.memory_space<vmem>>, vector<256x64xf32>
    %cst = arith.constant dense<0.000000e+00> : vector<128x64xf32>
    %6 = tpu.matmul %4, %5, %cst {dimension_numbers = #tpu.dot_dimension_numbers<[1], [0], [0], [1], [0, 0, 1, 1], [], []>} : vector<128x256xf32>, vector<256x64xf32>, vector<128x64xf32> -> vector<128x64xf32>
    %7 = arith.addf %3, %6 : vector<128x64xf32>
    %c0_6 = arith.constant 0 : index
    %c0_7 = arith.constant 0 : index
    %8 = vector.load %arg8[%c0_6, %c0_7] : memref<128x64xf32, #tpu.memory_space<vmem>>, vector<128x64xf32>
    tpu.vector_store %arg8[%c0_6, %c0_7], %7 {strides = array<i32>} : memref<128x64xf32, #tpu.memory_space<vmem>>, vector<128x64xf32>,
    %c0_i32_8 = arith.constant 0 : i32
    %9 = arith.cmpi eq, %arg2, %c0_i32_8 : i32
    %10 = arith.extui %9 : i1 to i32
    %c0_i32_9 = arith.constant 0 : i32
    %11 = arith.cmpi ne, %10, %c0_i32_9 : i32
    scf.if %11 {
      %c0_10 = arith.constant 0 : index
      %c0_11 = arith.constant 0 : index
      %12 = vector.load %arg8[%c0_10, %c0_11] : memref<128x64xf32, #tpu.memory_space<vmem>>, vector<128x64xf32>
      %c0_12 = arith.constant 0 : index
      %c0_13 = arith.constant 0 : index
      %13 = vector.load %arg5[%c0_12, %c0_13] : memref<1x64xf32, #tpu.memory_space<vmem>>, vector<1x64xf32>
      %14 = vector.broadcast %13 : vector<1x64xf32> to vector<128x64xf32>
      %15 = arith.addf %12, %14 : vector<128x64xf32>
      %c0_14 = arith.constant 0 : index
      %c0_15 = arith.constant 0 : index
      %16 = vector.load %arg6[%c0_14, %c0_15] : memref<128x64xf32, #tpu.memory_space<vmem>>, vector<128x64xf32>
      %17 = arith.addf %15, %16 : vector<128x64xf32>
      %c0_16 = arith.constant 0 : index
      %c0_17 = arith.constant 0 : index
      %18 = vector.load %arg7[%c0_16, %c0_17] : memref<128x64xf32, #tpu.memory_space<vmem>>, vector<128x64xf32>
      tpu.vector_store %arg7[%c0_16, %c0_17], %17 {strides = array<i32>} : memref<128x64xf32, #tpu.memory_space<vmem>>, vector<128x64xf32>,
    } else {
    }
    return
  }
  func.func @transform_0(%arg0: i32, %arg1: i32, %arg2: i32) -> (i32, i32) {
    %c0_i32 = arith.constant 0 : i32
    return %arg0, %arg2 : i32, i32
  }
  func.func @transform_1(%arg0: i32, %arg1: i32, %arg2: i32) -> (i32, i32) {
    %c0_i32 = arith.constant 0 : i32
    return %arg2, %arg1 : i32, i32
  }
  func.func @transform_2(%arg0: i32, %arg1: i32, %arg2: i32) -> (i32, i32) {
    %c0_i32 = arith.constant 0 : i32
    %c0_i32_0 = arith.constant 0 : i32
    return %c0_i32, %arg1 : i32, i32
  }
  func.func @transform_3(%arg0: i32, %arg1: i32, %arg2: i32) -> (i32, i32) {
    %c0_i32 = arith.constant 0 : i32
    return %arg0, %arg1 : i32, i32
  }
  func.func @transform_4(%arg0: i32, %arg1: i32, %arg2: i32) -> (i32, i32) {
    %c0_i32 = arith.constant 0 : i32
    return %arg0, %arg1 : i32, i32
  }
}

</mosaic_0001>

<bundles_post_ra>
// kernel: block_forward.6
= control target key start
LH: loop header
LB: loop body
LE: loop exit
PB: predicated region body
PF: predicated region fallthrough
CT: control target
= control target key end

     0   :  { %vm40_vm0 = vcmask 523264   ;;  %s1197_s0 = inlined_call_operand.vmem [shape: f32[128,64], index: 0, kind: input, shape index: {}]   ;;  %s1198_s3 = inlined_call_operand.vmem [shape: f32[64,192], index: 3, kind: input, shape index: {}]   ;;  %s1199_s1 = inlined_call_operand.vmem [shape: f32[1,64], index: 1, kind: input, shape index: {}]   ;;  %s1200_s2 = inlined_call_operand.vmem [shape: f32[1,64], index: 2, kind: input, shape index: {}]   ;;  %s1201_s4 = inlined_call_operand.vmem [shape: f32[1,192], index: 4, kind: input, shape index: {}]   ;;  %s1202_s5 = inlined_call_operand.vmem [shape: f32[128,192], index: 5, kind: output, shape index: {}]  }
   0x1   :  { %v24_v0 = vld [vmem:[%s1197_s0] sm:$0xff]  ;;  %v25_v1 = vld [vmem:[%s1197_s0 + $0x8] sm:$0xff]  ;;  %v26_v8 = vld [vmem:[%s1197_s0 + $0x10] sm:$0xff] }
   0x2   :  { %v32_v2 = vld [vmem:[%s1197_s0 + $0x40] sm:$0xff]  ;;  %v41_v3 = vsel %vm40_vm0, %v24_v0, 0.0  ;;  %v44_v4 = vsel %vm40_vm0, %v25_v1, 0.0  ;;  %v33_v5 = vld [vmem:[%s1197_s0 + $0x48] sm:$0xff]  ;;  %v34_v9 = vld [vmem:[%s1197_s0 + $0x50] sm:$0xff]  ;;  %v47_v10 = vsel %vm40_vm0, %v26_v8, 0.0 }
   0x3   :  { %42 = vadd.xlane.f32.xlu0 %v41_v3  ;;  %45 = vadd.xlane.f32.xlu1 %v44_v4  ;;  %v65_v6 = vsel %vm40_vm0, %v32_v2, 0.0  ;;  %v68_v7 = vsel %vm40_vm0, %v33_v5, 0.0  ;;  %v71_v11 = vsel %vm40_vm0, %v34_v9, 0.0  ;;  %v735_v12 = vld [vmem:[%s1197_s0 + $0x18] sm:$0xff]  ;;  %v749_v16 = vld [vmem:[%s1197_s0 + $0x20] sm:$0xff]  ;;  %v763_v20 = vld [vmem:[%s1197_s0 + $0x28] sm:$0xff] }
   0x4   :  { %v740_v13 = vld [vmem:[%s1197_s0 + $0x58] sm:$0xff]  ;;  %v50_v14 = vsel %vm40_vm0, %v735_v12, 0.0  ;;  %v754_v17 = vld [vmem:[%s1197_s0 + $0x60] sm:$0xff]  ;;  %v53_v18 = vsel %vm40_vm0, %v749_v16, 0.0  ;;  %v768_v21 = vld [vmem:[%s1197_s0 + $0x68] sm:$0xff]  ;;  %v56_v22 = vsel %vm40_vm0, %v763_v20, 0.0 }
   0x5   :  { %v74_v15 = vsel %vm40_vm0, %v740_v13, 0.0  ;;  %v77_v19 = vsel %vm40_vm0, %v754_v17, 0.0  ;;  %v80_v23 = vsel %vm40_vm0, %v768_v21, 0.0  ;;  %v777_v24 = vld [vmem:[%s1197_s0 + $0x30] sm:$0xff]  ;;  %v791_v28 = vld [vmem:[%s1197_s0 + $0x38] sm:$0xff] }
   0x6   :  { %v782_v25 = vld [vmem:[%s1197_s0 + $0x70] sm:$0xff]  ;;  %v59_v26 = vsel %vm40_vm0, %v777_v24, 0.0  ;;  %v796_v29 = vld [vmem:[%s1197_s0 + $0x78] sm:$0xff]  ;;  %v62_v30 = vsel %vm40_vm0, %v791_v28, 0.0 }
   0x7   :  { %66 = vadd.xlane.f32.xlu0 %v65_v6  ;;  %69 = vadd.xlane.f32.xlu1 %v68_v7  ;;  %v83_v27 = vsel %vm40_vm0, %v782_v25, 0.0  ;;  %v86_v31 = vsel %vm40_vm0, %v796_v29, 0.0 }
   0xb   :  { %48 = vadd.xlane.f32.xlu0 %v47_v10  ;;  %72 = vadd.xlane.f32.xlu1 %v71_v11 }
   0xf   :  { %51 = vadd.xlane.f32.xlu0 %v50_v14  ;;  %75 = vadd.xlane.f32.xlu1 %v74_v15 }
  0x13   :  { %54 = vadd.xlane.f32.xlu0 %v53_v18  ;;  %78 = vadd.xlane.f32.xlu1 %v77_v19 }
  0x17   :  { %57 = vadd.xlane.f32.xlu0 %v56_v22  ;;  %81 = vadd.xlane.f32.xlu1 %v80_v23 }
  0x1b   :  { %60 = vadd.xlane.f32.xlu0 %v59_v26  ;;  %84 = vadd.xlane.f32.xlu1 %v83_v27 }
  0x1f   :  { %63 = vadd.xlane.f32.xlu0 %v62_v30  ;;  %87 = vadd.xlane.f32.xlu1 %v86_v31 }
  0x90   :  { %v43_v32 = vpop.xlane.xlu0 %42  ;;  %v46_v33 = vpop.xlane.xlu1 %45 }
  0x91   :  { %v90_v34 = vmul.f32 0.015625, %v43_v32  ;;  %v91_v35 = vmul.f32 0.015625, %v46_v33 }
  0x93   :  { %v802_v36 = vsub.f32 %v24_v0, %v90_v34  ;;  %v804_v37 = vsub.f32 %v25_v1, %v91_v35 }
  0x94   :  { %v67_v38 = vpop.xlane.xlu0 %66  ;;  %v70_v39 = vpop.xlane.xlu1 %69 }
  0x95   :  { %v98_v40 = vmul.f32 0.015625, %v67_v38  ;;  %v99_v41 = vmul.f32 0.015625, %v70_v39  ;;  %v122_v42 = vmul.f32 %v802_v36, %v802_v36  ;;  %v123_v43 = vmul.f32 %v804_v37, %v804_v37 }
  0x97   :  { %v810_v44 = vsub.f32 %v32_v2, %v98_v40  ;;  %v812_v45 = vsub.f32 %v33_v5, %v99_v41  ;;  %v138_v46 = vsel %vm40_vm0, %v122_v42, 0.0  ;;  %v141_v49 = vsel %vm40_vm0, %v123_v43, 0.0 }
  0x98   :  { %139 = vadd.xlane.f32.xlu0 %v138_v46  ;;  %v49_v47 = vpop.xlane.xlu0 %48  ;;  %v73_v48 = vpop.xlane.xlu1 %72 }
  0x99   :  { %v92_v50 = vmul.f32 0.015625, %v49_v47  ;;  %v100_v51 = vmul.f32 0.015625, %v73_v48  ;;  %v130_v52 = vmul.f32 %v810_v44, %v810_v44  ;;  %v131_v53 = vmul.f32 %v812_v45, %v812_v45 }
  0x9b   :  { %v820_v54 = vsub.f32 %v26_v8, %v92_v50  ;;  %v822_v55 = vsub.f32 %v34_v9, %v100_v51  ;;  %v162_v56 = vsel %vm40_vm0, %v130_v52, 0.0  ;;  %v165_v59 = vsel %vm40_vm0, %v131_v53, 0.0  ;;  %v328_v53 = vld [vmem:[%s1198_s3] sm:$0xff] }
  0x9c   :  { %142 = vadd.xlane.f32.xlu0 %v141_v49  ;;  %163 = vadd.xlane.f32.xlu1 %v162_v56  ;;  %v52_v57 = vpop.xlane.xlu0 %51  ;;  %v76_v58 = vpop.xlane.xlu1 %75  ;;  %v330_v56 = vld [vmem:[%s1198_s3 + $0x10] sm:$0xff] }
  0x9d   :  { %v93_v60 = vmul.f32 0.015625, %v52_v57  ;;  %v101_v61 = vmul.f32 0.015625, %v76_v58  ;;  %v124_v62 = vmul.f32 %v820_v54, %v820_v54  ;;  %v132_v63 = vmul.f32 %v822_v55, %v822_v55 }
  0x9e   :  { %v622_v58 = vpack.c.bf16 %v330_v56, %v328_v53 }
  0x9f   :  { %v831_v0 = vsub.f32 %v735_v12, %v93_v60  ;;  %v834_v1 = vsub.f32 %v740_v13, %v101_v61  ;;  %v144_v2 = vsel %vm40_vm0, %v124_v62, 0.0  ;;  %v168_v5 = vsel %vm40_vm0, %v132_v63, 0.0  ;;  %v333_v60 = vld [vmem:[%s1198_s3 + $0x28] sm:$0xff]  ;;  %v335_v61 = vld [vmem:[%s1198_s3 + $0x38] sm:$0xff]  ;;  %v332_v63 = vld [vmem:[%s1198_s3 + $0x20] sm:$0xff] }
  0xa0   :  { %166 = vadd.xlane.f32.xlu1 %v165_v59  ;;  %145 = vadd.xlane.f32.xlu0 %v144_v2  ;;  %v55_v3 = vpop.xlane.xlu0 %54  ;;  %v79_v4 = vpop.xlane.xlu1 %78  ;;  %v624_v62 = vpack.c.bf16 %v335_v61, %v333_v60  ;;  %v334_v2 = vld [vmem:[%s1198_s3 + $0x30] sm:$0xff] }
  0xa1   :  { %v94_v6 = vmul.f32 0.015625, %v55_v3  ;;  %v102_v7 = vmul.f32 0.015625, %v79_v4  ;;  %v125_v8 = vmul.f32 %v831_v0, %v831_v0  ;;  %v133_v9 = vmul.f32 %v834_v1, %v834_v1  ;;  %v337_v4 = vld [vmem:[%s1198_s3 + $0x48] sm:$0xff] }
  0xa2   :  { %v626_v3 = vpack.c.bf16 %v334_v2, %v332_v63 }
  0xa3   :  { %v843_v10 = vsub.f32 %v749_v16, %v94_v6  ;;  %v846_v11 = vsub.f32 %v754_v17, %v102_v7  ;;  %v147_v12 = vsel %vm40_vm0, %v125_v8, 0.0  ;;  %v171_v15 = vsel %vm40_vm0, %v133_v9, 0.0  ;;  %v336_v7 = vld [vmem:[%s1198_s3 + $0x40] sm:$0xff]  ;;  %v338_v8 = vld [vmem:[%s1198_s3 + $0x50] sm:$0xff] }
  0xa4   :  { %169 = vadd.xlane.f32.xlu1 %v168_v5  ;;  %148 = vadd.xlane.f32.xlu0 %v147_v12  ;;  %v58_v13 = vpop.xlane.xlu0 %57  ;;  %v82_v14 = vpop.xlane.xlu1 %81  ;;  %v339_v5 = vld [vmem:[%s1198_s3 + $0x58] sm:$0xff]  ;;  %v630_v9 = vpack.c.bf16 %v338_v8, %v336_v7  ;;  %v341_v12 = vld [vmem:[%s1198_s3 + $0x68] sm:$0xff] }
  0xa5   :  { %v95_v18 = vmul.f32 0.015625, %v58_v13  ;;  %v103_v19 = vmul.f32 0.015625, %v82_v14  ;;  %v126_v22 = vmul.f32 %v843_v10, %v843_v10  ;;  %v134_v16 = vmul.f32 %v846_v11, %v846_v11  ;;  %v343_v13 = vld [vmem:[%s1198_s3 + $0x78] sm:$0xff] }
  0xa6   :  { %v628_v6 = vpack.c.bf16 %v339_v5, %v337_v4  ;;  %v632_v14 = vpack.c.bf16 %v343_v13, %v341_v12 }
  0xa7   :  { %v855_v23 = vsub.f32 %v763_v20, %v95_v18  ;;  %v858_v17 = vsub.f32 %v768_v21, %v103_v19  ;;  %v150_v26 = vsel %vm40_vm0, %v126_v22, 0.0  ;;  %v174_v31 = vsel %vm40_vm0, %v134_v16, 0.0  ;;  %v342_v18 = vld [vmem:[%s1198_s3 + $0x70] sm:$0xff] }
  0xa8   :  { %172 = vadd.xlane.f32.xlu1 %v171_v15  ;;  %151 = vadd.xlane.f32.xlu0 %v150_v26  ;;  %v61_v27 = vpop.xlane.xlu0 %60  ;;  %v85_v30 = vpop.xlane.xlu1 %84  ;;  %v340_v15 = vld [vmem:[%s1198_s3 + $0x60] sm:$0xff]  ;;  %v677_v22 = vmov 0.0  }
  0xa9   :  { %v96_v32 = vmul.f32 0.015625, %v61_v27  ;;  %v104_v33 = vmul.f32 0.015625, %v85_v30  ;;  %v127_v34 = vmul.f32 %v855_v23, %v855_v23  ;;  %v135_v20 = vmul.f32 %v858_v17, %v858_v17  ;;  %469 = vmatprep.mubr.f32.mxu0 %v677_v22  ;;  %517 = vmatprep.mubr.f32.mxu1 %v677_v22 }
  0xaa   :  { %v634_v19 = vpack.c.bf16 %v342_v18, %v340_v15 }
  0xab   :  { %v867_v35 = vsub.f32 %v777_v24, %v96_v32  ;;  %v870_v21 = vsub.f32 %v782_v25, %v104_v33  ;;  %v153_v38 = vsel %vm40_vm0, %v127_v34, 0.0  ;;  %v177_v41 = vsel %vm40_vm0, %v135_v20, 0.0 }
  0xac   :  { %175 = vadd.xlane.f32.xlu1 %v174_v31  ;;  %154 = vadd.xlane.f32.xlu0 %v153_v38  ;;  %v64_v39 = vpop.xlane.xlu0 %63  ;;  %v88_v40 = vpop.xlane.xlu1 %87 }
  0xad   :  { %v97_v42 = vmul.f32 0.015625, %v64_v39  ;;  %v105_v43 = vmul.f32 0.015625, %v88_v40  ;;  %v128_v46 = vmul.f32 %v867_v35, %v867_v35  ;;  %v136_v24 = vmul.f32 %v870_v21, %v870_v21 }
  0xaf   :  { %v879_v47 = vsub.f32 %v791_v28, %v97_v42  ;;  %v882_v25 = vsub.f32 %v796_v29, %v105_v43  ;;  %v156_v48 = vsel %vm40_vm0, %v128_v46, 0.0  ;;  %v180_v49 = vsel %vm40_vm0, %v136_v24, 0.0  ;;  %v329_v28 = vld [vmem:[%s1198_s3 + $0x8] sm:$0xff]  ;;  %v331_v29 = vld [vmem:[%s1198_s3 + $0x18] sm:$0xff] }
  0xb0   :  { %178 = vadd.xlane.f32.xlu1 %v177_v41  ;;  %157 = vadd.xlane.f32.xlu0 %v156_v48  ;;  %v620_v52 = vpack.c.bf16 %v331_v29, %v329_v28 }
  0xb1   :  { %v129_v50 = vmul.f32 %v879_v47, %v879_v47  ;;  %v137_v51 = vmul.f32 %v882_v25, %v882_v25 }
  0xb2   :  { %621 = vmatprep.subr.bf16.mxu0 %v620_v52  ;;  %636 = vmatprep.subr.bf16.mxu1 %v620_v52 }
  0xb3   :  { %v159_v57 = vsel %vm40_vm0, %v129_v50, 0.0  ;;  %v183_v59 = vsel %vm40_vm0, %v137_v51, 0.0  ;;  %623 = vmatpush1.bf16.msra.mxu0 %v622_v58  ;;  %640 = vmatpush1.bf16.msra.mxu1 %v622_v58  ;;  %v945_v51 = vld [vmem:[%s1199_s1] ss:$0 sm:$0xff] }
  0xb4   :  { %181 = vadd.xlane.f32.xlu1 %v180_v49  ;;  %160 = vadd.xlane.f32.xlu0 %v159_v57  ;;  %v951_v57 = vld [vmem:[%s1200_s2] ss:$0 sm:$0xff] }
  0xb5   :  { %625 = vmatprep.subr.bf16.mxu0 %v624_v62  ;;  %637 = vmatprep.subr.bf16.mxu1 %v624_v62 }
  0xb7   :  { %627 = vmatpush1.bf16.msra.mxu0 %v626_v3  ;;  %641 = vmatpush1.bf16.msra.mxu1 %v626_v3 }
  0xb8   :  { %184 = vadd.xlane.f32.xlu1 %v183_v59  ;;  %629 = vmatprep.subr.bf16.mxu0 %v628_v6 }
  0xb9   :  { %638 = vmatprep.subr.bf16.mxu1 %v628_v6 }
  0xbb   :  { %631 = vmatpush1.bf16.msra.mxu0 %v630_v9  ;;  %642 = vmatpush1.bf16.msra.mxu1 %v630_v9 }
  0xbc   :  { %633 = vmatprep.subr.bf16.mxu0 %v632_v14  ;;  %639 = vmatprep.subr.bf16.mxu1 %v632_v14 }
  0xbf   :  { %635 = vmatpush1.bf16.msra.mxu0 %v634_v19  ;;  %643 = vmatpush1.bf16.msra.mxu1 %v634_v19 }
 0x125   :  { %v140_v16 = vpop.xlane.xlu0 %139 }
 0x126   :  { %v186_v26 = vmul.f32 0.015625, %v140_v16 }
 0x128   :  { %v202_v27 = vadd.f32 1e-05, %v186_v26 }
 0x129   :  { %v164_v30 = vpop.xlane.xlu1 %163  ;;  %v143_v31 = vpop.xlane.xlu0 %142 }
 0x12a   :  { %645 = vrsqrt.f32 %v202_v27  ;;  %v194_v32 = vmul.f32 0.015625, %v164_v30  ;;  %v187_v33 = vmul.f32 0.015625, %v143_v31 }
 0x12c   :  { %v210_v34 = vadd.f32 1e-05, %v194_v32  ;;  %v203_v20 = vadd.f32 1e-05, %v187_v33 }
 0x12d   :  { %v167_v38 = vpop.xlane.xlu1 %166  ;;  %v146_v39 = vpop.xlane.xlu0 %145 }
 0x12e   :  { %647 = vrsqrt.f32 %v210_v34  ;;  %v195_v40 = vmul.f32 0.015625, %v167_v38  ;;  %v188_v41 = vmul.f32 0.015625, %v146_v39 }
 0x12f   :  { %649 = vrsqrt.f32 %v203_v20 }
 0x130   :  { %v211_v42 = vadd.f32 1e-05, %v195_v40  ;;  %v204_v43 = vadd.f32 1e-05, %v188_v41 }
 0x131   :  { %v170_v46 = vpop.xlane.xlu1 %169  ;;  %v149_v24 = vpop.xlane.xlu0 %148 }
 0x132   :  { %651 = vrsqrt.f32 %v211_v42  ;;  %v196_v48 = vmul.f32 0.015625, %v170_v46  ;;  %v189_v49 = vmul.f32 0.015625, %v149_v24 }
 0x133   :  { %653 = vrsqrt.f32 %v204_v43 }
 0x134   :  { %v646_v50 = vpop.eup %645  ;;  %v212_v28 = vadd.f32 1e-05, %v196_v48  ;;  %v205_v29 = vadd.f32 1e-05, %v189_v49 }
 0x135   :  { %v234_v52 = vmul.f32 %v646_v50, %v802_v36  ;;  %v173_v53 = vpop.xlane.xlu1 %172  ;;  %v152_v56 = vpop.xlane.xlu0 %151 }
 0x136   :  { %655 = vrsqrt.f32 %v212_v28  ;;  %v197_v58 = vmul.f32 0.015625, %v173_v53  ;;  %v190_v59 = vmul.f32 0.015625, %v152_v56 }
 0x137   :  { %v257_v60 = vmul.f32 %v945_v51, %v234_v52  ;;  %657 = vrsqrt.f32 %v205_v29 }
 0x138   :  { %v648_v61 = vpop.eup %647  ;;  %v213_v62 = vadd.f32 1e-05, %v197_v58  ;;  %v206_v63 = vadd.f32 1e-05, %v190_v59 }
 0x139   :  { %v650_v2 = vpop.eup %649  ;;  %v280_v3 = vadd.f32 %v951_v57, %v257_v60  ;;  %v242_v36 = vmul.f32 %v648_v61, %v810_v44  ;;  %v176_v4 = vpop.xlane.xlu1 %175 }
 0x13a   :  { %v155_v5 = vpop.xlane.xlu0 %154  ;;  %v235_v6 = vmul.f32 %v650_v2, %v804_v37  ;;  %659 = vrsqrt.f32 %v213_v62  ;;  %v198_v7 = vmul.f32 0.015625, %v176_v4 }
 0x13b   :  { %v191_v8 = vmul.f32 0.015625, %v155_v5  ;;  %296 = vst.msk [vmem:[#allocation2] sm:$0xff] %vm40_vm0, %v280_v3  ;;  %v265_v9 = vmul.f32 %v945_v51, %v242_v36  ;;  %661 = vrsqrt.f32 %v206_v63 }
 0x13c   :  { %v652_v12 = vpop.eup %651  ;;  %v258_v13 = vmul.f32 %v945_v51, %v235_v6  ;;  %v214_v14 = vadd.f32 1e-05, %v198_v7 }
 0x13d   :  { %v207_v15 = vadd.f32 1e-05, %v191_v8  ;;  %v654_v18 = vpop.eup %653  ;;  %v288_v44 = vadd.f32 %v951_v57, %v265_v9  ;;  %v243_v19 = vmul.f32 %v652_v12, %v812_v45  ;;  %v179_v16 = vpop.xlane.xlu1 %178 }
 0x13e   :  { %v158_v37 = vpop.xlane.xlu0 %157  ;;  %v281_v26 = vadd.f32 %v951_v57, %v258_v13  ;;  %v236_v27 = vmul.f32 %v654_v18, %v820_v54  ;;  %663 = vrsqrt.f32 %v214_v14  ;;  %v199_v30 = vmul.f32 0.015625, %v179_v16 }
 0x13f   :  { %304 = vst.msk [vmem:[#allocation2 + $0x40] sm:$0xff] %vm40_vm0, %v288_v44  ;;  %v266_v31 = vmul.f32 %v945_v51, %v243_v19  ;;  %665 = vrsqrt.f32 %v207_v15  ;;  %v192_v32 = vmul.f32 0.015625, %v158_v37 }
 0x140   :  { %v656_v33 = vpop.eup %655  ;;  %297 = vst.msk [vmem:[#allocation2 + $0x8] sm:$0xff] %vm40_vm0, %v281_v26  ;;  %v259_v34 = vmul.f32 %v945_v51, %v236_v27  ;;  %v215_v45 = vadd.f32 1e-05, %v199_v30 }
 0x141   :  { %v658_v20 = vpop.eup %657  ;;  %v289_v38 = vadd.f32 %v951_v57, %v266_v31  ;;  %v244_v39 = vmul.f32 %v656_v33, %v822_v55  ;;  %v208_v54 = vadd.f32 1e-05, %v192_v32  ;;  %v182_v40 = vpop.xlane.xlu1 %181 }
 0x142   :  { %v161_v41 = vpop.xlane.xlu0 %160  ;;  %v282_v42 = vadd.f32 %v951_v57, %v259_v34  ;;  %v237_v43 = vmul.f32 %v658_v20, %v831_v0  ;;  %667 = vrsqrt.f32 %v215_v45  ;;  %v200_v46 = vmul.f32 0.015625, %v182_v40  ;;  %v312_v24 = vld [vmem:[#allocation2] sm:$0xff] }
 0x143   :  { %305 = vst.msk [vmem:[#allocation2 + $0x48] sm:$0xff] %vm40_vm0, %v289_v38  ;;  %v267_v48 = vmul.f32 %v945_v51, %v244_v39  ;;  %669 = vrsqrt.f32 %v208_v54  ;;  %v193_v49 = vmul.f32 0.015625, %v161_v41  ;;  %604 = vmatmul.mubr.msk.f32.vlgmr.msra.gmra.mrb[0].mxu0 %vm40_vm0, %v312_v24 }
 0x144   :  { %v660_v50 = vpop.eup %659  ;;  %298 = vst.msk [vmem:[#allocation2 + $0x10] sm:$0xff] %vm40_vm0, %v282_v42  ;;  %v260_v55 = vmul.f32 %v945_v51, %v237_v43  ;;  %v216_v28 = vadd.f32 1e-05, %v200_v46  ;;  %475 = vmatprep.mubr.f32.mxu0 %v677_v22  ;;  %v346_v46 = vlaneseq }
 0x145   :  { %v662_v0 = vpop.eup %661  ;;  %v290_v29 = vadd.f32 %v951_v57, %v267_v48  ;;  %v245_v52 = vmul.f32 %v660_v50, %v834_v1  ;;  %v209_v53 = vadd.f32 1e-05, %v193_v49  ;;  %v185_v56 = vpop.xlane.xlu1 %184  ;;  %v344_v49 = vld [vmem:[%s1201_s4] sm:$0x3] }
 0x146   :  { %v283_v58 = vadd.f32 %v951_v57, %v260_v55  ;;  %v238_v59 = vmul.f32 %v662_v0, %v843_v10  ;;  %671 = vrsqrt.f32 %v216_v28  ;;  %v201_v60 = vmul.f32 0.015625, %v185_v56  ;;  %v320_v61 = vld [vmem:[#allocation2 + $0x40] sm:$0xff] }
 0x147   :  { %306 = vst.msk [vmem:[#allocation2 + $0x50] sm:$0xff] %vm40_vm0, %v290_v29  ;;  %v268_v62 = vmul.f32 %v945_v51, %v245_v52  ;;  %673 = vrsqrt.f32 %v209_v53  ;;  %v313_v63 = vld [vmem:[#allocation2 + $0x8] sm:$0xff]  ;;  %612 = vmatmul.mubr.msk.f32.vlgmr.msra.gmra.mrb[0].mxu1 %vm40_vm0, %v320_v61  ;;  %v347_v24 = vshrl.u32 %v346_v46, 7 }
 0x148   :  { %v664_v2 = vpop.eup %663  ;;  %299 = vst.msk [vmem:[#allocation2 + $0x18] sm:$0xff] %vm40_vm0, %v283_v58  ;;  %v261_v1 = vmul.f32 %v945_v51, %v238_v59  ;;  %v217_v3 = vadd.f32 1e-05, %v201_v60  ;;  %605 = vmatmul.mubr.msk.f32.gmra.mrb[2].mxu0 %vm40_vm0, %v313_v63  ;;  %523 = vmatprep.mubr.f32.mxu1 %v677_v22 }
 0x149   :  { %v666_v10 = vpop.eup %665  ;;  %v291_v36 = vadd.f32 %v951_v57, %v268_v62  ;;  %v246_v4 = vmul.f32 %v664_v2, %v846_v11  ;;  %481 = vmatprep.mubr.f32.mxu0 %v677_v22  ;;  %v348_v48 = vsub.s32 0, %v347_v24  ;;  %v352_v50 = vsub.s32 1, %v347_v24 }
 0x14a   :  { %v284_v5 = vadd.f32 %v951_v57, %v261_v1  ;;  %v239_v6 = vmul.f32 %v666_v10, %v855_v23  ;;  %675 = vrsqrt.f32 %v217_v3  ;;  %v321_v7 = vld [vmem:[#allocation2 + $0x48] sm:$0xff] }
 0x14b   :  { %307 = vst.msk [vmem:[#allocation2 + $0x58] sm:$0xff] %vm40_vm0, %v291_v36  ;;  %v269_v8 = vmul.f32 %v945_v51, %v246_v4  ;;  %v314_v9 = vld [vmem:[#allocation2 + $0x10] sm:$0xff]  ;;  %613 = vmatmul.mubr.msk.f32.gmra.mrb[2].mxu1 %vm40_vm0, %v321_v7  ;;  %v1049_v55 = vrot.slane %v344_v49, %v348_v48  ;;  %v1051_v28 = vrot.slane %v344_v49, %v352_v50 }
 0x14c   :  { %v668_v12 = vpop.eup %667  ;;  %300 = vst.msk [vmem:[#allocation2 + $0x20] sm:$0xff] %vm40_vm0, %v284_v5  ;;  %v262_v11 = vmul.f32 %v945_v51, %v239_v6  ;;  %606 = vmatmul.mubr.msk.f32.gmra.mrb[4].mxu0 %vm40_vm0, %v314_v9  ;;  %529 = vmatprep.mubr.f32.mxu1 %v677_v22 }
 0x14d   :  { %v670_v13 = vpop.eup %669  ;;  %v292_v23 = vadd.f32 %v951_v57, %v269_v8  ;;  %v247_v14 = vmul.f32 %v668_v12, %v858_v17  ;;  %487 = vmatprep.mubr.f32.mxu0 %v677_v22 }
 0x14e   :  { %v285_v15 = vadd.f32 %v951_v57, %v262_v11  ;;  %v240_v18 = vmul.f32 %v670_v13, %v867_v35  ;;  %v322_v44 = vld [vmem:[#allocation2 + $0x50] sm:$0xff] }
 0x14f   :  { %308 = vst.msk [vmem:[#allocation2 + $0x60] sm:$0xff] %vm40_vm0, %v292_v23  ;;  %v270_v19 = vmul.f32 %v945_v51, %v247_v14  ;;  %v315_v16 = vld [vmem:[#allocation2 + $0x18] sm:$0xff]  ;;  %614 = vmatmul.mubr.msk.f32.gmra.mrb[4].mxu1 %vm40_vm0, %v322_v44 }
 0x150   :  { %v672_v37 = vpop.eup %671  ;;  %301 = vst.msk [vmem:[#allocation2 + $0x28] sm:$0xff] %vm40_vm0, %v285_v15  ;;  %v263_v26 = vmul.f32 %v945_v51, %v240_v18  ;;  %607 = vmatmul.mubr.msk.f32.gmra.mrb[6].mxu0 %vm40_vm0, %v315_v16  ;;  %535 = vmatprep.mubr.f32.mxu1 %v677_v22 }
 0x151   :  { %v674_v17 = vpop.eup %673  ;;  %v293_v35 = vadd.f32 %v951_v57, %v270_v19  ;;  %v248_v27 = vmul.f32 %v672_v37, %v870_v21  ;;  %493 = vmatprep.mubr.f32.mxu0 %v677_v22 }
 0x152   :  { %v286_v30 = vadd.f32 %v951_v57, %v263_v26  ;;  %v241_v31 = vmul.f32 %v674_v17, %v879_v47  ;;  %v323_v32 = vld [vmem:[#allocation2 + $0x58] sm:$0xff] }
 0x153   :  { %309 = vst.msk [vmem:[#allocation2 + $0x68] sm:$0xff] %vm40_vm0, %v293_v35  ;;  %v271_v33 = vmul.f32 %v945_v51, %v248_v27  ;;  %v316_v34 = vld [vmem:[#allocation2 + $0x20] sm:$0xff]  ;;  %615 = vmatmul.mubr.msk.f32.gmra.mrb[6].mxu1 %vm40_vm0, %v323_v32 }
 0x154   :  { %v676_v45 = vpop.eup %675  ;;  %302 = vst.msk [vmem:[#allocation2 + $0x30] sm:$0xff] %vm40_vm0, %v286_v30  ;;  %v264_v20 = vmul.f32 %v945_v51, %v241_v31  ;;  %608 = vmatmul.mubr.msk.f32.gmra.mrb[8].mxu0 %vm40_vm0, %v316_v34  ;;  %541 = vmatprep.mubr.f32.mxu1 %v677_v22 }
 0x155   :  { %v294_v21 = vadd.f32 %v951_v57, %v271_v33  ;;  %v249_v47 = vmul.f32 %v676_v45, %v882_v25  ;;  %499 = vmatprep.mubr.f32.mxu0 %v677_v22 }
 0x156   :  { %v287_v38 = vadd.f32 %v951_v57, %v264_v20  ;;  %v324_v39 = vld [vmem:[#allocation2 + $0x60] sm:$0xff] }
 0x157   :  { %310 = vst.msk [vmem:[#allocation2 + $0x70] sm:$0xff] %vm40_vm0, %v294_v21  ;;  %v272_v54 = vmul.f32 %v945_v51, %v249_v47  ;;  %v317_v40 = vld [vmem:[#allocation2 + $0x28] sm:$0xff]  ;;  %616 = vmatmul.mubr.msk.f32.gmra.mrb[8].mxu1 %vm40_vm0, %v324_v39 }
 0x158   :  { %303 = vst.msk [vmem:[#allocation2 + $0x38] sm:$0xff] %vm40_vm0, %v287_v38  ;;  %609 = vmatmul.mubr.msk.f32.gmra.mrb[10].mxu0 %vm40_vm0, %v317_v40  ;;  %547 = vmatprep.mubr.f32.mxu1 %v677_v22 }
 0x159   :  { %v295_v25 = vadd.f32 %v951_v57, %v272_v54  ;;  %505 = vmatprep.mubr.f32.mxu0 %v677_v22 }
 0x15a   :  { %v325_v41 = vld [vmem:[#allocation2 + $0x68] sm:$0xff] }
 0x15b   :  { %311 = vst.msk [vmem:[#allocation2 + $0x78] sm:$0xff] %vm40_vm0, %v295_v25  ;;  %v318_v42 = vld [vmem:[#allocation2 + $0x30] sm:$0xff]  ;;  %617 = vmatmul.mubr.msk.f32.gmra.mrb[10].mxu1 %vm40_vm0, %v325_v41 }
 0x15c   :  { %610 = vmatmul.mubr.msk.f32.gmra.mrb[12].mxu0 %vm40_vm0, %v318_v42  ;;  %553 = vmatprep.mubr.f32.mxu1 %v677_v22 }
 0x15d   :  { %511 = vmatprep.mubr.f32.mxu0 %v677_v22 }
 0x15e   :  { %v326_v51 = vld [vmem:[#allocation2 + $0x70] sm:$0xff] }
 0x15f   :  { %v319_v43 = vld [vmem:[#allocation2 + $0x38] sm:$0xff]  ;;  %618 = vmatmul.mubr.msk.f32.gmra.mrb[12].mxu1 %vm40_vm0, %v326_v51 }
 0x160   :  { %611 = vmatmul.mubr.msk.f32.gmra.mrb[14].mxu0 %vm40_vm0, %v319_v43  ;;  %559 = vmatprep.mubr.f32.mxu1 %v677_v22 }
 0x162   :  { %v327_v57 = vld [vmem:[#allocation2 + $0x78] sm:$0xff] }
 0x163   :  { %619 = vmatmul.mubr.msk.f32.gmra.mrb[14].mxu1 %vm40_vm0, %v327_v57 }
 0x216   :  { %v471_v0 = vpop.f32.mrb[0].mxu0 }
 0x217   :  { %v472_v29 = vadd.f32 %v471_v0, %v1049_v55  ;;  %v473_v52 = vpop.f32.mrb[1].mxu0 }
 0x218   :  { %v474_v22 = vadd.f32 %v473_v52, %v1051_v28 }
 0x219   :  { %566 = vst [vmem:[%s1202_s5] sm:$0xff] %v472_v29 }
 0x21a   :  { %567 = vst.msk [vmem:[%s1202_s5 + $0x8] sm:$0xff] %vm40_vm0, %v474_v22  ;;  %v519_v53 = vpop.f32.mrb[0].mxu1 }
 0x21b   :  { %v477_v56 = vpop.f32.mrb[2].mxu0  ;;  %v520_v58 = vadd.f32 %v519_v53, %v1049_v55  ;;  %v521_v59 = vpop.f32.mrb[1].mxu1 }
 0x21c   :  { %v478_v60 = vadd.f32 %v477_v56, %v1049_v55  ;;  %v479_v61 = vpop.f32.mrb[3].mxu0  ;;  %v522_v62 = vadd.f32 %v521_v59, %v1051_v28 }
 0x21d   :  { %582 = vst [vmem:[%s1202_s5 + $0x80] sm:$0xff] %v520_v58  ;;  %v480_v63 = vadd.f32 %v479_v61, %v1051_v28 }
 0x21e   :  { %568 = vst [vmem:[%s1202_s5 + $0x10] sm:$0xff] %v478_v60  ;;  %583 = vst.msk [vmem:[%s1202_s5 + $0x88] sm:$0xff] %vm40_vm0, %v522_v62  ;;  %v525_v2 = vpop.f32.mrb[2].mxu1 }
 0x21f   :  { %569 = vst.msk [vmem:[%s1202_s5 + $0x18] sm:$0xff] %vm40_vm0, %v480_v63  ;;  %v483_v1 = vpop.f32.mrb[4].mxu0  ;;  %v526_v3 = vadd.f32 %v525_v2, %v1049_v55  ;;  %v527_v10 = vpop.f32.mrb[3].mxu1 }
 0x220   :  { %v484_v36 = vadd.f32 %v483_v1, %v1049_v55  ;;  %v485_v4 = vpop.f32.mrb[5].mxu0  ;;  %v528_v5 = vadd.f32 %v527_v10, %v1051_v28 }
 0x221   :  { %584 = vst [vmem:[%s1202_s5 + $0x90] sm:$0xff] %v526_v3  ;;  %v486_v6 = vadd.f32 %v485_v4, %v1051_v28 }
 0x222   :  { %570 = vst [vmem:[%s1202_s5 + $0x20] sm:$0xff] %v484_v36  ;;  %585 = vst.msk [vmem:[%s1202_s5 + $0x98] sm:$0xff] %vm40_vm0, %v528_v5  ;;  %v531_v7 = vpop.f32.mrb[4].mxu1 }
 0x223   :  { %571 = vst.msk [vmem:[%s1202_s5 + $0x28] sm:$0xff] %vm40_vm0, %v486_v6  ;;  %v489_v8 = vpop.f32.mrb[6].mxu0  ;;  %v532_v9 = vadd.f32 %v531_v7, %v1049_v55  ;;  %v533_v12 = vpop.f32.mrb[5].mxu1 }
 0x224   :  { %v490_v11 = vadd.f32 %v489_v8, %v1049_v55  ;;  %v491_v13 = vpop.f32.mrb[7].mxu0  ;;  %v534_v23 = vadd.f32 %v533_v12, %v1051_v28 }
 0x225   :  { %586 = vst [vmem:[%s1202_s5 + $0xa0] sm:$0xff] %v532_v9  ;;  %v492_v14 = vadd.f32 %v491_v13, %v1051_v28 }
 0x226   :  { %572 = vst [vmem:[%s1202_s5 + $0x30] sm:$0xff] %v490_v11  ;;  %587 = vst.msk [vmem:[%s1202_s5 + $0xa8] sm:$0xff] %vm40_vm0, %v534_v23  ;;  %v537_v15 = vpop.f32.mrb[6].mxu1 }
 0x227   :  { %573 = vst.msk [vmem:[%s1202_s5 + $0x38] sm:$0xff] %vm40_vm0, %v492_v14  ;;  %v495_v18 = vpop.f32.mrb[8].mxu0  ;;  %v538_v44 = vadd.f32 %v537_v15, %v1049_v55  ;;  %v539_v19 = vpop.f32.mrb[7].mxu1 }
 0x228   :  { %v496_v16 = vadd.f32 %v495_v18, %v1049_v55  ;;  %v497_v37 = vpop.f32.mrb[9].mxu0  ;;  %v540_v26 = vadd.f32 %v539_v19, %v1051_v28 }
 0x229   :  { %588 = vst [vmem:[%s1202_s5 + $0xb0] sm:$0xff] %v538_v44  ;;  %v498_v17 = vadd.f32 %v497_v37, %v1051_v28 }
 0x22a   :  { %574 = vst [vmem:[%s1202_s5 + $0x40] sm:$0xff] %v496_v16  ;;  %589 = vst.msk [vmem:[%s1202_s5 + $0xb8] sm:$0xff] %vm40_vm0, %v540_v26  ;;  %v543_v35 = vpop.f32.mrb[8].mxu1 }
 0x22b   :  { %575 = vst.msk [vmem:[%s1202_s5 + $0x48] sm:$0xff] %vm40_vm0, %v498_v17  ;;  %v501_v27 = vpop.f32.mrb[10].mxu0  ;;  %v544_v30 = vadd.f32 %v543_v35, %v1049_v55  ;;  %v545_v31 = vpop.f32.mrb[9].mxu1 }
 0x22c   :  { %v502_v32 = vadd.f32 %v501_v27, %v1049_v55  ;;  %v503_v33 = vpop.f32.mrb[11].mxu0  ;;  %v546_v34 = vadd.f32 %v545_v31, %v1051_v28 }
 0x22d   :  { %590 = vst [vmem:[%s1202_s5 + $0xc0] sm:$0xff] %v544_v30  ;;  %v504_v45 = vadd.f32 %v503_v33, %v1051_v28 }
 0x22e   :  { %576 = vst [vmem:[%s1202_s5 + $0x50] sm:$0xff] %v502_v32  ;;  %591 = vst.msk [vmem:[%s1202_s5 + $0xc8] sm:$0xff] %vm40_vm0, %v546_v34  ;;  %v549_v20 = vpop.f32.mrb[10].mxu1 }
 0x22f   :  { %577 = vst.msk [vmem:[%s1202_s5 + $0x58] sm:$0xff] %vm40_vm0, %v504_v45  ;;  %v507_v21 = vpop.f32.mrb[12].mxu0  ;;  %v550_v47 = vadd.f32 %v549_v20, %v1049_v55  ;;  %v551_v38 = vpop.f32.mrb[11].mxu1 }
 0x230   :  { %v508_v39 = vadd.f32 %v507_v21, %v1049_v55  ;;  %v509_v54 = vpop.f32.mrb[13].mxu0  ;;  %v552_v40 = vadd.f32 %v551_v38, %v1051_v28 }
 0x231   :  { %592 = vst [vmem:[%s1202_s5 + $0xd0] sm:$0xff] %v550_v47  ;;  %v510_v25 = vadd.f32 %v509_v54, %v1051_v28 }
 0x232   :  { %578 = vst [vmem:[%s1202_s5 + $0x60] sm:$0xff] %v508_v39  ;;  %593 = vst.msk [vmem:[%s1202_s5 + $0xd8] sm:$0xff] %vm40_vm0, %v552_v40  ;;  %v555_v41 = vpop.f32.mrb[12].mxu1 }
 0x233   :  { %579 = vst.msk [vmem:[%s1202_s5 + $0x68] sm:$0xff] %vm40_vm0, %v510_v25  ;;  %v513_v42 = vpop.f32.mrb[14].mxu0  ;;  %v556_v51 = vadd.f32 %v555_v41, %v1049_v55  ;;  %v557_v43 = vpop.f32.mrb[13].mxu1 }
 0x234   :  { %v514_v57 = vadd.f32 %v513_v42, %v1049_v55  ;;  %v515_v46 = vpop.f32.mrb[15].mxu0  ;;  %v558_v24 = vadd.f32 %v557_v43, %v1051_v28 }
 0x235   :  { %594 = vst [vmem:[%s1202_s5 + $0xe0] sm:$0xff] %v556_v51  ;;  %v516_v48 = vadd.f32 %v515_v46, %v1051_v28 }
 0x236   :  { %580 = vst [vmem:[%s1202_s5 + $0x70] sm:$0xff] %v514_v57  ;;  %595 = vst.msk [vmem:[%s1202_s5 + $0xe8] sm:$0xff] %vm40_vm0, %v558_v24  ;;  %v561_v49 = vpop.f32.mrb[14].mxu1 }
 0x237   :  { %581 = vst.msk [vmem:[%s1202_s5 + $0x78] sm:$0xff] %vm40_vm0, %v516_v48  ;;  %v562_v50 = vadd.f32 %v561_v49, %v1049_v55  ;;  %v563_v0 = vpop.f32.mrb[15].mxu1 }
 0x238   :  { %v564_v29 = vadd.f32 %v563_v0, %v1051_v28 }
 0x239   :  { %596 = vst [vmem:[%s1202_s5 + $0xf0] sm:$0xff] %v562_v50 }
 0x23a   :  { %597 = vst.msk [vmem:[%s1202_s5 + $0xf8] sm:$0xff] %vm40_vm0, %v564_v29 }

// kernel: block_forward.7
= control target key start
LH: loop header
LB: loop body
LE: loop exit
PB: predicated region body
PF: predicated region fallthrough
CT: control target
= control target key end

     0   :  { %s1404_s12 = smov 0   ;;  %s1406_s13 = smov 0   ;;  %s1717_s0 = inlined_call_operand.vmem [shape: f32[8,64,16], index: 0, kind: input, shape index: {}]   ;;  %s1718_s1 = inlined_call_operand.vmem [shape: f32[8,64,16], index: 1, kind: input, shape index: {}]   ;;  %s1719_s2 = inlined_call_operand.vmem [shape: f32[8,64,16], index: 2, kind: input, shape index: {}]   ;;  %s1720_s3 = inlined_call_operand.vmem [shape: f32[8,64,16], index: 3, kind: output, shape index: {}]  }
   0x1   :  { %s1408_s14 = smov 0  }
   0x2 LB: > { %s32_s15 = sadd.s32 1, %s1375_s13  ;;  %p1113_p0 = scmp.ge.s32.totalorder %s1379_s14, 1  ;;  %s1379_s14 = sphi %s1408_s14, %s13_s14   ;;  %s1375_s13 = sphi %s1406_s13, %s1724_s13   ;;  %s1371_s12 = sphi %s1404_s12, %s1723_s12  }
   0x3   : > { %p34_p1 = scmp.ge.s32.totalorder %s32_s15, 8  ;;  %p199_p2 = scmp.lt.s32.totalorder %s1379_s14, 9 }
   0x5   : > { %s1726_s15 = smov (%p34_p1, %s32_s15), 0  ;;  %p200_p3 = pnand %p1113_p0, %p199_p2 }
   0x6   : > { %p250_p4 = scmp.lt.s32.totalorder (!%p200_p3), %s1371_s12, 7  ;;  %vm310_vm0 = vcmask (!%p200_p3), 130048   ;;  %vm293_vm2 = vcmask (!%p200_p3), 7168   ;;  %v1381_v21 = vmov (!%p200_p3), -inf   ;;  %vm505_vm3 = vcmask (!%p200_p3), 523264  }
   0x7   : > { %203 = sbr.rel (%p200_p3) target bundleno = 878 (0x36e), region = 32  ;;  %vm1430_vm1 = vmpackc.low (!%p200_p3), %vm310_vm0, %vm310_vm0  ;;  %294 = vst.msk [vmem:[#allocation2] sm:$0xff] (!%p200_p3), %vm293_vm2, %v1381_v21  ;;  %v1382_v46 = vmov (!%p200_p3), 0   ;;  %v1383_v47 = vmov (!%p200_p3), 0.0  }
   0x8   : > { %295 = vst.msk [vmem:[#allocation2 + $0x8] sm:$0xff] (!%p200_p3), %vm293_vm2, %v1381_v21  ;;  %296 = vst.msk [vmem:[#allocation2 + $0x10] sm:$0xff] (!%p200_p3), %vm293_vm2, %v1381_v21  ;;  %1307 = vset.pattern.permute.xlu0 (!%p200_p3), %v1382_v46  ;;  %1308 = vset.pattern.permute.xlu1 (!%p200_p3), %v1382_v46 }
   0x9   : > { %297 = vst.msk [vmem:[#allocation2 + $0x18] sm:$0xff] (!%p200_p3), %vm293_vm2, %v1381_v21  ;;  %298 = vst.msk [vmem:[#allocation2 + $0x20] sm:$0xff] (!%p200_p3), %vm293_vm2, %v1381_v21 }
   0xa   : > { %299 = vst.msk [vmem:[#allocation2 + $0x28] sm:$0xff] (!%p200_p3), %vm293_vm2, %v1381_v21  ;;  %300 = vst.msk [vmem:[#allocation2 + $0x30] sm:$0xff] (!%p200_p3), %vm293_vm2, %v1381_v21 }
   0xb   : > { %301 = vst.msk [vmem:[#allocation2 + $0x38] sm:$0xff] (!%p200_p3), %vm293_vm2, %v1381_v21  ;;  %302 = vst.msk [vmem:[#allocation3] sm:$0xff] (!%p200_p3), %vm293_vm2, %v1383_v47 }
   0xc   : > { %303 = vst.msk [vmem:[#allocation3 + $0x8] sm:$0xff] (!%p200_p3), %vm293_vm2, %v1383_v47  ;;  %304 = vst.msk [vmem:[#allocation3 + $0x10] sm:$0xff] (!%p200_p3), %vm293_vm2, %v1383_v47 }
   0xd   : > { %305 = vst.msk [vmem:[#allocation3 + $0x18] sm:$0xff] (!%p200_p3), %vm293_vm2, %v1383_v47  ;;  %306 = vst.msk [vmem:[#allocation3 + $0x20] sm:$0xff] (!%p200_p3), %vm293_vm2, %v1383_v47 }
   0xe   : > { %s1728_s12 = smov (!%p250_p4, %s1371_s12), 7  ;;  %307 = vst.msk [vmem:[#allocation3 + $0x28] sm:$0xff] %vm293_vm2, %v1383_v47  ;;  %308 = vst.msk [vmem:[#allocation3 + $0x30] sm:$0xff] %vm293_vm2, %v1383_v47  ;;  %v1528_v48 = vld [vmem:[#allocation2] sm:$0xff] }
   0xf   : > { %s1422_s16 = sshll.u32 %s1728_s12, 6  ;;  %309 = vst.msk [vmem:[#allocation3 + $0x38] sm:$0xff] %vm293_vm2, %v1383_v47  ;;  %v1533_v51 = vld [vmem:[#allocation2 + $0x8] sm:$0xff]  ;;  %v1535_v52 = vld [vmem:[#allocation2 + $0x10] sm:$0xff] }
  0x10   : > { %s267_s19 = scalar_lea.vmem %s1718_s1, %s1422_s16  ;;  %s1438_s22 = scalar_lea.vmem %s1717_s0, %s1422_s16  ;;  %311 = vst.msk [vmem:[#allocation4] sm:$0xff] %vm310_vm0, %v1383_v47  ;;  %312 = vst.msk [vmem:[#allocation4 + $0x8] sm:$0xff] %vm310_vm0, %v1383_v47  ;;  %v1556_v61 = vld [vmem:[#allocation2 + $0x18] sm:$0xff]  ;;  %v1558_v62 = vld [vmem:[#allocation2 + $0x20] sm:$0xff] }
  0x11   : > { %v327_v1 = vld [vmem:[%s267_s19] sm:$0xff]  ;;  %v328_v2 = vld [vmem:[%s267_s19 + $0x8] sm:$0xff]  ;;  %v329_v3 = vld [vmem:[%s267_s19 + $0x10] sm:$0xff]  ;;  %313 = vst.msk [vmem:[#allocation4 + $0x10] sm:$0xff] %vm310_vm0, %v1383_v47  ;;  %s1546_s25 = scalar_lea.vmem %s1719_s2, %s1422_s16  ;;  %s1690_s28 = scalar_lea.vmem %s1720_s3, %s1422_s16 }
  0x12   : > { %v1240_v4 = vpack.c.bf16 %v328_v2, %v327_v1  ;;  %v330_v5 = vld [vmem:[%s267_s19 + $0x18] sm:$0xff]  ;;  %v319_v7 = vld [vmem:[%s1438_s22] sm:$0xff]  ;;  %v332_v9 = vld [vmem:[%s267_s19 + $0x28] sm:$0xff]  ;;  %314 = vst.msk [vmem:[#allocation4 + $0x18] sm:$0xff] %vm310_vm0, %v1383_v47 }
  0x13   : > { %v1246_v6 = vpack.c.bf16 %v330_v5, %v329_v3  ;;  %1200 = vmatprep.mubr.msk.f32.mxu0 %vm310_vm0, %v319_v7  ;;  %v331_v8 = vld [vmem:[%s267_s19 + $0x20] sm:$0xff]  ;;  %v333_v11 = vld [vmem:[%s267_s19 + $0x30] sm:$0xff]  ;;  %v334_v12 = vld [vmem:[%s267_s19 + $0x38] sm:$0xff]  ;;  %315 = vst.msk [vmem:[#allocation4 + $0x20] sm:$0xff] %vm310_vm0, %v1383_v47 }
  0x14   : > { %1242 = vmatprep.subr.msk.bf16.mxu0 %vm1430_vm1, %v1240_v4  ;;  %v1252_v10 = vpack.c.bf16 %v332_v9, %v331_v8  ;;  %v1258_v13 = vpack.c.bf16 %v334_v12, %v333_v11  ;;  %v320_v14 = vld [vmem:[%s1438_s22 + $0x8] sm:$0xff]  ;;  %v321_v15 = vld [vmem:[%s1438_s22 + $0x10] sm:$0xff]  ;;  %v322_v16 = vld [vmem:[%s1438_s22 + $0x18] sm:$0xff]  ;;  %316 = vst.msk [vmem:[#allocation4 + $0x28] sm:$0xff] %vm310_vm0, %v1383_v47 }
  0x15   : > { %1245 = vmatpush3.bf16.xpose.msk.msra.mxu0 %vm1430_vm1, %v1240_v4  ;;  %v323_v17 = vld [vmem:[%s1438_s22 + $0x20] sm:$0xff]  ;;  %v324_v18 = vld [vmem:[%s1438_s22 + $0x28] sm:$0xff]  ;;  %v325_v19 = vld [vmem:[%s1438_s22 + $0x30] sm:$0xff]  ;;  %317 = vst.msk [vmem:[#allocation4 + $0x30] sm:$0xff] %vm310_vm0, %v1383_v47 }
  0x16   : > { %1248 = vmatprep.subr.msk.bf16.mxu0 %vm1430_vm1, %v1246_v6  ;;  %v326_v20 = vld [vmem:[%s1438_s22 + $0x38] sm:$0xff]  ;;  %318 = vst.msk [vmem:[#allocation4 + $0x38] sm:$0xff] %vm310_vm0, %v1383_v47  ;;  %v739_v56 = vld [vmem:[%s1546_s25] sm:$0xff]  ;;  %v740_v57 = vld [vmem:[%s1546_s25 + $0x8] sm:$0xff] }
  0x17   : > { %v1264_v60 = vpack.c.bf16 %v740_v57, %v739_v56  ;;  %v741_v3 = vld [vmem:[%s1546_s25 + $0x10] sm:$0xff]  ;;  %v742_v4 = vld [vmem:[%s1546_s25 + $0x18] sm:$0xff]  ;;  %v1577_v7 = vld [vmem:[#allocation2 + $0x28] sm:$0xff] }
  0x18   : > { %v1579_v8 = vld [vmem:[#allocation2 + $0x30] sm:$0xff]  ;;  %v1268_v9 = vpack.c.bf16 %v742_v4, %v741_v3 }
  0x19   : > { %1265 = vmatprep.subr.bf16.mxu1 %v1264_v60 }
  0x1a   : > { %1267 = vmatpush3.bf16.msra.mxu1 %v1264_v60 }
  0x1b   : > { %1269 = vmatprep.subr.bf16.mxu1 %v1268_v9 }
  0x1d   : > { %1251 = vmatpush3.bf16.xpose.msk.msra.mxu0 %vm1430_vm1, %v1246_v6 }
  0x1e   : > { %1254 = vmatprep.subr.msk.bf16.mxu0 %vm1430_vm1, %v1252_v10  ;;  %1271 = vmatpush3.bf16.msra.mxu1 %v1268_v9 }
  0x25   : > { %1257 = vmatpush3.bf16.xpose.msk.msra.mxu0 %vm1430_vm1, %v1252_v10 }
  0x26   : > { %1260 = vmatprep.subr.msk.bf16.mxu0 %vm1430_vm1, %v1258_v13 }
  0x2d   : > { %1263 = vmatpush3.bf16.xpose.msk.msra.mxu0 %vm1430_vm1, %v1258_v13 }
  0x34   : > { %1201 = vmatmul.mubr.msk.f32.vlgmr.msra.gmra.mrb[0].mxu0 %vm310_vm0, %v320_v14  ;;  %v743_v14 = vld [vmem:[%s1546_s25 + $0x20] sm:$0xff] }
  0x35   : > { %1203 = vmatprep.mubr.msk.f32.mxu0 %vm310_vm0, %v321_v15  ;;  %v744_v15 = vld [vmem:[%s1546_s25 + $0x28] sm:$0xff] }
  0x38   : > { %1204 = vmatmul.mubr.msk.f32.gmra.mrb[2].mxu0 %vm310_vm0, %v322_v16 }
  0x39   : > { %1206 = vmatprep.mubr.msk.f32.mxu0 %vm310_vm0, %v323_v17 }
  0x3c   : > { %1207 = vmatmul.mubr.msk.f32.gmra.mrb[4].mxu0 %vm310_vm0, %v324_v18  ;;  %v1598_v18 = vld [vmem:[#allocation2 + $0x38] sm:$0xff] }
  0x3d   : > { %1209 = vmatprep.mubr.msk.f32.mxu0 %vm310_vm0, %v325_v19  ;;  %v1272_v19 = vpack.c.bf16 %v744_v15, %v743_v14 }
  0x3f   : > { %1273 = vmatprep.subr.bf16.mxu1 %v1272_v19 }
  0x40   : > { %1210 = vmatmul.mubr.msk.f32.gmra.mrb[6].mxu0 %vm310_vm0, %v326_v20  ;;  %1275 = vmatpush3.bf16.msra.mxu1 %v1272_v19 }
 0x107   : > { %v1202_v22 = vpop.f32.mrb[0].mxu0 }
 0x108   : > { %v450_v23 = vpop.f32.mrb[1].mxu0  ;;  %v1482_v25 = vmul.f32 0.25, %v1202_v22 }
 0x109   : > { %v1480_v24 = vmul.f32 0.25, %v450_v23  ;;  %v745_v23 = vld [vmem:[%s1546_s25 + $0x30] sm:$0xff] }
 0x10a   : > { %v509_v31 = vsel %vm505_vm3, %v1482_v25, -inf }
 0x10b   : > { %v1205_v26 = vpop.f32.mrb[2].mxu0  ;;  %v506_v27 = vsel %vm505_vm3, %v1480_v24, -inf }
 0x10c   : > { %507 = vmax.xlane.f32.xlu0 %v506_v27  ;;  %v460_v28 = vpop.f32.mrb[3].mxu0  ;;  %v1488_v30 = vmul.f32 0.25, %v1205_v26  ;;  %v746_v26 = vld [vmem:[%s1546_s25 + $0x38] sm:$0xff] }
 0x10d   : > { %v1486_v29 = vmul.f32 0.25, %v460_v28  ;;  %v1276_v28 = vpack.c.bf16 %v746_v26, %v745_v23 }
 0x10e   : > { %v515_v37 = vsel %vm505_vm3, %v1488_v30, -inf }
 0x10f   : > { %v512_v32 = vsel %vm505_vm3, %v1486_v29, -inf  ;;  %v1208_v33 = vpop.f32.mrb[4].mxu0  ;;  %1277 = vmatprep.subr.bf16.mxu1 %v1276_v28 }
 0x110   : > { %510 = vmax.xlane.f32.xlu0 %v509_v31  ;;  %513 = vmax.xlane.f32.xlu1 %v512_v32  ;;  %v470_v34 = vpop.f32.mrb[5].mxu0  ;;  %v1494_v35 = vmul.f32 0.25, %v1208_v33 }
 0x111   : > { %v1496_v36 = vmul.f32 0.25, %v470_v34  ;;  %1279 = vmatpush3.bf16.msra.mxu1 %v1276_v28 }
 0x112   : > { %v521_v41 = vsel %vm505_vm3, %v1494_v35, -inf }
 0x113   : > { %v518_v38 = vsel %vm505_vm3, %v1496_v36, -inf  ;;  %v1211_v39 = vpop.f32.mrb[6].mxu0 }
 0x114   : > { %516 = vmax.xlane.f32.xlu1 %v515_v37  ;;  %519 = vmax.xlane.f32.xlu0 %v518_v38  ;;  %v480_v40 = vpop.f32.mrb[7].mxu0  ;;  %v1504_v42 = vmul.f32 0.25, %v1211_v39 }
 0x115   : > { %v1506_v43 = vmul.f32 0.25, %v480_v40 }
 0x116   : > { %v527_v45 = vsel %vm505_vm3, %v1504_v42, -inf }
 0x117   : > { %v524_v44 = vsel %vm505_vm3, %v1506_v43, -inf }
 0x118   : > { %522 = vmax.xlane.f32.xlu1 %v521_v41  ;;  %525 = vmax.xlane.f32.xlu0 %v524_v44 }
 0x11c   : > { %528 = vmax.xlane.f32.xlu1 %v527_v45 }
 0x199   : > { %v508_v49 = vpop.xlane.xlu0 %507 }
 0x19a   : > { %v1531_v50 = vmax.f32 %v1528_v48, %v508_v49 }
 0x19c   : > { %v538_v53 = vsub.f32 %v1528_v48, %v1531_v50  ;;  %892 = vst.msk [vmem:[#allocation2] sm:$0xff] %vm293_vm2, %v1531_v50  ;;  %564 = vperm.xlu0 %1307, %v1531_v50  }
 0x19d   : > { %v511_v54 = vpop.xlane.xlu0 %510  ;;  %v514_v55 = vpop.xlane.xlu1 %513 }
 0x19e   : > { %v1551_v58 = vmax.f32 %v1533_v51, %v511_v54  ;;  %v1554_v59 = vmax.f32 %v1535_v52, %v514_v55 }
 0x1a0   : > { %v539_v63 = vsub.f32 %v1533_v51, %v1551_v58  ;;  %893 = vst.msk [vmem:[#allocation2 + $0x8] sm:$0xff] %vm293_vm2, %v1551_v58  ;;  %v540_v0 = vsub.f32 %v1535_v52, %v1554_v59  ;;  %894 = vst.msk [vmem:[#allocation2 + $0x10] sm:$0xff] %vm293_vm2, %v1554_v59  ;;  %569 = vperm.xlu1 %1308, %v1551_v58  }
 0x1a1   : > { %v517_v1 = vpop.xlane.xlu1 %516  ;;  %v520_v2 = vpop.xlane.xlu0 %519 }
 0x1a2   : > { %v1572_v5 = vmax.f32 %v1556_v61, %v517_v1  ;;  %v1575_v6 = vmax.f32 %v1558_v62, %v520_v2 }
 0x1a4   : > { %v541_v10 = vsub.f32 %v1556_v61, %v1572_v5  ;;  %895 = vst.msk [vmem:[#allocation2 + $0x18] sm:$0xff] %vm293_vm2, %v1572_v5  ;;  %579 = vperm.xlu1 %1308, %v1572_v5   ;;  %v542_v11 = vsub.f32 %v1558_v62, %v1575_v6  ;;  %896 = vst.msk [vmem:[#allocation2 + $0x20] sm:$0xff] %vm293_vm2, %v1575_v6 }
 0x1a5   : > { %v523_v12 = vpop.xlane.xlu1 %522  ;;  %v526_v13 = vpop.xlane.xlu0 %525 }
 0x1a6   : > { %v1593_v16 = vmax.f32 %v1577_v7, %v523_v12  ;;  %v1596_v17 = vmax.f32 %v1579_v8, %v526_v13  ;;  %v554_v51 = vmul.f32 1.442695, %v542_v11 }
 0x1a8   : > { %574 = vperm.xlu1 %1308, %v1554_v59   ;;  %v543_v20 = vsub.f32 %v1577_v7, %v1593_v16  ;;  %897 = vst.msk [vmem:[#allocation2 + $0x28] sm:$0xff] %vm293_vm2, %v1593_v16  ;;  %v544_v21 = vsub.f32 %v1579_v8, %v1596_v17  ;;  %898 = vst.msk [vmem:[#allocation2 + $0x30] sm:$0xff] %vm293_vm2, %v1596_v17 }
 0x1a9   : > { %v529_v22 = vpop.xlane.xlu1 %528 }
 0x1aa   : > { %v1612_v27 = vmax.f32 %v1598_v18, %v529_v22  ;;  %v556_v48 = vmul.f32 1.442695, %v543_v20  ;;  %v558_v50 = vmul.f32 1.442695, %v544_v21 }
 0x1ac   : > { %589 = vperm.xlu1 %1308, %v1593_v16   ;;  %v545_v31 = vsub.f32 %v1598_v18, %v1612_v27  ;;  %899 = vst.msk [vmem:[#allocation2 + $0x38] sm:$0xff] %vm293_vm2, %v1612_v27  ;;  %v629_v18 = vld [vmem:[#allocation3 + $0x18] sm:$0xff] }
 0x1ae   : > { %v560_v52 = vmul.f32 1.442695, %v545_v31  ;;  %v628_v31 = vld [vmem:[#allocation3 + $0x10] sm:$0xff] }
 0x1b0   : > { %584 = vperm.xlu1 %1308, %v1575_v6   ;;  %v626_v6 = vld [vmem:[#allocation3] sm:$0xff] }
 0x1b4   : > { %594 = vperm.xlu1 %1308, %v1596_v17  }
 0x1b8   : > { %599 = vperm.xlu1 %1308, %v1612_v27  }
 0x21b   : > { %v565_v32 = vpop.permute.xlu0 %564 }
 0x21c   : > { %v602_v33 = vsub.f32 %v1480_v24, %v565_v32  ;;  %v548_v32 = vmul.f32 1.442695, %v539_v63 }
 0x21e   : > { %v610_v34 = vmul.f32 1.442695, %v602_v33  ;;  %v546_v33 = vmul.f32 1.442695, %v538_v53 }
 0x21f   : > { %v570_v37 = vpop.permute.xlu1 %569 }
 0x220   : > { %1309 = vpow2.f32 %v610_v34  ;;  %v603_v38 = vsub.f32 %v1482_v25, %v570_v37  ;;  %v550_v34 = vmul.f32 1.442695, %v540_v0  ;;  %v552_v37 = vmul.f32 1.442695, %v541_v10  ;;  %v627_v10 = vld [vmem:[#allocation3 + $0x8] sm:$0xff] }
 0x222   : > { %v612_v39 = vmul.f32 1.442695, %v603_v38 }
 0x223   : > { %v580_v40 = vpop.permute.xlu1 %579 }
 0x224   : > { %1311 = vpow2.f32 %v612_v39  ;;  %v605_v41 = vsub.f32 %v1488_v30, %v580_v40 }
 0x226   : > { %v616_v44 = vmul.f32 1.442695, %v605_v41 }
 0x227   : > { %v575_v45 = vpop.permute.xlu1 %574 }
 0x228   : > { %1313 = vpow2.f32 %v616_v44  ;;  %v604_v46 = vsub.f32 %v1486_v29, %v575_v45  ;;  %v631_v44 = vld [vmem:[#allocation3 + $0x28] sm:$0xff] }
 0x22a   : > { %v1310_v47 = vpop.eup %1309  ;;  %v614_v49 = vmul.f32 1.442695, %v604_v46 }
 0x22b   : > { %v590_v54 = vpop.permute.xlu1 %589  ;;  %1228 = vmatprep.mubr.msk.f32.mxu1 %vm505_vm3, %v1310_v47  ;;  %v642_v24 = vsel %vm505_vm3, %v1310_v47, 0.0 }
 0x22c   : > { %1315 = vpow2.f32 %v614_v49  ;;  %v607_v25 = vsub.f32 %v1494_v35, %v590_v54  ;;  %643 = vadd.xlane.f32.xlu1 %v642_v24  ;;  %v630_v54 = vld [vmem:[#allocation3 + $0x20] sm:$0xff] }
 0x22e   : > { %v1312_v55 = vpop.eup %1311  ;;  %v620_v56 = vmul.f32 1.442695, %v607_v25 }
 0x22f   : > { %v585_v57 = vpop.permute.xlu1 %584  ;;  %1229 = vmatmul.mubr.msk.f32.vlgmr.msra.gmra.mrb[0].mxu1 %vm505_vm3, %v1312_v55  ;;  %v645_v30 = vsel %vm505_vm3, %v1312_v55, 0.0 }
 0x230   : > { %1317 = vpow2.f32 %v620_v56  ;;  %v606_v29 = vsub.f32 %v1496_v36, %v585_v57  ;;  %646 = vadd.xlane.f32.xlu0 %v645_v30  ;;  %v632_v57 = vld [vmem:[#allocation3 + $0x30] sm:$0xff] }
 0x232   : > { %v1314_v60 = vpop.eup %1313  ;;  %v618_v1 = vmul.f32 1.442695, %v606_v29 }
 0x233   : > { %v595_v2 = vpop.permute.xlu1 %594  ;;  %v651_v3 = vsel %vm505_vm3, %v1314_v60, 0.0 }
 0x234   : > { %1319 = vpow2.f32 %v618_v1  ;;  %v608_v35 = vsub.f32 %v1506_v43, %v595_v2  ;;  %652 = vadd.xlane.f32.xlu1 %v651_v3  ;;  %v633_v2 = vld [vmem:[#allocation3 + $0x38] sm:$0xff] }
 0x236   : > { %v1316_v4 = vpop.eup %1315  ;;  %v622_v9 = vmul.f32 1.442695, %v608_v35 }
 0x237   : > { %v600_v12 = vpop.permute.xlu1 %599  ;;  %1231 = vmatprep.mubr.msk.f32.mxu1 %vm505_vm3, %v1316_v4  ;;  %v648_v13 = vsel %vm505_vm3, %v1316_v4, 0.0 }
 0x238   : > { %1321 = vpow2.f32 %v622_v9  ;;  %v609_v36 = vsub.f32 %v1504_v42, %v600_v12  ;;  %649 = vadd.xlane.f32.xlu0 %v648_v13  ;;  %1232 = vmatmul.mubr.msk.f32.gmra.mrb[2].mxu1 %vm505_vm3, %v1314_v60 }
 0x23a   : > { %v1318_v14 = vpop.eup %1317  ;;  %v624_v15 = vmul.f32 1.442695, %v609_v36 }
 0x23b   : > { %v657_v19 = vsel %vm505_vm3, %v1318_v14, 0.0 }
 0x23c   : > { %1323 = vpow2.f32 %v624_v15  ;;  %658 = vadd.xlane.f32.xlu1 %v657_v19  ;;  %v684_v15 = vld [vmem:[#allocation4 + $0x8] sm:$0xff] }
 0x23d   : > { %1325 = vpow2.f32 %v548_v32 }
 0x23e   : > { %v1320_v43 = vpop.eup %1319  ;;  %1327 = vpow2.f32 %v546_v33 }
 0x23f   : > { %1234 = vmatprep.mubr.msk.f32.mxu1 %vm505_vm3, %v1320_v43  ;;  %v654_v22 = vsel %vm505_vm3, %v1320_v43, 0.0  ;;  %1329 = vpow2.f32 %v550_v34  ;;  %v683_v43 = vld [vmem:[#allocation4] sm:$0xff]  ;;  %v686_v34 = vld [vmem:[#allocation4 + $0x18] sm:$0xff] }
 0x240   : > { %655 = vadd.xlane.f32.xlu0 %v654_v22  ;;  %1235 = vmatmul.mubr.msk.f32.gmra.mrb[4].mxu1 %vm505_vm3, %v1318_v14  ;;  %1331 = vpow2.f32 %v552_v37 }
 0x241   : > { %1333 = vpow2.f32 %v554_v51  ;;  %v685_v51 = vld [vmem:[#allocation4 + $0x10] sm:$0xff] }
 0x242   : > { %v1322_v23 = vpop.eup %1321  ;;  %1335 = vpow2.f32 %v556_v48 }
 0x243   : > { %1237 = vmatprep.mubr.msk.f32.mxu1 %vm505_vm3, %v1322_v23  ;;  %v660_v42 = vsel %vm505_vm3, %v1322_v23, 0.0  ;;  %1337 = vpow2.f32 %v558_v50 }
 0x244   : > { %661 = vadd.xlane.f32.xlu0 %v660_v42  ;;  %1339 = vpow2.f32 %v560_v52 }
 0x246   : > { %v1324_v26 = vpop.eup %1323 }
 0x247   : > { %1238 = vmatmul.mubr.msk.f32.gmra.mrb[6].mxu1 %vm505_vm3, %v1324_v26  ;;  %v663_v28 = vsel %vm505_vm3, %v1324_v26, 0.0  ;;  %v1326_v53 = vpop.eup %1325 }
 0x248   : > { %664 = vadd.xlane.f32.xlu1 %v663_v28  ;;  %v1328_v58 = vpop.eup %1327  ;;  %v635_v16 = vmul.f32 %v1326_v53, %v627_v10 }
 0x249   : > { %v1330_v59 = vpop.eup %1329  ;;  %v634_v7 = vmul.f32 %v1328_v58, %v626_v6 }
 0x24a   : > { %v1332_v61 = vpop.eup %1331  ;;  %v636_v40 = vmul.f32 %v1330_v59, %v628_v31 }
 0x24b   : > { %v1334_v62 = vpop.eup %1333  ;;  %v637_v21 = vmul.f32 %v1332_v61, %v629_v18 }
 0x24c   : > { %v1336_v63 = vpop.eup %1335  ;;  %v638_v55 = vmul.f32 %v1334_v62, %v630_v54 }
 0x24d   : > { %v1338_v0 = vpop.eup %1337  ;;  %v639_v47 = vmul.f32 %v1336_v63, %v631_v44 }
 0x24e   : > { %v1340_v5 = vpop.eup %1339  ;;  %v640_v60 = vmul.f32 %v1338_v0, %v632_v57 }
 0x24f   : > { %v641_v4 = vmul.f32 %v1340_v5, %v633_v2 }
 0x259   : > { %698 = vperm.xlu1 %1308, %v1326_v53  }
 0x25a   : > { %693 = vperm.xlu0 %1307, %v1328_v58  }
 0x25d   : > { %703 = vperm.xlu1 %1308, %v1330_v59  }
 0x25e   : > { %708 = vperm.xlu0 %1307, %v1332_v61  }
 0x261   : > { %713 = vperm.xlu1 %1308, %v1334_v62   ;;  %v688_v62 = vld [vmem:[#allocation4 + $0x28] sm:$0xff] }
 0x262   : > { %718 = vperm.xlu0 %1307, %v1336_v63  }
 0x265   : > { %723 = vperm.xlu1 %1308, %v1338_v0   ;;  %v687_v0 = vld [vmem:[#allocation4 + $0x20] sm:$0xff] }
 0x266   : > { %728 = vperm.xlu0 %1307, %v1340_v5  }
 0x2b9   : > { %v644_v8 = vpop.xlane.xlu1 %643 }
 0x2ba   : > { %v666_v11 = vadd.f32 %v644_v8, %v634_v7 }
 0x2bc   : > { %675 = vst.msk [vmem:[#allocation3] sm:$0xff] %vm293_vm2, %v666_v11 }
 0x2bd   : > { %v647_v17 = vpop.xlane.xlu0 %646 }
 0x2be   : > { %v667_v20 = vadd.f32 %v647_v17, %v635_v16  ;;  %v690_v17 = vld [vmem:[#allocation4 + $0x38] sm:$0xff] }
 0x2c0   : > { %676 = vst.msk [vmem:[#allocation3 + $0x8] sm:$0xff] %vm293_vm2, %v667_v20  ;;  %v689_v20 = vld [vmem:[#allocation4 + $0x30] sm:$0xff] }
 0x2c1   : > { %v653_v27 = vpop.xlane.xlu1 %652 }
 0x2c2   : > { %v669_v38 = vadd.f32 %v653_v27, %v637_v21 }
 0x2c3   : > { %v911_v39 = vld [vmem:[#allocation3] sm:$0xff] }
 0x2c4   : > { %678 = vst.msk [vmem:[#allocation3 + $0x18] sm:$0xff] %vm293_vm2, %v669_v38  ;;  %921 = vperm.xlu1 %1308, %v911_v39  }
 0x2c5   : > { %v650_v41 = vpop.xlane.xlu0 %649 }
 0x2c6   : > { %v668_v45 = vadd.f32 %v650_v41, %v636_v40 }
 0x2c7   : > { %v912_v46 = vld [vmem:[#allocation3 + $0x8] sm:$0xff] }
 0x2c8   : > { %677 = vst.msk [vmem:[#allocation3 + $0x10] sm:$0xff] %vm293_vm2, %v668_v45  ;;  %926 = vperm.xlu0 %1307, %v912_v46  }
 0x2c9   : > { %v659_v49 = vpop.xlane.xlu1 %658 }
 0x2ca   : > { %v671_v24 = vadd.f32 %v659_v49, %v639_v47 }
 0x2cb   : > { %v914_v25 = vld [vmem:[#allocation3 + $0x18] sm:$0xff] }
 0x2cc   : > { %680 = vst.msk [vmem:[#allocation3 + $0x28] sm:$0xff] %vm293_vm2, %v671_v24  ;;  %936 = vperm.xlu0 %1307, %v914_v25  }
 0x2cd   : > { %v656_v56 = vpop.xlane.xlu0 %655 }
 0x2ce   : > { %v670_v30 = vadd.f32 %v656_v56, %v638_v55 }
 0x2cf   : > { %v913_v29 = vld [vmem:[#allocation3 + $0x10] sm:$0xff] }
 0x2d0   : > { %679 = vst.msk [vmem:[#allocation3 + $0x20] sm:$0xff] %vm293_vm2, %v670_v30  ;;  %931 = vperm.xlu1 %1308, %v913_v29  }
 0x2d1   : > { %v662_v1 = vpop.xlane.xlu0 %661 }
 0x2d2   : > { %v672_v3 = vadd.f32 %v662_v1, %v640_v60 }
 0x2d3   : > { %v916_v35 = vld [vmem:[#allocation3 + $0x28] sm:$0xff] }
 0x2d4   : > { %681 = vst.msk [vmem:[#allocation3 + $0x30] sm:$0xff] %vm293_vm2, %v672_v3  ;;  %946 = vperm.xlu0 %1307, %v916_v35  }
 0x2d5   : > { %v665_v9 = vpop.xlane.xlu1 %664 }
 0x2d6   : > { %v673_v12 = vadd.f32 %v665_v9, %v641_v4 }
 0x2d7   : > { %v915_v13 = vld [vmem:[#allocation3 + $0x20] sm:$0xff] }
 0x2d8   : > { %682 = vst.msk [vmem:[#allocation3 + $0x38] sm:$0xff] %vm293_vm2, %v673_v12  ;;  %941 = vperm.xlu1 %1308, %v915_v13  }
 0x2d9   : > { %v699_v19 = vpop.permute.xlu1 %698  ;;  %v694_v22 = vpop.permute.xlu0 %693 }
 0x2da   : > { %v732_v23 = vmul.f32 %v699_v19, %v684_v15  ;;  %v731_v42 = vmul.f32 %v694_v22, %v683_v43 }
 0x2db   : > { %v917_v36 = vld [vmem:[#allocation3 + $0x30] sm:$0xff] }
 0x2dc   : > { %951 = vperm.xlu1 %1308, %v917_v36  }
 0x2dd   : > { %v709_v37 = vpop.permute.xlu0 %708  ;;  %v704_v48 = vpop.permute.xlu1 %703 }
 0x2de   : > { %v734_v50 = vmul.f32 %v709_v37, %v686_v34  ;;  %v733_v52 = vmul.f32 %v704_v48, %v685_v51 }
 0x2df   : > { %v918_v14 = vld [vmem:[#allocation3 + $0x38] sm:$0xff] }
 0x2e0   : > { %956 = vperm.xlu0 %1307, %v918_v14  }
 0x2e1   : > { %v719_v63 = vpop.permute.xlu0 %718  ;;  %v714_v5 = vpop.permute.xlu1 %713 }
 0x2e2   : > { %v736_v6 = vmul.f32 %v719_v63, %v688_v62  ;;  %v735_v7 = vmul.f32 %v714_v5, %v687_v0 }
 0x2e5   : > { %v729_v18 = vpop.permute.xlu0 %728  ;;  %v724_v21 = vpop.permute.xlu1 %723 }
 0x2e6   : > { %v738_v27 = vmul.f32 %v729_v18, %v690_v17  ;;  %v737_v31 = vmul.f32 %v724_v21, %v689_v20 }
 0x302   : > { %v1230_v26 = vpop.f32.mrb[0].mxu1 }
 0x303   : > { %v877_v28 = vadd.f32 %v1230_v26, %v732_v23  ;;  %v837_v32 = vpop.f32.mrb[1].mxu1 }
 0x304   : > { %v876_v33 = vadd.f32 %v837_v32, %v731_v42 }
 0x305   : > { %885 = vst.msk [vmem:[#allocation4 + $0x8] sm:$0xff] %vm310_vm0, %v877_v28 }
 0x306   : > { %884 = vst.msk [vmem:[#allocation4] sm:$0xff] %vm310_vm0, %v876_v33 }
 0x30b   : > { %v1233_v53 = vpop.f32.mrb[2].mxu1 }
 0x30c   : > { %v879_v58 = vadd.f32 %v1233_v53, %v734_v50  ;;  %v847_v59 = vpop.f32.mrb[3].mxu1  ;;  %v904_v55 = vld [vmem:[#allocation4 + $0x8] sm:$0xff] }
 0x30d   : > { %v878_v61 = vadd.f32 %v847_v59, %v733_v52  ;;  %v903_v49 = vld [vmem:[#allocation4] sm:$0xff] }
 0x30e   : > { %887 = vst.msk [vmem:[#allocation4 + $0x18] sm:$0xff] %vm310_vm0, %v879_v58 }
 0x30f   : > { %886 = vst.msk [vmem:[#allocation4 + $0x10] sm:$0xff] %vm310_vm0, %v878_v61 }
 0x313   : > { %v1236_v8 = vpop.f32.mrb[4].mxu1 }
 0x314   : > { %v881_v10 = vadd.f32 %v1236_v8, %v736_v6  ;;  %v857_v11 = vpop.f32.mrb[5].mxu1 }
 0x315   : > { %v880_v16 = vadd.f32 %v857_v11, %v735_v7  ;;  %v906_v29 = vld [vmem:[#allocation4 + $0x18] sm:$0xff] }
 0x316   : > { %889 = vst.msk [vmem:[#allocation4 + $0x28] sm:$0xff] %vm310_vm0, %v881_v10  ;;  %v905_v3 = vld [vmem:[#allocation4 + $0x10] sm:$0xff] }
 0x317   : > { %888 = vst.msk [vmem:[#allocation4 + $0x20] sm:$0xff] %vm310_vm0, %v880_v16 }
 0x31a   : > { %v1239_v38 = vpop.f32.mrb[6].mxu1 }
 0x31b   : > { %v883_v39 = vadd.f32 %v1239_v38, %v738_v27  ;;  %v867_v40 = vpop.f32.mrb[7].mxu1 }
 0x31c   : > { %v882_v41 = vadd.f32 %v867_v40, %v737_v31 }
 0x31d   : > { %891 = vst.msk [vmem:[#allocation4 + $0x38] sm:$0xff] %vm310_vm0, %v883_v39  ;;  %v908_v12 = vld [vmem:[#allocation4 + $0x28] sm:$0xff] }
 0x31e   : > { %890 = vst.msk [vmem:[#allocation4 + $0x30] sm:$0xff] %vm310_vm0, %v882_v41  ;;  %v907_v15 = vld [vmem:[#allocation4 + $0x20] sm:$0xff] }
 0x324   : > { %v910_v26 = vld [vmem:[#allocation4 + $0x38] sm:$0xff] }
 0x325   : > { %v909_v22 = vld [vmem:[#allocation4 + $0x30] sm:$0xff] }
 0x343   : > { %v922_v44 = vpop.permute.xlu1 %921 }
 0x344   : > { %1341 = vrcp.f32 %v922_v44 }
 0x347   : > { %v927_v45 = vpop.permute.xlu0 %926 }
 0x348   : > { %1343 = vrcp.f32 %v927_v45 }
 0x34b   : > { %v937_v46 = vpop.permute.xlu0 %936 }
 0x34c   : > { %1345 = vrcp.f32 %v937_v46 }
 0x34e   : > { %v1342_v47 = vpop.eup %1341 }
 0x34f   : > { %v960_v54 = vmul.f32 %v1342_v47, %v903_v49  ;;  %v932_v24 = vpop.permute.xlu1 %931 }
 0x350   : > { %1347 = vrcp.f32 %v932_v24 }
 0x351   : > { %975 = vst.msk [vmem:[%s1690_s28] sm:$0xff] %vm310_vm0, %v960_v54 }
 0x352   : > { %v1344_v25 = vpop.eup %1343 }
 0x353   : > { %v962_v56 = vmul.f32 %v1344_v25, %v904_v55  ;;  %v947_v57 = vpop.permute.xlu0 %946 }
 0x354   : > { %1349 = vrcp.f32 %v947_v57 }
 0x355   : > { %976 = vst.msk [vmem:[%s1690_s28 + $0x8] sm:$0xff] %vm310_vm0, %v962_v56 }
 0x356   : > { %v1346_v30 = vpop.eup %1345 }
 0x357   : > { %v966_v60 = vmul.f32 %v1346_v30, %v906_v29  ;;  %v942_v1 = vpop.permute.xlu1 %941 }
 0x358   : > { %1351 = vrcp.f32 %v942_v1 }
 0x359   : > { %978 = vst.msk [vmem:[%s1690_s28 + $0x18] sm:$0xff] %vm310_vm0, %v966_v60 }
 0x35a   : > { %v1348_v2 = vpop.eup %1347 }
 0x35b   : > { %v964_v35 = vmul.f32 %v1348_v2, %v905_v3  ;;  %v952_v4 = vpop.permute.xlu1 %951 }
 0x35c   : > { %1353 = vrcp.f32 %v952_v4 }
 0x35d   : > { %977 = vst.msk [vmem:[%s1690_s28 + $0x10] sm:$0xff] %vm310_vm0, %v964_v35 }
 0x35e   : > { %v1350_v9 = vpop.eup %1349 }
 0x35f   : > { %v970_v13 = vmul.f32 %v1350_v9, %v908_v12  ;;  %v957_v36 = vpop.permute.xlu0 %956 }
 0x360   : > { %1355 = vrcp.f32 %v957_v36 }
 0x361   : > { %980 = vst.msk [vmem:[%s1690_s28 + $0x28] sm:$0xff] %vm310_vm0, %v970_v13 }
 0x362   : > { %v1352_v14 = vpop.eup %1351 }
 0x363   : > { %v968_v19 = vmul.f32 %v1352_v14, %v907_v15 }
 0x365   : > { %979 = vst.msk [vmem:[%s1690_s28 + $0x20] sm:$0xff] %vm310_vm0, %v968_v19 }
 0x366   : > { %v1354_v43 = vpop.eup %1353 }
 0x367   : > { %v972_v23 = vmul.f32 %v1354_v43, %v909_v22 }
 0x369   : > { %981 = vst.msk [vmem:[%s1690_s28 + $0x30] sm:$0xff] %vm310_vm0, %v972_v23 }
 0x36a   : > { %v1356_v42 = vpop.eup %1355 }
 0x36b   : > { %v974_v28 = vmul.f32 %v1356_v42, %v910_v26 }
 0x36d   : > { %982 = vst.msk [vmem:[%s1690_s28 + $0x38] sm:$0xff] %vm310_vm0, %v974_v28 }
 0x36e PF: > { %s13_s14 = sadd.s32 1, %s1379_s14   ;;  %s1723_s12 = smov %s1375_s13 }
 0x36f   : > { %p10_p5 = scmp.ge.s32.totalorder %s13_s14, 10   ;;  %s1724_s13 = smov %s1726_s15 }
 0x371   :  { %12 = sbr.rel (!%p10_p5) target bundleno = 2 (0x2), region = 76 }

// kernel: block_forward.8
= control target key start
LH: loop header
LB: loop body
LE: loop exit
PB: predicated region body
PF: predicated region fallthrough
CT: control target
= control target key end

     0   :  { %vm21_vm0 = vcmask 523264   ;;  %v504_v3 = vmov 0.0   ;;  %s783_s1 = inlined_call_operand.vmem [shape: f32[64,64], index: 1, kind: input, shape index: {}]   ;;  %s784_s0 = inlined_call_operand.vmem [shape: f32[128,64], index: 0, kind: input, shape index: {}]   ;;  %s785_s2 = inlined_call_operand.vmem [shape: f32[1,64], index: 2, kind: input, shape index: {}]   ;;  %s786_s3 = inlined_call_operand.vmem [shape: f32[128,64], index: 3, kind: input, shape index: {}]   ;;  %s787_s4 = inlined_call_operand.vmem [shape: f32[128,64], index: 4, kind: output, shape index: {}]  }
   0x1   :  { %v70_v0 = vld [vmem:[%s783_s1] sm:$0xff]  ;;  %v71_v1 = vld [vmem:[%s783_s1 + $0x8] sm:$0xff]  ;;  %v72_v2 = vld [vmem:[%s783_s1 + $0x10] sm:$0xff]  ;;  %23 = vst.msk [vmem:[#allocation2 + $0x8] sm:$0xff] %vm21_vm0, %v504_v3 }
   0x2   :  { %22 = vst.msk [vmem:[#allocation2] sm:$0xff] %vm21_vm0, %v504_v3  ;;  %24 = vst.msk [vmem:[#allocation2 + $0x10] sm:$0xff] %vm21_vm0, %v504_v3  ;;  %v479_v4 = vpack.c.bf16 %v71_v1, %v70_v0  ;;  %v73_v5 = vld [vmem:[%s783_s1 + $0x18] sm:$0xff]  ;;  %v74_v7 = vld [vmem:[%s783_s1 + $0x20] sm:$0xff] }
   0x3   :  { %25 = vst.msk [vmem:[#allocation2 + $0x18] sm:$0xff] %vm21_vm0, %v504_v3  ;;  %26 = vst.msk [vmem:[#allocation2 + $0x20] sm:$0xff] %vm21_vm0, %v504_v3  ;;  %v483_v6 = vpack.c.bf16 %v73_v5, %v72_v2  ;;  %v75_v8 = vld [vmem:[%s783_s1 + $0x28] sm:$0xff]  ;;  %v54_v9 = vld [vmem:[%s784_s0] sm:$0xff] }
   0x4   :  { %27 = vst.msk [vmem:[#allocation2 + $0x28] sm:$0xff] %vm21_vm0, %v504_v3  ;;  %28 = vst.msk [vmem:[#allocation2 + $0x30] sm:$0xff] %vm21_vm0, %v504_v3  ;;  %480 = vmatprep.subr.bf16.mxu0 %v479_v4  ;;  %495 = vmatprep.subr.bf16.mxu1 %v479_v4  ;;  %v62_v10 = vld [vmem:[%s784_s0 + $0x40] sm:$0xff]  ;;  %v487_v11 = vpack.c.bf16 %v75_v8, %v74_v7  ;;  %v76_v12 = vld [vmem:[%s783_s1 + $0x30] sm:$0xff] }
   0x5   :  { %29 = vst.msk [vmem:[#allocation2 + $0x38] sm:$0xff] %vm21_vm0, %v504_v3  ;;  %30 = vst.msk [vmem:[#allocation2 + $0x40] sm:$0xff] %vm21_vm0, %v504_v3  ;;  %482 = vmatpush3.bf16.msra.mxu0 %v479_v4  ;;  %499 = vmatpush3.bf16.msra.mxu1 %v479_v4  ;;  %v77_v13 = vld [vmem:[%s783_s1 + $0x38] sm:$0xff]  ;;  %v55_v15 = vld [vmem:[%s784_s0 + $0x8] sm:$0xff] }
   0x6   :  { %31 = vst.msk [vmem:[#allocation2 + $0x48] sm:$0xff] %vm21_vm0, %v504_v3  ;;  %32 = vst.msk [vmem:[#allocation2 + $0x50] sm:$0xff] %vm21_vm0, %v504_v3  ;;  %484 = vmatprep.subr.bf16.mxu0 %v483_v6  ;;  %496 = vmatprep.subr.bf16.mxu1 %v483_v6  ;;  %v491_v14 = vpack.c.bf16 %v77_v13, %v76_v12  ;;  %v63_v16 = vld [vmem:[%s784_s0 + $0x48] sm:$0xff]  ;;  %v56_v17 = vld [vmem:[%s784_s0 + $0x10] sm:$0xff] }
   0x7   :  { %33 = vst.msk [vmem:[#allocation2 + $0x58] sm:$0xff] %vm21_vm0, %v504_v3  ;;  %34 = vst.msk [vmem:[#allocation2 + $0x60] sm:$0xff] %vm21_vm0, %v504_v3  ;;  %455 = vmatprep.mubr.msk.f32.mxu0 %vm21_vm0, %v54_v9  ;;  %467 = vmatprep.mubr.msk.f32.mxu1 %vm21_vm0, %v62_v10  ;;  %v64_v18 = vld [vmem:[%s784_s0 + $0x50] sm:$0xff]  ;;  %v57_v19 = vld [vmem:[%s784_s0 + $0x18] sm:$0xff] }
   0x8   :  { %35 = vst.msk [vmem:[#allocation2 + $0x68] sm:$0xff] %vm21_vm0, %v504_v3  ;;  %36 = vst.msk [vmem:[#allocation2 + $0x70] sm:$0xff] %vm21_vm0, %v504_v3  ;;  %v65_v20 = vld [vmem:[%s784_s0 + $0x58] sm:$0xff]  ;;  %v58_v21 = vld [vmem:[%s784_s0 + $0x20] sm:$0xff] }
   0x9   :  { %37 = vst.msk [vmem:[#allocation2 + $0x78] sm:$0xff] %vm21_vm0, %v504_v3  ;;  %486 = vmatpush3.bf16.msra.mxu0 %v483_v6  ;;  %500 = vmatpush3.bf16.msra.mxu1 %v483_v6  ;;  %v66_v22 = vld [vmem:[%s784_s0 + $0x60] sm:$0xff]  ;;  %v59_v23 = vld [vmem:[%s784_s0 + $0x28] sm:$0xff]  ;;  %v60_v25 = vld [vmem:[%s784_s0 + $0x30] sm:$0xff] }
   0xa   :  { %488 = vmatprep.subr.bf16.mxu0 %v487_v11  ;;  %497 = vmatprep.subr.bf16.mxu1 %v487_v11  ;;  %v67_v24 = vld [vmem:[%s784_s0 + $0x68] sm:$0xff]  ;;  %v68_v26 = vld [vmem:[%s784_s0 + $0x70] sm:$0xff]  ;;  %v61_v27 = vld [vmem:[%s784_s0 + $0x38] sm:$0xff] }
   0xb   :  { %v69_v28 = vld [vmem:[%s784_s0 + $0x78] sm:$0xff]  ;;  %v39_v29 = vld [vmem:[#allocation2 + $0x8] sm:$0xff]  ;;  %v38_v31 = vld [vmem:[#allocation2] sm:$0xff] }
   0xc   :  { %v46_v32 = vld [vmem:[#allocation2 + $0x40] sm:$0xff]  ;;  %v41_v41 = vld [vmem:[#allocation2 + $0x18] sm:$0xff]  ;;  %v40_v43 = vld [vmem:[#allocation2 + $0x10] sm:$0xff] }
   0xd   :  { %490 = vmatpush3.bf16.msra.mxu0 %v487_v11  ;;  %501 = vmatpush3.bf16.msra.mxu1 %v487_v11  ;;  %v47_v30 = vld [vmem:[#allocation2 + $0x48] sm:$0xff]  ;;  %v48_v44 = vld [vmem:[#allocation2 + $0x50] sm:$0xff]  ;;  %v641_v55 = vld [vmem:[%s785_s2] ss:$0 sm:$0xff] }
   0xe   :  { %492 = vmatprep.subr.bf16.mxu0 %v491_v14  ;;  %498 = vmatprep.subr.bf16.mxu1 %v491_v14  ;;  %v49_v42 = vld [vmem:[#allocation2 + $0x58] sm:$0xff]  ;;  %v43_v53 = vld [vmem:[#allocation2 + $0x28] sm:$0xff]  ;;  %v42_v56 = vld [vmem:[#allocation2 + $0x20] sm:$0xff] }
   0xf   :  { %v51_v54 = vld [vmem:[#allocation2 + $0x68] sm:$0xff]  ;;  %v50_v57 = vld [vmem:[#allocation2 + $0x60] sm:$0xff]  ;;  %v45_v62 = vld [vmem:[#allocation2 + $0x38] sm:$0xff] }
  0x10   :  { %v347_v58 = vld [vmem:[%s786_s3 + $0x8] sm:$0xff]  ;;  %v346_v63 = vld [vmem:[%s786_s3] sm:$0xff]  ;;  %v53_v5 = vld [vmem:[#allocation2 + $0x78] sm:$0xff] }
  0x11   :  { %494 = vmatpush3.bf16.msra.mxu0 %v491_v14  ;;  %502 = vmatpush3.bf16.msra.mxu1 %v491_v14  ;;  %v355_v59 = vld [vmem:[%s786_s3 + $0x48] sm:$0xff]  ;;  %v354_v0 = vld [vmem:[%s786_s3 + $0x40] sm:$0xff]  ;;  %v44_v10 = vld [vmem:[#allocation2 + $0x30] sm:$0xff] }
  0x14   :  { %456 = vmatmul.mubr.msk.f32.vlgmr.msra.gmra.mrb[0].mxu0 %vm21_vm0, %v55_v15  ;;  %468 = vmatmul.mubr.msk.f32.vlgmr.msra.gmra.mrb[0].mxu1 %vm21_vm0, %v63_v16  ;;  %v52_v15 = vld [vmem:[#allocation2 + $0x70] sm:$0xff] }
  0x15   :  { %458 = vmatprep.mubr.msk.f32.mxu0 %vm21_vm0, %v56_v17  ;;  %470 = vmatprep.mubr.msk.f32.mxu1 %vm21_vm0, %v64_v18 }
  0x18   :  { %459 = vmatmul.mubr.msk.f32.gmra.mrb[2].mxu0 %vm21_vm0, %v57_v19  ;;  %471 = vmatmul.mubr.msk.f32.gmra.mrb[2].mxu1 %vm21_vm0, %v65_v20 }
  0x19   :  { %461 = vmatprep.mubr.msk.f32.mxu0 %vm21_vm0, %v58_v21  ;;  %473 = vmatprep.mubr.msk.f32.mxu1 %vm21_vm0, %v66_v22  ;;  %v349_v22 = vld [vmem:[%s786_s3 + $0x18] sm:$0xff] }
  0x1c   :  { %462 = vmatmul.mubr.msk.f32.gmra.mrb[4].mxu0 %vm21_vm0, %v59_v23  ;;  %474 = vmatmul.mubr.msk.f32.gmra.mrb[4].mxu1 %vm21_vm0, %v67_v24  ;;  %v357_v23 = vld [vmem:[%s786_s3 + $0x58] sm:$0xff] }
  0x1d   :  { %464 = vmatprep.mubr.msk.f32.mxu0 %vm21_vm0, %v60_v25  ;;  %476 = vmatprep.mubr.msk.f32.mxu1 %vm21_vm0, %v68_v26 }
  0x20   :  { %465 = vmatmul.mubr.msk.f32.gmra.mrb[6].mxu0 %vm21_vm0, %v61_v27  ;;  %477 = vmatmul.mubr.msk.f32.gmra.mrb[6].mxu1 %vm21_vm0, %v69_v28 }
  0xe7   :  { %v457_v33 = vpop.f32.mrb[0].mxu0  ;;  %v469_v34 = vpop.f32.mrb[0].mxu1 }
  0xe8   :  { %v273_v35 = vadd.f32 %v457_v33, %v39_v29  ;;  %v281_v36 = vadd.f32 %v469_v34, %v47_v30  ;;  %v193_v37 = vpop.f32.mrb[1].mxu0  ;;  %v233_v38 = vpop.f32.mrb[1].mxu1 }
  0xe9   :  { %v272_v39 = vadd.f32 %v193_v37, %v38_v31  ;;  %v280_v40 = vadd.f32 %v233_v38, %v46_v32  ;;  %v348_v32 = vld [vmem:[%s786_s3 + $0x10] sm:$0xff] }
  0xea   :  { %289 = vst.msk [vmem:[#allocation2 + $0x8] sm:$0xff] %vm21_vm0, %v273_v35  ;;  %297 = vst.msk [vmem:[#allocation2 + $0x48] sm:$0xff] %vm21_vm0, %v281_v36 }
  0xeb   :  { %288 = vst.msk [vmem:[#allocation2] sm:$0xff] %vm21_vm0, %v272_v39  ;;  %296 = vst.msk [vmem:[#allocation2 + $0x40] sm:$0xff] %vm21_vm0, %v280_v40  ;;  %v460_v45 = vpop.f32.mrb[2].mxu0  ;;  %v472_v46 = vpop.f32.mrb[2].mxu1  ;;  %v356_v39 = vld [vmem:[%s786_s3 + $0x50] sm:$0xff] }
  0xec   :  { %v275_v47 = vadd.f32 %v460_v45, %v41_v41  ;;  %v283_v48 = vadd.f32 %v472_v46, %v49_v42  ;;  %v203_v49 = vpop.f32.mrb[3].mxu0  ;;  %v243_v50 = vpop.f32.mrb[3].mxu1  ;;  %v359_v45 = vld [vmem:[%s786_s3 + $0x68] sm:$0xff] }
  0xed   :  { %v274_v51 = vadd.f32 %v203_v49, %v40_v43  ;;  %v282_v52 = vadd.f32 %v243_v50, %v48_v44  ;;  %v351_v44 = vld [vmem:[%s786_s3 + $0x28] sm:$0xff]  ;;  %v350_v50 = vld [vmem:[%s786_s3 + $0x20] sm:$0xff] }
  0xee   :  { %291 = vst.msk [vmem:[#allocation2 + $0x18] sm:$0xff] %vm21_vm0, %v275_v47  ;;  %299 = vst.msk [vmem:[#allocation2 + $0x58] sm:$0xff] %vm21_vm0, %v283_v48 }
  0xef   :  { %290 = vst.msk [vmem:[#allocation2 + $0x10] sm:$0xff] %vm21_vm0, %v274_v51  ;;  %298 = vst.msk [vmem:[#allocation2 + $0x50] sm:$0xff] %vm21_vm0, %v282_v52  ;;  %v463_v60 = vpop.f32.mrb[4].mxu0  ;;  %v475_v61 = vpop.f32.mrb[4].mxu1 }
  0xf0   :  { %v277_v1 = vadd.f32 %v463_v60, %v43_v53  ;;  %v285_v2 = vadd.f32 %v475_v61, %v51_v54  ;;  %v213_v3 = vpop.f32.mrb[5].mxu0  ;;  %v253_v4 = vpop.f32.mrb[5].mxu1  ;;  %v353_v61 = vld [vmem:[%s786_s3 + $0x38] sm:$0xff] }
  0xf1   :  { %v308_v6 = vld [vmem:[#allocation2 + $0x8] sm:$0xff]  ;;  %v276_v8 = vadd.f32 %v213_v3, %v42_v56  ;;  %v284_v9 = vadd.f32 %v253_v4, %v50_v57  ;;  %v358_v56 = vld [vmem:[%s786_s3 + $0x60] sm:$0xff]  ;;  %v352_v3 = vld [vmem:[%s786_s3 + $0x30] sm:$0xff] }
  0xf2   :  { %v316_v7 = vld [vmem:[#allocation2 + $0x48] sm:$0xff]  ;;  %v331_v11 = vadd.f32 %v641_v55, %v308_v6  ;;  %v307_v13 = vld [vmem:[#allocation2] sm:$0xff]  ;;  %293 = vst.msk [vmem:[#allocation2 + $0x28] sm:$0xff] %vm21_vm0, %v277_v1  ;;  %301 = vst.msk [vmem:[#allocation2 + $0x68] sm:$0xff] %vm21_vm0, %v285_v2 }
  0xf3   :  { %v339_v12 = vadd.f32 %v641_v55, %v316_v7  ;;  %v315_v14 = vld [vmem:[#allocation2 + $0x40] sm:$0xff]  ;;  %v330_v16 = vadd.f32 %v641_v55, %v307_v13  ;;  %292 = vst.msk [vmem:[#allocation2 + $0x20] sm:$0xff] %vm21_vm0, %v276_v8  ;;  %300 = vst.msk [vmem:[#allocation2 + $0x60] sm:$0xff] %vm21_vm0, %v284_v9  ;;  %v466_v18 = vpop.f32.mrb[6].mxu0  ;;  %v478_v19 = vpop.f32.mrb[6].mxu1  ;;  %v360_v8 = vld [vmem:[%s786_s3 + $0x70] sm:$0xff] }
  0xf4   :  { %v338_v17 = vadd.f32 %v641_v55, %v315_v14  ;;  %v363_v20 = vadd.f32 %v347_v58, %v331_v11  ;;  %v279_v24 = vadd.f32 %v466_v18, %v45_v62  ;;  %v287_v25 = vadd.f32 %v478_v19, %v53_v5  ;;  %v223_v26 = vpop.f32.mrb[7].mxu0  ;;  %v263_v27 = vpop.f32.mrb[7].mxu1  ;;  %v361_v62 = vld [vmem:[%s786_s3 + $0x78] sm:$0xff] }
  0xf5   :  { %v371_v21 = vadd.f32 %v355_v59, %v339_v12  ;;  %v362_v28 = vadd.f32 %v346_v63, %v330_v16  ;;  %v310_v30 = vld [vmem:[#allocation2 + $0x18] sm:$0xff]  ;;  %v278_v33 = vadd.f32 %v223_v26, %v44_v10  ;;  %v286_v34 = vadd.f32 %v263_v27, %v52_v15 }
  0xf6   :  { %v370_v29 = vadd.f32 %v354_v0, %v338_v17  ;;  %v318_v31 = vld [vmem:[#allocation2 + $0x58] sm:$0xff]  ;;  %379 = vst.msk [vmem:[%s787_s4 + $0x8] sm:$0xff] %vm21_vm0, %v363_v20  ;;  %v333_v35 = vadd.f32 %v641_v55, %v310_v30  ;;  %v309_v37 = vld [vmem:[#allocation2 + $0x10] sm:$0xff]  ;;  %295 = vst.msk [vmem:[#allocation2 + $0x38] sm:$0xff] %vm21_vm0, %v279_v24 }
  0xf7   :  { %387 = vst.msk [vmem:[%s787_s4 + $0x48] sm:$0xff] %vm21_vm0, %v371_v21  ;;  %v341_v36 = vadd.f32 %v641_v55, %v318_v31  ;;  %v317_v38 = vld [vmem:[#allocation2 + $0x50] sm:$0xff]  ;;  %303 = vst.msk [vmem:[#allocation2 + $0x78] sm:$0xff] %vm21_vm0, %v287_v25  ;;  %v332_v40 = vadd.f32 %v641_v55, %v309_v37 }
  0xf8   :  { %378 = vst.msk [vmem:[%s787_s4] sm:$0xff] %vm21_vm0, %v362_v28  ;;  %386 = vst.msk [vmem:[%s787_s4 + $0x40] sm:$0xff] %vm21_vm0, %v370_v29  ;;  %v340_v41 = vadd.f32 %v641_v55, %v317_v38  ;;  %v365_v42 = vadd.f32 %v349_v22, %v333_v35 }
  0xf9   :  { %294 = vst.msk [vmem:[#allocation2 + $0x30] sm:$0xff] %vm21_vm0, %v278_v33  ;;  %302 = vst.msk [vmem:[#allocation2 + $0x70] sm:$0xff] %vm21_vm0, %v286_v34  ;;  %v373_v43 = vadd.f32 %v357_v23, %v341_v36  ;;  %v364_v46 = vadd.f32 %v348_v32, %v332_v40  ;;  %v312_v48 = vld [vmem:[#allocation2 + $0x28] sm:$0xff] }
  0xfa   :  { %v372_v47 = vadd.f32 %v356_v39, %v340_v41  ;;  %v320_v49 = vld [vmem:[#allocation2 + $0x68] sm:$0xff]  ;;  %381 = vst.msk [vmem:[%s787_s4 + $0x18] sm:$0xff] %vm21_vm0, %v365_v42  ;;  %v335_v51 = vadd.f32 %v641_v55, %v312_v48  ;;  %v311_v53 = vld [vmem:[#allocation2 + $0x20] sm:$0xff] }
  0xfb   :  { %389 = vst.msk [vmem:[%s787_s4 + $0x58] sm:$0xff] %vm21_vm0, %v373_v43  ;;  %v343_v52 = vadd.f32 %v641_v55, %v320_v49  ;;  %v319_v54 = vld [vmem:[#allocation2 + $0x60] sm:$0xff]  ;;  %380 = vst.msk [vmem:[%s787_s4 + $0x10] sm:$0xff] %vm21_vm0, %v364_v46  ;;  %v334_v57 = vadd.f32 %v641_v55, %v311_v53 }
  0xfc   :  { %388 = vst.msk [vmem:[%s787_s4 + $0x50] sm:$0xff] %vm21_vm0, %v372_v47  ;;  %v342_v58 = vadd.f32 %v641_v55, %v319_v54  ;;  %v367_v59 = vadd.f32 %v351_v44, %v335_v51 }
  0xfd   :  { %v375_v60 = vadd.f32 %v359_v45, %v343_v52  ;;  %v366_v63 = vadd.f32 %v350_v50, %v334_v57  ;;  %v314_v1 = vld [vmem:[#allocation2 + $0x38] sm:$0xff] }
  0xfe   :  { %v374_v0 = vadd.f32 %v358_v56, %v342_v58  ;;  %v322_v2 = vld [vmem:[#allocation2 + $0x78] sm:$0xff]  ;;  %383 = vst.msk [vmem:[%s787_s4 + $0x28] sm:$0xff] %vm21_vm0, %v367_v59  ;;  %v337_v4 = vadd.f32 %v641_v55, %v314_v1 }
  0xff   :  { %391 = vst.msk [vmem:[%s787_s4 + $0x68] sm:$0xff] %vm21_vm0, %v375_v60  ;;  %v345_v5 = vadd.f32 %v641_v55, %v322_v2  ;;  %382 = vst.msk [vmem:[%s787_s4 + $0x20] sm:$0xff] %vm21_vm0, %v366_v63 }
 0x100   :  { %v313_v6 = vld [vmem:[#allocation2 + $0x30] sm:$0xff]  ;;  %390 = vst.msk [vmem:[%s787_s4 + $0x60] sm:$0xff] %vm21_vm0, %v374_v0  ;;  %v369_v11 = vadd.f32 %v353_v61, %v337_v4 }
 0x101   :  { %v321_v7 = vld [vmem:[#allocation2 + $0x70] sm:$0xff]  ;;  %v336_v9 = vadd.f32 %v641_v55, %v313_v6  ;;  %v377_v12 = vadd.f32 %v361_v62, %v345_v5 }
 0x102   :  { %v344_v10 = vadd.f32 %v641_v55, %v321_v7  ;;  %385 = vst.msk [vmem:[%s787_s4 + $0x38] sm:$0xff] %vm21_vm0, %v369_v11 }
 0x103   :  { %v368_v13 = vadd.f32 %v352_v3, %v336_v9  ;;  %393 = vst.msk [vmem:[%s787_s4 + $0x78] sm:$0xff] %vm21_vm0, %v377_v12 }
 0x104   :  { %v376_v14 = vadd.f32 %v360_v8, %v344_v10 }
 0x105   :  { %384 = vst.msk [vmem:[%s787_s4 + $0x30] sm:$0xff] %vm21_vm0, %v368_v13 }
 0x106   :  { %392 = vst.msk [vmem:[%s787_s4 + $0x70] sm:$0xff] %vm21_vm0, %v376_v14 }

// kernel: block_forward.9
= control target key start
LH: loop header
LB: loop body
LE: loop exit
PB: predicated region body
PF: predicated region fallthrough
CT: control target
= control target key end

     0   :  { %vm40_vm0 = vcmask 523264   ;;  %s1181_s0 = inlined_call_operand.vmem [shape: f32[128,64], index: 0, kind: input, shape index: {}]   ;;  %s1182_s3 = inlined_call_operand.vmem [shape: f32[64,256], index: 3, kind: input, shape index: {}]   ;;  %s1183_s1 = inlined_call_operand.vmem [shape: f32[1,64], index: 1, kind: input, shape index: {}]   ;;  %s1184_s2 = inlined_call_operand.vmem [shape: f32[1,64], index: 2, kind: input, shape index: {}]   ;;  %s1185_s4 = inlined_call_operand.vmem [shape: f32[1,256], index: 4, kind: input, shape index: {}]   ;;  %s1186_s5 = inlined_call_operand.vmem [shape: f32[128,256], index: 5, kind: output, shape index: {}]  }
   0x1   :  { %v24_v0 = vld [vmem:[%s1181_s0] sm:$0xff]  ;;  %v25_v1 = vld [vmem:[%s1181_s0 + $0x8] sm:$0xff]  ;;  %v26_v8 = vld [vmem:[%s1181_s0 + $0x10] sm:$0xff] }
   0x2   :  { %v32_v2 = vld [vmem:[%s1181_s0 + $0x40] sm:$0xff]  ;;  %v41_v3 = vsel %vm40_vm0, %v24_v0, 0.0  ;;  %v44_v4 = vsel %vm40_vm0, %v25_v1, 0.0  ;;  %v33_v5 = vld [vmem:[%s1181_s0 + $0x48] sm:$0xff]  ;;  %v34_v9 = vld [vmem:[%s1181_s0 + $0x50] sm:$0xff]  ;;  %v47_v10 = vsel %vm40_vm0, %v26_v8, 0.0 }
   0x3   :  { %42 = vadd.xlane.f32.xlu0 %v41_v3  ;;  %45 = vadd.xlane.f32.xlu1 %v44_v4  ;;  %v65_v6 = vsel %vm40_vm0, %v32_v2, 0.0  ;;  %v68_v7 = vsel %vm40_vm0, %v33_v5, 0.0  ;;  %v71_v11 = vsel %vm40_vm0, %v34_v9, 0.0  ;;  %v735_v12 = vld [vmem:[%s1181_s0 + $0x18] sm:$0xff]  ;;  %v749_v16 = vld [vmem:[%s1181_s0 + $0x20] sm:$0xff]  ;;  %v763_v20 = vld [vmem:[%s1181_s0 + $0x28] sm:$0xff] }
   0x4   :  { %v740_v13 = vld [vmem:[%s1181_s0 + $0x58] sm:$0xff]  ;;  %v50_v14 = vsel %vm40_vm0, %v735_v12, 0.0  ;;  %v754_v17 = vld [vmem:[%s1181_s0 + $0x60] sm:$0xff]  ;;  %v53_v18 = vsel %vm40_vm0, %v749_v16, 0.0  ;;  %v768_v21 = vld [vmem:[%s1181_s0 + $0x68] sm:$0xff]  ;;  %v56_v22 = vsel %vm40_vm0, %v763_v20, 0.0 }
   0x5   :  { %v74_v15 = vsel %vm40_vm0, %v740_v13, 0.0  ;;  %v77_v19 = vsel %vm40_vm0, %v754_v17, 0.0  ;;  %v80_v23 = vsel %vm40_vm0, %v768_v21, 0.0  ;;  %v777_v24 = vld [vmem:[%s1181_s0 + $0x30] sm:$0xff]  ;;  %v791_v28 = vld [vmem:[%s1181_s0 + $0x38] sm:$0xff] }
   0x6   :  { %v782_v25 = vld [vmem:[%s1181_s0 + $0x70] sm:$0xff]  ;;  %v59_v26 = vsel %vm40_vm0, %v777_v24, 0.0  ;;  %v796_v29 = vld [vmem:[%s1181_s0 + $0x78] sm:$0xff]  ;;  %v62_v30 = vsel %vm40_vm0, %v791_v28, 0.0 }
   0x7   :  { %66 = vadd.xlane.f32.xlu0 %v65_v6  ;;  %69 = vadd.xlane.f32.xlu1 %v68_v7  ;;  %v83_v27 = vsel %vm40_vm0, %v782_v25, 0.0  ;;  %v86_v31 = vsel %vm40_vm0, %v796_v29, 0.0 }
   0xb   :  { %48 = vadd.xlane.f32.xlu0 %v47_v10  ;;  %72 = vadd.xlane.f32.xlu1 %v71_v11 }
   0xf   :  { %51 = vadd.xlane.f32.xlu0 %v50_v14  ;;  %75 = vadd.xlane.f32.xlu1 %v74_v15 }
  0x13   :  { %54 = vadd.xlane.f32.xlu0 %v53_v18  ;;  %78 = vadd.xlane.f32.xlu1 %v77_v19 }
  0x17   :  { %57 = vadd.xlane.f32.xlu0 %v56_v22  ;;  %81 = vadd.xlane.f32.xlu1 %v80_v23 }
  0x1b   :  { %60 = vadd.xlane.f32.xlu0 %v59_v26  ;;  %84 = vadd.xlane.f32.xlu1 %v83_v27 }
  0x1f   :  { %63 = vadd.xlane.f32.xlu0 %v62_v30  ;;  %87 = vadd.xlane.f32.xlu1 %v86_v31 }
  0x90   :  { %v43_v32 = vpop.xlane.xlu0 %42  ;;  %v46_v33 = vpop.xlane.xlu1 %45 }
  0x91   :  { %v90_v34 = vmul.f32 0.015625, %v43_v32  ;;  %v91_v35 = vmul.f32 0.015625, %v46_v33 }
  0x93   :  { %v802_v36 = vsub.f32 %v24_v0, %v90_v34  ;;  %v804_v37 = vsub.f32 %v25_v1, %v91_v35 }
  0x94   :  { %v67_v38 = vpop.xlane.xlu0 %66  ;;  %v70_v39 = vpop.xlane.xlu1 %69 }
  0x95   :  { %v98_v40 = vmul.f32 0.015625, %v67_v38  ;;  %v99_v41 = vmul.f32 0.015625, %v70_v39  ;;  %v122_v42 = vmul.f32 %v802_v36, %v802_v36  ;;  %v123_v43 = vmul.f32 %v804_v37, %v804_v37 }
  0x97   :  { %v810_v44 = vsub.f32 %v32_v2, %v98_v40  ;;  %v812_v45 = vsub.f32 %v33_v5, %v99_v41  ;;  %v138_v46 = vsel %vm40_vm0, %v122_v42, 0.0  ;;  %v141_v49 = vsel %vm40_vm0, %v123_v43, 0.0 }
  0x98   :  { %139 = vadd.xlane.f32.xlu0 %v138_v46  ;;  %v49_v47 = vpop.xlane.xlu0 %48  ;;  %v73_v48 = vpop.xlane.xlu1 %72 }
  0x99   :  { %v92_v50 = vmul.f32 0.015625, %v49_v47  ;;  %v100_v51 = vmul.f32 0.015625, %v73_v48  ;;  %v130_v52 = vmul.f32 %v810_v44, %v810_v44  ;;  %v131_v53 = vmul.f32 %v812_v45, %v812_v45 }
  0x9b   :  { %v820_v54 = vsub.f32 %v26_v8, %v92_v50  ;;  %v822_v55 = vsub.f32 %v34_v9, %v100_v51  ;;  %v162_v56 = vsel %vm40_vm0, %v130_v52, 0.0  ;;  %v165_v59 = vsel %vm40_vm0, %v131_v53, 0.0  ;;  %v328_v53 = vld [vmem:[%s1182_s3] sm:$0xff] }
  0x9c   :  { %142 = vadd.xlane.f32.xlu0 %v141_v49  ;;  %163 = vadd.xlane.f32.xlu1 %v162_v56  ;;  %v52_v57 = vpop.xlane.xlu0 %51  ;;  %v76_v58 = vpop.xlane.xlu1 %75  ;;  %v330_v56 = vld [vmem:[%s1182_s3 + $0x10] sm:$0xff] }
  0x9d   :  { %v93_v60 = vmul.f32 0.015625, %v52_v57  ;;  %v101_v61 = vmul.f32 0.015625, %v76_v58  ;;  %v124_v62 = vmul.f32 %v820_v54, %v820_v54  ;;  %v132_v63 = vmul.f32 %v822_v55, %v822_v55 }
  0x9e   :  { %v622_v58 = vpack.c.bf16 %v330_v56, %v328_v53 }
  0x9f   :  { %v831_v0 = vsub.f32 %v735_v12, %v93_v60  ;;  %v834_v1 = vsub.f32 %v740_v13, %v101_v61  ;;  %v144_v2 = vsel %vm40_vm0, %v124_v62, 0.0  ;;  %v168_v5 = vsel %vm40_vm0, %v132_v63, 0.0  ;;  %v333_v60 = vld [vmem:[%s1182_s3 + $0x28] sm:$0xff]  ;;  %v335_v61 = vld [vmem:[%s1182_s3 + $0x38] sm:$0xff]  ;;  %v332_v63 = vld [vmem:[%s1182_s3 + $0x20] sm:$0xff] }
  0xa0   :  { %166 = vadd.xlane.f32.xlu1 %v165_v59  ;;  %145 = vadd.xlane.f32.xlu0 %v144_v2  ;;  %v55_v3 = vpop.xlane.xlu0 %54  ;;  %v79_v4 = vpop.xlane.xlu1 %78  ;;  %v624_v62 = vpack.c.bf16 %v335_v61, %v333_v60  ;;  %v334_v2 = vld [vmem:[%s1182_s3 + $0x30] sm:$0xff] }
  0xa1   :  { %v94_v6 = vmul.f32 0.015625, %v55_v3  ;;  %v102_v7 = vmul.f32 0.015625, %v79_v4  ;;  %v125_v8 = vmul.f32 %v831_v0, %v831_v0  ;;  %v133_v9 = vmul.f32 %v834_v1, %v834_v1  ;;  %v337_v4 = vld [vmem:[%s1182_s3 + $0x48] sm:$0xff] }
  0xa2   :  { %v626_v3 = vpack.c.bf16 %v334_v2, %v332_v63 }
  0xa3   :  { %v843_v10 = vsub.f32 %v749_v16, %v94_v6  ;;  %v846_v11 = vsub.f32 %v754_v17, %v102_v7  ;;  %v147_v12 = vsel %vm40_vm0, %v125_v8, 0.0  ;;  %v171_v15 = vsel %vm40_vm0, %v133_v9, 0.0  ;;  %v336_v7 = vld [vmem:[%s1182_s3 + $0x40] sm:$0xff]  ;;  %v338_v8 = vld [vmem:[%s1182_s3 + $0x50] sm:$0xff] }
  0xa4   :  { %169 = vadd.xlane.f32.xlu1 %v168_v5  ;;  %148 = vadd.xlane.f32.xlu0 %v147_v12  ;;  %v58_v13 = vpop.xlane.xlu0 %57  ;;  %v82_v14 = vpop.xlane.xlu1 %81  ;;  %v339_v5 = vld [vmem:[%s1182_s3 + $0x58] sm:$0xff]  ;;  %v630_v9 = vpack.c.bf16 %v338_v8, %v336_v7  ;;  %v341_v12 = vld [vmem:[%s1182_s3 + $0x68] sm:$0xff] }
  0xa5   :  { %v95_v18 = vmul.f32 0.015625, %v58_v13  ;;  %v103_v19 = vmul.f32 0.015625, %v82_v14  ;;  %v126_v22 = vmul.f32 %v843_v10, %v843_v10  ;;  %v134_v16 = vmul.f32 %v846_v11, %v846_v11  ;;  %v343_v13 = vld [vmem:[%s1182_s3 + $0x78] sm:$0xff] }
  0xa6   :  { %v628_v6 = vpack.c.bf16 %v339_v5, %v337_v4  ;;  %v632_v14 = vpack.c.bf16 %v343_v13, %v341_v12 }
  0xa7   :  { %v855_v23 = vsub.f32 %v763_v20, %v95_v18  ;;  %v858_v17 = vsub.f32 %v768_v21, %v103_v19  ;;  %v150_v26 = vsel %vm40_vm0, %v126_v22, 0.0  ;;  %v174_v31 = vsel %vm40_vm0, %v134_v16, 0.0  ;;  %v342_v18 = vld [vmem:[%s1182_s3 + $0x70] sm:$0xff] }
  0xa8   :  { %172 = vadd.xlane.f32.xlu1 %v171_v15  ;;  %151 = vadd.xlane.f32.xlu0 %v150_v26  ;;  %v61_v27 = vpop.xlane.xlu0 %60  ;;  %v85_v30 = vpop.xlane.xlu1 %84  ;;  %v340_v15 = vld [vmem:[%s1182_s3 + $0x60] sm:$0xff]  ;;  %v677_v22 = vmov 0.0  }
  0xa9   :  { %v96_v32 = vmul.f32 0.015625, %v61_v27  ;;  %v104_v33 = vmul.f32 0.015625, %v85_v30  ;;  %v127_v34 = vmul.f32 %v855_v23, %v855_v23  ;;  %v135_v20 = vmul.f32 %v858_v17, %v858_v17  ;;  %469 = vmatprep.mubr.f32.mxu0 %v677_v22  ;;  %517 = vmatprep.mubr.f32.mxu1 %v677_v22 }
  0xaa   :  { %v634_v19 = vpack.c.bf16 %v342_v18, %v340_v15 }
  0xab   :  { %v867_v35 = vsub.f32 %v777_v24, %v96_v32  ;;  %v870_v21 = vsub.f32 %v782_v25, %v104_v33  ;;  %v153_v38 = vsel %vm40_vm0, %v127_v34, 0.0  ;;  %v177_v41 = vsel %vm40_vm0, %v135_v20, 0.0 }
  0xac   :  { %175 = vadd.xlane.f32.xlu1 %v174_v31  ;;  %154 = vadd.xlane.f32.xlu0 %v153_v38  ;;  %v64_v39 = vpop.xlane.xlu0 %63  ;;  %v88_v40 = vpop.xlane.xlu1 %87 }
  0xad   :  { %v97_v42 = vmul.f32 0.015625, %v64_v39  ;;  %v105_v43 = vmul.f32 0.015625, %v88_v40  ;;  %v128_v46 = vmul.f32 %v867_v35, %v867_v35  ;;  %v136_v24 = vmul.f32 %v870_v21, %v870_v21 }
  0xaf   :  { %v879_v47 = vsub.f32 %v791_v28, %v97_v42  ;;  %v882_v25 = vsub.f32 %v796_v29, %v105_v43  ;;  %v156_v48 = vsel %vm40_vm0, %v128_v46, 0.0  ;;  %v180_v49 = vsel %vm40_vm0, %v136_v24, 0.0  ;;  %v329_v28 = vld [vmem:[%s1182_s3 + $0x8] sm:$0xff]  ;;  %v331_v29 = vld [vmem:[%s1182_s3 + $0x18] sm:$0xff] }
  0xb0   :  { %178 = vadd.xlane.f32.xlu1 %v177_v41  ;;  %157 = vadd.xlane.f32.xlu0 %v156_v48  ;;  %v620_v52 = vpack.c.bf16 %v331_v29, %v329_v28 }
  0xb1   :  { %v129_v50 = vmul.f32 %v879_v47, %v879_v47  ;;  %v137_v51 = vmul.f32 %v882_v25, %v882_v25 }
  0xb2   :  { %621 = vmatprep.subr.bf16.mxu0 %v620_v52  ;;  %636 = vmatprep.subr.bf16.mxu1 %v620_v52 }
  0xb3   :  { %v159_v57 = vsel %vm40_vm0, %v129_v50, 0.0  ;;  %v183_v59 = vsel %vm40_vm0, %v137_v51, 0.0  ;;  %623 = vmatpush1.bf16.msra.mxu0 %v622_v58  ;;  %640 = vmatpush1.bf16.msra.mxu1 %v622_v58  ;;  %v945_v51 = vld [vmem:[%s1183_s1] ss:$0 sm:$0xff] }
  0xb4   :  { %181 = vadd.xlane.f32.xlu1 %v180_v49  ;;  %160 = vadd.xlane.f32.xlu0 %v159_v57  ;;  %v951_v57 = vld [vmem:[%s1184_s2] ss:$0 sm:$0xff] }
  0xb5   :  { %625 = vmatprep.subr.bf16.mxu0 %v624_v62  ;;  %637 = vmatprep.subr.bf16.mxu1 %v624_v62 }
  0xb7   :  { %627 = vmatpush1.bf16.msra.mxu0 %v626_v3  ;;  %641 = vmatpush1.bf16.msra.mxu1 %v626_v3 }
  0xb8   :  { %184 = vadd.xlane.f32.xlu1 %v183_v59  ;;  %629 = vmatprep.subr.bf16.mxu0 %v628_v6 }
  0xb9   :  { %638 = vmatprep.subr.bf16.mxu1 %v628_v6 }
  0xbb   :  { %631 = vmatpush1.bf16.msra.mxu0 %v630_v9  ;;  %642 = vmatpush1.bf16.msra.mxu1 %v630_v9 }
  0xbc   :  { %633 = vmatprep.subr.bf16.mxu0 %v632_v14  ;;  %639 = vmatprep.subr.bf16.mxu1 %v632_v14 }
  0xbf   :  { %635 = vmatpush1.bf16.msra.mxu0 %v634_v19  ;;  %643 = vmatpush1.bf16.msra.mxu1 %v634_v19 }
 0x125   :  { %v140_v16 = vpop.xlane.xlu0 %139 }
 0x126   :  { %v186_v26 = vmul.f32 0.015625, %v140_v16 }
 0x128   :  { %v202_v27 = vadd.f32 1e-05, %v186_v26 }
 0x129   :  { %v164_v30 = vpop.xlane.xlu1 %163  ;;  %v143_v31 = vpop.xlane.xlu0 %142 }
 0x12a   :  { %645 = vrsqrt.f32 %v202_v27  ;;  %v194_v32 = vmul.f32 0.015625, %v164_v30  ;;  %v187_v33 = vmul.f32 0.015625, %v143_v31 }
 0x12c   :  { %v210_v34 = vadd.f32 1e-05, %v194_v32  ;;  %v203_v20 = vadd.f32 1e-05, %v187_v33 }
 0x12d   :  { %v167_v38 = vpop.xlane.xlu1 %166  ;;  %v146_v39 = vpop.xlane.xlu0 %145 }
 0x12e   :  { %647 = vrsqrt.f32 %v210_v34  ;;  %v195_v40 = vmul.f32 0.015625, %v167_v38  ;;  %v188_v41 = vmul.f32 0.015625, %v146_v39 }
 0x12f   :  { %649 = vrsqrt.f32 %v203_v20 }
 0x130   :  { %v211_v42 = vadd.f32 1e-05, %v195_v40  ;;  %v204_v43 = vadd.f32 1e-05, %v188_v41 }
 0x131   :  { %v170_v46 = vpop.xlane.xlu1 %169  ;;  %v149_v24 = vpop.xlane.xlu0 %148 }
 0x132   :  { %651 = vrsqrt.f32 %v211_v42  ;;  %v196_v48 = vmul.f32 0.015625, %v170_v46  ;;  %v189_v49 = vmul.f32 0.015625, %v149_v24 }
 0x133   :  { %653 = vrsqrt.f32 %v204_v43 }
 0x134   :  { %v646_v50 = vpop.eup %645  ;;  %v212_v28 = vadd.f32 1e-05, %v196_v48  ;;  %v205_v29 = vadd.f32 1e-05, %v189_v49 }
 0x135   :  { %v234_v52 = vmul.f32 %v646_v50, %v802_v36  ;;  %v173_v53 = vpop.xlane.xlu1 %172  ;;  %v152_v56 = vpop.xlane.xlu0 %151 }
 0x136   :  { %655 = vrsqrt.f32 %v212_v28  ;;  %v197_v58 = vmul.f32 0.015625, %v173_v53  ;;  %v190_v59 = vmul.f32 0.015625, %v152_v56 }
 0x137   :  { %v257_v60 = vmul.f32 %v945_v51, %v234_v52  ;;  %657 = vrsqrt.f32 %v205_v29 }
 0x138   :  { %v648_v61 = vpop.eup %647  ;;  %v213_v62 = vadd.f32 1e-05, %v197_v58  ;;  %v206_v63 = vadd.f32 1e-05, %v190_v59 }
 0x139   :  { %v650_v2 = vpop.eup %649  ;;  %v280_v3 = vadd.f32 %v951_v57, %v257_v60  ;;  %v242_v36 = vmul.f32 %v648_v61, %v810_v44  ;;  %v176_v4 = vpop.xlane.xlu1 %175 }
 0x13a   :  { %v155_v5 = vpop.xlane.xlu0 %154  ;;  %v235_v6 = vmul.f32 %v650_v2, %v804_v37  ;;  %659 = vrsqrt.f32 %v213_v62  ;;  %v198_v7 = vmul.f32 0.015625, %v176_v4 }
 0x13b   :  { %v191_v8 = vmul.f32 0.015625, %v155_v5  ;;  %296 = vst.msk [vmem:[#allocation2] sm:$0xff] %vm40_vm0, %v280_v3  ;;  %v265_v9 = vmul.f32 %v945_v51, %v242_v36  ;;  %661 = vrsqrt.f32 %v206_v63 }
 0x13c   :  { %v652_v12 = vpop.eup %651  ;;  %v258_v13 = vmul.f32 %v945_v51, %v235_v6  ;;  %v214_v14 = vadd.f32 1e-05, %v198_v7 }
 0x13d   :  { %v207_v15 = vadd.f32 1e-05, %v191_v8  ;;  %v654_v18 = vpop.eup %653  ;;  %v288_v44 = vadd.f32 %v951_v57, %v265_v9  ;;  %v243_v19 = vmul.f32 %v652_v12, %v812_v45  ;;  %v179_v16 = vpop.xlane.xlu1 %178 }
 0x13e   :  { %v158_v37 = vpop.xlane.xlu0 %157  ;;  %v281_v26 = vadd.f32 %v951_v57, %v258_v13  ;;  %v236_v27 = vmul.f32 %v654_v18, %v820_v54  ;;  %663 = vrsqrt.f32 %v214_v14  ;;  %v199_v30 = vmul.f32 0.015625, %v179_v16 }
 0x13f   :  { %304 = vst.msk [vmem:[#allocation2 + $0x40] sm:$0xff] %vm40_vm0, %v288_v44  ;;  %v266_v31 = vmul.f32 %v945_v51, %v243_v19  ;;  %665 = vrsqrt.f32 %v207_v15  ;;  %v192_v32 = vmul.f32 0.015625, %v158_v37 }
 0x140   :  { %v656_v33 = vpop.eup %655  ;;  %297 = vst.msk [vmem:[#allocation2 + $0x8] sm:$0xff] %vm40_vm0, %v281_v26  ;;  %v259_v34 = vmul.f32 %v945_v51, %v236_v27  ;;  %v215_v45 = vadd.f32 1e-05, %v199_v30 }
 0x141   :  { %v658_v20 = vpop.eup %657  ;;  %v289_v38 = vadd.f32 %v951_v57, %v266_v31  ;;  %v244_v39 = vmul.f32 %v656_v33, %v822_v55  ;;  %v208_v54 = vadd.f32 1e-05, %v192_v32  ;;  %v182_v40 = vpop.xlane.xlu1 %181 }
 0x142   :  { %v161_v41 = vpop.xlane.xlu0 %160  ;;  %v282_v42 = vadd.f32 %v951_v57, %v259_v34  ;;  %v237_v43 = vmul.f32 %v658_v20, %v831_v0  ;;  %667 = vrsqrt.f32 %v215_v45  ;;  %v200_v46 = vmul.f32 0.015625, %v182_v40  ;;  %v312_v24 = vld [vmem:[#allocation2] sm:$0xff] }
 0x143   :  { %305 = vst.msk [vmem:[#allocation2 + $0x48] sm:$0xff] %vm40_vm0, %v289_v38  ;;  %v267_v48 = vmul.f32 %v945_v51, %v244_v39  ;;  %669 = vrsqrt.f32 %v208_v54  ;;  %v193_v49 = vmul.f32 0.015625, %v161_v41  ;;  %604 = vmatmul.mubr.msk.f32.vlgmr.msra.gmra.mrb[0].mxu0 %vm40_vm0, %v312_v24 }
 0x144   :  { %v660_v50 = vpop.eup %659  ;;  %298 = vst.msk [vmem:[#allocation2 + $0x10] sm:$0xff] %vm40_vm0, %v282_v42  ;;  %v260_v55 = vmul.f32 %v945_v51, %v237_v43  ;;  %v216_v28 = vadd.f32 1e-05, %v200_v46  ;;  %475 = vmatprep.mubr.f32.mxu0 %v677_v22  ;;  %v346_v46 = vlaneseq }
 0x145   :  { %v662_v0 = vpop.eup %661  ;;  %v290_v29 = vadd.f32 %v951_v57, %v267_v48  ;;  %v245_v52 = vmul.f32 %v660_v50, %v834_v1  ;;  %v209_v53 = vadd.f32 1e-05, %v193_v49  ;;  %v185_v56 = vpop.xlane.xlu1 %184  ;;  %v344_v49 = vld [vmem:[%s1185_s4] sm:$0x3] }
 0x146   :  { %v283_v58 = vadd.f32 %v951_v57, %v260_v55  ;;  %v238_v59 = vmul.f32 %v662_v0, %v843_v10  ;;  %671 = vrsqrt.f32 %v216_v28  ;;  %v201_v60 = vmul.f32 0.015625, %v185_v56  ;;  %v320_v61 = vld [vmem:[#allocation2 + $0x40] sm:$0xff] }
 0x147   :  { %306 = vst.msk [vmem:[#allocation2 + $0x50] sm:$0xff] %vm40_vm0, %v290_v29  ;;  %v268_v62 = vmul.f32 %v945_v51, %v245_v52  ;;  %673 = vrsqrt.f32 %v209_v53  ;;  %v313_v63 = vld [vmem:[#allocation2 + $0x8] sm:$0xff]  ;;  %612 = vmatmul.mubr.msk.f32.vlgmr.msra.gmra.mrb[0].mxu1 %vm40_vm0, %v320_v61  ;;  %v347_v24 = vshrl.u32 %v346_v46, 7 }
 0x148   :  { %v664_v2 = vpop.eup %663  ;;  %299 = vst.msk [vmem:[#allocation2 + $0x18] sm:$0xff] %vm40_vm0, %v283_v58  ;;  %v261_v1 = vmul.f32 %v945_v51, %v238_v59  ;;  %v217_v3 = vadd.f32 1e-05, %v201_v60  ;;  %605 = vmatmul.mubr.msk.f32.gmra.mrb[2].mxu0 %vm40_vm0, %v313_v63  ;;  %523 = vmatprep.mubr.f32.mxu1 %v677_v22 }
 0x149   :  { %v666_v10 = vpop.eup %665  ;;  %v291_v36 = vadd.f32 %v951_v57, %v268_v62  ;;  %v246_v4 = vmul.f32 %v664_v2, %v846_v11  ;;  %481 = vmatprep.mubr.f32.mxu0 %v677_v22  ;;  %v348_v48 = vsub.s32 0, %v347_v24  ;;  %v352_v50 = vsub.s32 1, %v347_v24 }
 0x14a   :  { %v284_v5 = vadd.f32 %v951_v57, %v261_v1  ;;  %v239_v6 = vmul.f32 %v666_v10, %v855_v23  ;;  %675 = vrsqrt.f32 %v217_v3  ;;  %v321_v7 = vld [vmem:[#allocation2 + $0x48] sm:$0xff] }
 0x14b   :  { %307 = vst.msk [vmem:[#allocation2 + $0x58] sm:$0xff] %vm40_vm0, %v291_v36  ;;  %v269_v8 = vmul.f32 %v945_v51, %v246_v4  ;;  %v314_v9 = vld [vmem:[#allocation2 + $0x10] sm:$0xff]  ;;  %613 = vmatmul.mubr.msk.f32.gmra.mrb[2].mxu1 %vm40_vm0, %v321_v7  ;;  %v1049_v55 = vrot.slane %v344_v49, %v348_v48  ;;  %v1051_v28 = vrot.slane %v344_v49, %v352_v50 }
 0x14c   :  { %v668_v12 = vpop.eup %667  ;;  %300 = vst.msk [vmem:[#allocation2 + $0x20] sm:$0xff] %vm40_vm0, %v284_v5  ;;  %v262_v11 = vmul.f32 %v945_v51, %v239_v6  ;;  %606 = vmatmul.mubr.msk.f32.gmra.mrb[4].mxu0 %vm40_vm0, %v314_v9  ;;  %529 = vmatprep.mubr.f32.mxu1 %v677_v22 }
 0x14d   :  { %v670_v13 = vpop.eup %669  ;;  %v292_v23 = vadd.f32 %v951_v57, %v269_v8  ;;  %v247_v14 = vmul.f32 %v668_v12, %v858_v17  ;;  %487 = vmatprep.mubr.f32.mxu0 %v677_v22 }
 0x14e   :  { %v285_v15 = vadd.f32 %v951_v57, %v262_v11  ;;  %v240_v18 = vmul.f32 %v670_v13, %v867_v35  ;;  %v322_v44 = vld [vmem:[#allocation2 + $0x50] sm:$0xff] }
 0x14f   :  { %308 = vst.msk [vmem:[#allocation2 + $0x60] sm:$0xff] %vm40_vm0, %v292_v23  ;;  %v270_v19 = vmul.f32 %v945_v51, %v247_v14  ;;  %v315_v16 = vld [vmem:[#allocation2 + $0x18] sm:$0xff]  ;;  %614 = vmatmul.mubr.msk.f32.gmra.mrb[4].mxu1 %vm40_vm0, %v322_v44 }
 0x150   :  { %v672_v37 = vpop.eup %671  ;;  %301 = vst.msk [vmem:[#allocation2 + $0x28] sm:$0xff] %vm40_vm0, %v285_v15  ;;  %v263_v26 = vmul.f32 %v945_v51, %v240_v18  ;;  %607 = vmatmul.mubr.msk.f32.gmra.mrb[6].mxu0 %vm40_vm0, %v315_v16  ;;  %535 = vmatprep.mubr.f32.mxu1 %v677_v22 }
 0x151   :  { %v674_v17 = vpop.eup %673  ;;  %v293_v35 = vadd.f32 %v951_v57, %v270_v19  ;;  %v248_v27 = vmul.f32 %v672_v37, %v870_v21  ;;  %493 = vmatprep.mubr.f32.mxu0 %v677_v22 }
 0x152   :  { %v286_v30 = vadd.f32 %v951_v57, %v263_v26  ;;  %v241_v31 = vmul.f32 %v674_v17, %v879_v47  ;;  %v323_v32 = vld [vmem:[#allocation2 + $0x58] sm:$0xff] }
 0x153   :  { %309 = vst.msk [vmem:[#allocation2 + $0x68] sm:$0xff] %vm40_vm0, %v293_v35  ;;  %v271_v33 = vmul.f32 %v945_v51, %v248_v27  ;;  %v316_v34 = vld [vmem:[#allocation2 + $0x20] sm:$0xff]  ;;  %615 = vmatmul.mubr.msk.f32.gmra.mrb[6].mxu1 %vm40_vm0, %v323_v32 }
 0x154   :  { %v676_v45 = vpop.eup %675  ;;  %302 = vst.msk [vmem:[#allocation2 + $0x30] sm:$0xff] %vm40_vm0, %v286_v30  ;;  %v264_v20 = vmul.f32 %v945_v51, %v241_v31  ;;  %608 = vmatmul.mubr.msk.f32.gmra.mrb[8].mxu0 %vm40_vm0, %v316_v34  ;;  %541 = vmatprep.mubr.f32.mxu1 %v677_v22 }
 0x155   :  { %v294_v21 = vadd.f32 %v951_v57, %v271_v33  ;;  %v249_v47 = vmul.f32 %v676_v45, %v882_v25  ;;  %499 = vmatprep.mubr.f32.mxu0 %v677_v22 }
 0x156   :  { %v287_v38 = vadd.f32 %v951_v57, %v264_v20  ;;  %v324_v39 = vld [vmem:[#allocation2 + $0x60] sm:$0xff] }
 0x157   :  { %310 = vst.msk [vmem:[#allocation2 + $0x70] sm:$0xff] %vm40_vm0, %v294_v21  ;;  %v272_v54 = vmul.f32 %v945_v51, %v249_v47  ;;  %v317_v40 = vld [vmem:[#allocation2 + $0x28] sm:$0xff]  ;;  %616 = vmatmul.mubr.msk.f32.gmra.mrb[8].mxu1 %vm40_vm0, %v324_v39 }
 0x158   :  { %303 = vst.msk [vmem:[#allocation2 + $0x38] sm:$0xff] %vm40_vm0, %v287_v38  ;;  %609 = vmatmul.mubr.msk.f32.gmra.mrb[10].mxu0 %vm40_vm0, %v317_v40  ;;  %547 = vmatprep.mubr.f32.mxu1 %v677_v22 }
 0x159   :  { %v295_v25 = vadd.f32 %v951_v57, %v272_v54  ;;  %505 = vmatprep.mubr.f32.mxu0 %v677_v22 }
 0x15a   :  { %v325_v41 = vld [vmem:[#allocation2 + $0x68] sm:$0xff] }
 0x15b   :  { %311 = vst.msk [vmem:[#allocation2 + $0x78] sm:$0xff] %vm40_vm0, %v295_v25  ;;  %v318_v42 = vld [vmem:[#allocation2 + $0x30] sm:$0xff]  ;;  %617 = vmatmul.mubr.msk.f32.gmra.mrb[10].mxu1 %vm40_vm0, %v325_v41 }
 0x15c   :  { %610 = vmatmul.mubr.msk.f32.gmra.mrb[12].mxu0 %vm40_vm0, %v318_v42  ;;  %553 = vmatprep.mubr.f32.mxu1 %v677_v22 }
 0x15d   :  { %511 = vmatprep.mubr.f32.mxu0 %v677_v22 }
 0x15e   :  { %v326_v51 = vld [vmem:[#allocation2 + $0x70] sm:$0xff] }
 0x15f   :  { %v319_v43 = vld [vmem:[#allocation2 + $0x38] sm:$0xff]  ;;  %618 = vmatmul.mubr.msk.f32.gmra.mrb[12].mxu1 %vm40_vm0, %v326_v51 }
 0x160   :  { %611 = vmatmul.mubr.msk.f32.gmra.mrb[14].mxu0 %vm40_vm0, %v319_v43  ;;  %559 = vmatprep.mubr.f32.mxu1 %v677_v22 }
 0x162   :  { %v327_v57 = vld [vmem:[#allocation2 + $0x78] sm:$0xff] }
 0x163   :  { %619 = vmatmul.mubr.msk.f32.gmra.mrb[14].mxu1 %vm40_vm0, %v327_v57 }
 0x216   :  { %v471_v0 = vpop.f32.mrb[0].mxu0 }
 0x217   :  { %v472_v29 = vadd.f32 %v471_v0, %v1049_v55  ;;  %v473_v52 = vpop.f32.mrb[1].mxu0 }
 0x218   :  { %v474_v22 = vadd.f32 %v473_v52, %v1051_v28 }
 0x219   :  { %566 = vst [vmem:[%s1186_s5] sm:$0xff] %v472_v29 }
 0x21a   :  { %567 = vst [vmem:[%s1186_s5 + $0x8] sm:$0xff] %v474_v22  ;;  %v519_v53 = vpop.f32.mrb[0].mxu1 }
 0x21b   :  { %v477_v56 = vpop.f32.mrb[2].mxu0  ;;  %v520_v58 = vadd.f32 %v519_v53, %v1049_v55  ;;  %v521_v59 = vpop.f32.mrb[1].mxu1 }
 0x21c   :  { %v478_v60 = vadd.f32 %v477_v56, %v1049_v55  ;;  %v479_v61 = vpop.f32.mrb[3].mxu0  ;;  %v522_v62 = vadd.f32 %v521_v59, %v1051_v28 }
 0x21d   :  { %582 = vst [vmem:[%s1186_s5 + $0x80] sm:$0xff] %v520_v58  ;;  %v480_v63 = vadd.f32 %v479_v61, %v1051_v28 }
 0x21e   :  { %568 = vst [vmem:[%s1186_s5 + $0x10] sm:$0xff] %v478_v60  ;;  %583 = vst [vmem:[%s1186_s5 + $0x88] sm:$0xff] %v522_v62  ;;  %v525_v2 = vpop.f32.mrb[2].mxu1 }
 0x21f   :  { %569 = vst [vmem:[%s1186_s5 + $0x18] sm:$0xff] %v480_v63  ;;  %v483_v1 = vpop.f32.mrb[4].mxu0  ;;  %v526_v3 = vadd.f32 %v525_v2, %v1049_v55  ;;  %v527_v10 = vpop.f32.mrb[3].mxu1 }
 0x220   :  { %v484_v36 = vadd.f32 %v483_v1, %v1049_v55  ;;  %v485_v4 = vpop.f32.mrb[5].mxu0  ;;  %v528_v5 = vadd.f32 %v527_v10, %v1051_v28 }
 0x221   :  { %584 = vst [vmem:[%s1186_s5 + $0x90] sm:$0xff] %v526_v3  ;;  %v486_v6 = vadd.f32 %v485_v4, %v1051_v28 }
 0x222   :  { %570 = vst [vmem:[%s1186_s5 + $0x20] sm:$0xff] %v484_v36  ;;  %585 = vst [vmem:[%s1186_s5 + $0x98] sm:$0xff] %v528_v5  ;;  %v531_v7 = vpop.f32.mrb[4].mxu1 }
 0x223   :  { %571 = vst [vmem:[%s1186_s5 + $0x28] sm:$0xff] %v486_v6  ;;  %v489_v8 = vpop.f32.mrb[6].mxu0  ;;  %v532_v9 = vadd.f32 %v531_v7, %v1049_v55  ;;  %v533_v12 = vpop.f32.mrb[5].mxu1 }
 0x224   :  { %v490_v11 = vadd.f32 %v489_v8, %v1049_v55  ;;  %v491_v13 = vpop.f32.mrb[7].mxu0  ;;  %v534_v23 = vadd.f32 %v533_v12, %v1051_v28 }
 0x225   :  { %586 = vst [vmem:[%s1186_s5 + $0xa0] sm:$0xff] %v532_v9  ;;  %v492_v14 = vadd.f32 %v491_v13, %v1051_v28 }
 0x226   :  { %572 = vst [vmem:[%s1186_s5 + $0x30] sm:$0xff] %v490_v11  ;;  %587 = vst [vmem:[%s1186_s5 + $0xa8] sm:$0xff] %v534_v23  ;;  %v537_v15 = vpop.f32.mrb[6].mxu1 }
 0x227   :  { %573 = vst [vmem:[%s1186_s5 + $0x38] sm:$0xff] %v492_v14  ;;  %v495_v18 = vpop.f32.mrb[8].mxu0  ;;  %v538_v44 = vadd.f32 %v537_v15, %v1049_v55  ;;  %v539_v19 = vpop.f32.mrb[7].mxu1 }
 0x228   :  { %v496_v16 = vadd.f32 %v495_v18, %v1049_v55  ;;  %v497_v37 = vpop.f32.mrb[9].mxu0  ;;  %v540_v26 = vadd.f32 %v539_v19, %v1051_v28 }
 0x229   :  { %588 = vst [vmem:[%s1186_s5 + $0xb0] sm:$0xff] %v538_v44  ;;  %v498_v17 = vadd.f32 %v497_v37, %v1051_v28 }
 0x22a   :  { %574 = vst [vmem:[%s1186_s5 + $0x40] sm:$0xff] %v496_v16  ;;  %589 = vst [vmem:[%s1186_s5 + $0xb8] sm:$0xff] %v540_v26  ;;  %v543_v35 = vpop.f32.mrb[8].mxu1 }
 0x22b   :  { %575 = vst [vmem:[%s1186_s5 + $0x48] sm:$0xff] %v498_v17  ;;  %v501_v27 = vpop.f32.mrb[10].mxu0  ;;  %v544_v30 = vadd.f32 %v543_v35, %v1049_v55  ;;  %v545_v31 = vpop.f32.mrb[9].mxu1 }
 0x22c   :  { %v502_v32 = vadd.f32 %v501_v27, %v1049_v55  ;;  %v503_v33 = vpop.f32.mrb[11].mxu0  ;;  %v546_v34 = vadd.f32 %v545_v31, %v1051_v28 }
 0x22d   :  { %590 = vst [vmem:[%s1186_s5 + $0xc0] sm:$0xff] %v544_v30  ;;  %v504_v45 = vadd.f32 %v503_v33, %v1051_v28 }
 0x22e   :  { %576 = vst [vmem:[%s1186_s5 + $0x50] sm:$0xff] %v502_v32  ;;  %591 = vst [vmem:[%s1186_s5 + $0xc8] sm:$0xff] %v546_v34  ;;  %v549_v20 = vpop.f32.mrb[10].mxu1 }
 0x22f   :  { %577 = vst [vmem:[%s1186_s5 + $0x58] sm:$0xff] %v504_v45  ;;  %v507_v21 = vpop.f32.mrb[12].mxu0  ;;  %v550_v47 = vadd.f32 %v549_v20, %v1049_v55  ;;  %v551_v38 = vpop.f32.mrb[11].mxu1 }
 0x230   :  { %v508_v39 = vadd.f32 %v507_v21, %v1049_v55  ;;  %v509_v54 = vpop.f32.mrb[13].mxu0  ;;  %v552_v40 = vadd.f32 %v551_v38, %v1051_v28 }
 0x231   :  { %592 = vst [vmem:[%s1186_s5 + $0xd0] sm:$0xff] %v550_v47  ;;  %v510_v25 = vadd.f32 %v509_v54, %v1051_v28 }
 0x232   :  { %578 = vst [vmem:[%s1186_s5 + $0x60] sm:$0xff] %v508_v39  ;;  %593 = vst [vmem:[%s1186_s5 + $0xd8] sm:$0xff] %v552_v40  ;;  %v555_v41 = vpop.f32.mrb[12].mxu1 }
 0x233   :  { %579 = vst [vmem:[%s1186_s5 + $0x68] sm:$0xff] %v510_v25  ;;  %v513_v42 = vpop.f32.mrb[14].mxu0  ;;  %v556_v51 = vadd.f32 %v555_v41, %v1049_v55  ;;  %v557_v43 = vpop.f32.mrb[13].mxu1 }
 0x234   :  { %v514_v57 = vadd.f32 %v513_v42, %v1049_v55  ;;  %v515_v46 = vpop.f32.mrb[15].mxu0  ;;  %v558_v24 = vadd.f32 %v557_v43, %v1051_v28 }
 0x235   :  { %594 = vst [vmem:[%s1186_s5 + $0xe0] sm:$0xff] %v556_v51  ;;  %v516_v48 = vadd.f32 %v515_v46, %v1051_v28 }
 0x236   :  { %580 = vst [vmem:[%s1186_s5 + $0x70] sm:$0xff] %v514_v57  ;;  %595 = vst [vmem:[%s1186_s5 + $0xe8] sm:$0xff] %v558_v24  ;;  %v561_v49 = vpop.f32.mrb[14].mxu1 }
 0x237   :  { %581 = vst [vmem:[%s1186_s5 + $0x78] sm:$0xff] %v516_v48  ;;  %v562_v50 = vadd.f32 %v561_v49, %v1049_v55  ;;  %v563_v0 = vpop.f32.mrb[15].mxu1 }
 0x238   :  { %v564_v29 = vadd.f32 %v563_v0, %v1051_v28 }
 0x239   :  { %596 = vst [vmem:[%s1186_s5 + $0xf0] sm:$0xff] %v562_v50 }
 0x23a   :  { %597 = vst [vmem:[%s1186_s5 + $0xf8] sm:$0xff] %v564_v29 }

// kernel: block_forward.10
= control target key start
LH: loop header
LB: loop body
LE: loop exit
PB: predicated region body
PF: predicated region fallthrough
CT: control target
= control target key end

     0   :  { %s1601_s12 = smov 0   ;;  %s1603_s13 = smov 0   ;;  %s2450_s0 = inlined_call_operand.vmem [shape: f32[2,10,10,256], index: 0, kind: input, shape index: {}]   ;;  %s2451_s1 = inlined_call_operand.vmem [shape: f32[9,256], index: 1, kind: input, shape index: {}]   ;;  %s2452_s2 = inlined_call_operand.vmem [shape: f32[1,256], index: 2, kind: input, shape index: {}]   ;;  %s2453_s3 = inlined_call_operand.vmem [shape: f32[2,8,8,256], index: 3, kind: output, shape index: {}]  }
   0x1   :  { %s1605_s14 = smov 0  }
   0x2 LB: > { %s25_s15 = sadd.s32 1, %s1575_s13  ;;  %p1517_p0 = scmp.ge.s32.totalorder %s1579_s14, 1  ;;  %s1579_s14 = sphi %s1605_s14, %s13_s14   ;;  %s1575_s13 = sphi %s1603_s13, %s2455_s13   ;;  %s1571_s12 = sphi %s1601_s12, %s2454_s12  }
   0x3   : > { %p27_p1 = scmp.ge.s32.totalorder %s25_s15, 2  ;;  %p179_p2 = scmp.lt.s32.totalorder %s1579_s14, 3 }
   0x5   : > { %s2457_s15 = smov (%p27_p1, %s25_s15), 0  ;;  %p180_p3 = pnand %p1517_p0, %p179_p2 }
   0x6   : > { %p221_p4 = scmp.lt.s32.totalorder (!%p180_p3), %s1571_s12, 1  ;;  %v293_v0 = vlaneseq (!%p180_p3)  ;;  %v1622_v1 = vld [vmem:[%s2451_s1] ss:$8 sm:$0x3] (!%p180_p3)  ;;  %vm396_vm0 = vcmask (!%p180_p3), 1046528   ;;  %vm554_vm1 = vcmask (!%p180_p3), 1045504  }
   0x7   : > { %183 = sbr.rel (%p180_p3) target bundleno = 201 (0xc9), region = 32  ;;  %v1627_v2 = vld [vmem:[%s2451_s1 + $0x1] ss:$8 sm:$0x3] (!%p180_p3) }
   0x8   : > { %v1632_v3 = vld [vmem:[%s2451_s1 + $0x2] ss:$8 sm:$0x3] (!%p180_p3)  ;;  %v294_v4 = vshrl.u32 (!%p180_p3), %v293_v0, 7  ;;  %v1725_v41 = vld [vmem:[%s2452_s2] sm:$0x3] (!%p180_p3) }
   0x9   : > { %v1639_v5 = vld [vmem:[%s2451_s1 + $0x3] ss:$8 sm:$0x3] (!%p180_p3)  ;;  %v1644_v6 = vld [vmem:[%s2451_s1 + $0x4] ss:$8 sm:$0x3] (!%p180_p3) }
   0xa   : > { %v1649_v7 = vld [vmem:[%s2451_s1 + $0x5] ss:$8 sm:$0x3] (!%p180_p3)  ;;  %v295_v8 = vsub.s32 (!%p180_p3), 0, %v294_v4  ;;  %v299_v57 = vsub.s32 (!%p180_p3), 1, %v294_v4 }
   0xb   : > { %v1655_v9 = vld [vmem:[%s2451_s1 + $0x6] ss:$8 sm:$0x3] (!%p180_p3)  ;;  %v1660_v10 = vld [vmem:[%s2451_s1 + $0x7] ss:$8 sm:$0x3] (!%p180_p3) }
   0xc   : > { %v1668_v11 = vrot.slane (!%p180_p3), %v1622_v1, %v295_v8  ;;  %v1671_v12 = vrot.slane (!%p180_p3), %v1627_v2, %v295_v8  ;;  %v1674_v13 = vrot.slane (!%p180_p3), %v1632_v3, %v295_v8  ;;  %v1677_v14 = vrot.slane (!%p180_p3), %v1639_v5, %v295_v8  ;;  %v1715_v35 = vld [vmem:[%s2451_s1 + $0x10] ss:$8 sm:$0x3] (!%p180_p3) }
   0xd   : > { %v1682_v17 = vrot.slane (!%p180_p3), %v1644_v6, %v295_v8  ;;  %v1685_v18 = vrot.slane (!%p180_p3), %v1649_v7, %v295_v8  ;;  %v1688_v19 = vrot.slane (!%p180_p3), %v1655_v9, %v295_v8  ;;  %v1691_v20 = vrot.slane (!%p180_p3), %v1660_v10, %v295_v8 }
   0xe   : > { %s2459_s12 = smov (!%p221_p4, %s1571_s12), 1  ;;  %v1740_v53 = vrot.slane %v1715_v35, %v295_v8  ;;  %v1743_v54 = vrot.slane %v1725_v41, %v295_v8  ;;  %v1761_v4 = vrot.slane %v1622_v1, %v299_v57 }
   0xf   : > { %s1532_s28 = smul.u32 320, %s2459_s12  ;;  %s1531_s17 = sshll.u32 %s2459_s12, 7 }
  0x10   : > { %s1828_s19 = scalar_lea.vmem %s2453_s3, %s1531_s17 }
  0x11   : > { %s1665_s8 = scalar_lea.vmem %s2450_s0, %s1532_s28 }
  0x12   : > { %v251_v15 = vld [vmem:[%s1665_s8] sm:$0xff]  ;;  %v253_v16 = vld [vmem:[%s1665_s8 + $0x10] sm:$0x3]  ;;  %v252_v62 = vld [vmem:[%s1665_s8 + $0x8] sm:$0xff] }
  0x13   : > { %v1694_v21 = vld [vmem:[%s1665_s8 + $0x20] sm:$0xff]  ;;  %v1697_v22 = vld [vmem:[%s1665_s8 + $0x30] sm:$0x3]  ;;  %v303_v23 = vmul.f32 %v1668_v11, %v251_v15  ;;  %v332_v24 = vmul.f32 %v1671_v12, %v251_v15  ;;  %v334_v25 = vmul.f32 %v1671_v12, %v253_v16  ;;  %v490_v26 = vmul.f32 %v1674_v13, %v251_v15  ;;  %v254_v63 = vld [vmem:[%s1665_s8 + $0x18] sm:$0x3] }
  0x14   : > { %v492_v27 = vmul.f32 %v1674_v13, %v253_v16  ;;  %v648_v28 = vmul.f32 %v1677_v14, %v1694_v21  ;;  %v693_v29 = vmul.f32 %v1682_v17, %v1694_v21  ;;  %v695_v30 = vmul.f32 %v1682_v17, %v1697_v22  ;;  %v1718_v36 = vld [vmem:[%s1665_s8 + $0x40] sm:$0xff]  ;;  %v1733_v46 = vld [vmem:[%s1665_s8 + $0x50] sm:$0x3] }
  0x15   : > { %v397_v31 = vrot.slane %v332_v24, 1  ;;  %v398_v32 = vrot.slane %v334_v25, 1  ;;  %v555_v33 = vrot.slane %v490_v26, 2  ;;  %v850_v34 = vmul.f32 %v1685_v18, %v1694_v21 }
  0x16   : > { %v556_v37 = vrot.slane %v492_v27, 2  ;;  %v757_v38 = vrot.slane %v693_v29, 1  ;;  %v758_v39 = vrot.slane %v695_v30, 1  ;;  %v852_v40 = vmul.f32 %v1685_v18, %v1697_v22  ;;  %v1774_v29 = vld [vmem:[%s1665_s8 + $0x28] sm:$0xff] }
  0x17   : > { %v399_v42 = vsel %vm396_vm0, %v397_v31, %v398_v32  ;;  %v914_v43 = vrot.slane %v850_v34, 2  ;;  %v1007_v44 = vmul.f32 %v1688_v19, %v1718_v36  ;;  %v1052_v45 = vmul.f32 %v1691_v20, %v1718_v36 }
  0x18   : > { %v461_v47 = vadd.f32 %v399_v42, %v303_v23  ;;  %v557_v48 = vsel %vm554_vm1, %v555_v33, %v556_v37  ;;  %v759_v49 = vsel %vm396_vm0, %v757_v38, %v758_v39  ;;  %v915_v50 = vrot.slane %v852_v40, 2  ;;  %v1788_v38 = vld [vmem:[%s1665_s8 + $0x38] sm:$0x3] }
  0x19   : > { %v1054_v51 = vmul.f32 %v1691_v20, %v1733_v46  ;;  %v1116_v52 = vrot.slane %v1052_v45, 1  ;;  %v1748_v58 = vmul.f32 %v1668_v11, %v1694_v21  ;;  %v1209_v60 = vmul.f32 %v1740_v53, %v1718_v36 }
  0x1a   : > { %v619_v55 = vadd.f32 %v557_v48, %v461_v47  ;;  %v916_v56 = vsel %vm554_vm1, %v914_v43, %v915_v50  ;;  %v1211_v61 = vmul.f32 %v1740_v53, %v1733_v46  ;;  %v1758_v0 = vmul.f32 %v1671_v12, %v1694_v21 }
  0x1b   : > { %v1117_v59 = vrot.slane %v1054_v51, 1  ;;  %v1764_v15 = vrot.slane %v1627_v2, %v299_v57  ;;  %v1767_v16 = vrot.slane %v1632_v3, %v299_v57  ;;  %v1273_v24 = vrot.slane %v1209_v60, 2 }
  0x1c   : > { %v664_v8 = vadd.f32 %v648_v28, %v619_v55  ;;  %v1274_v25 = vrot.slane %v1211_v61, 2  ;;  %v1771_v26 = vrot.slane %v1639_v5, %v299_v57  ;;  %v304_v1 = vmul.f32 %v1761_v4, %v252_v62 }
  0x1d   : > { %v1118_v23 = vsel %vm396_vm0, %v1116_v52, %v1117_v59  ;;  %v333_v28 = vmul.f32 %v1764_v15, %v252_v62  ;;  %v335_v2 = vmul.f32 %v1764_v15, %v254_v63  ;;  %v491_v30 = vmul.f32 %v1767_v16, %v252_v62 }
  0x1e   : > { %v821_v27 = vadd.f32 %v759_v49, %v664_v8  ;;  %v1275_v3 = vsel %vm554_vm1, %v1273_v24, %v1274_v25  ;;  %v493_v31 = vmul.f32 %v1767_v16, %v254_v63  ;;  %v649_v5 = vmul.f32 %v1771_v26, %v1774_v29  ;;  %v1802_v49 = vld [vmem:[%s1665_s8 + $0x48] sm:$0xff]  ;;  %v1816_v8 = vld [vmem:[%s1665_s8 + $0x58] sm:$0x3] }
  0x1f   : > { %v400_v33 = vrot.slane %v333_v28, 1  ;;  %v401_v34 = vrot.slane %v335_v2, 1  ;;  %v1785_v37 = vrot.slane %v1644_v6, %v299_v57  ;;  %v558_v39 = vrot.slane %v491_v30, 2 }
  0x20   : > { %v978_v32 = vadd.f32 %v916_v56, %v821_v27  ;;  %v559_v40 = vrot.slane %v493_v31, 2  ;;  %v1791_v42 = vrot.slane %v1649_v7, %v299_v57  ;;  %v1794_v43 = vrot.slane %v1655_v9, %v299_v57 }
  0x21   : > { %v402_v47 = vsel %vm396_vm0, %v400_v33, %v401_v34  ;;  %v694_v48 = vmul.f32 %v1785_v37, %v1774_v29  ;;  %v696_v6 = vmul.f32 %v1785_v37, %v1788_v38  ;;  %v1813_v62 = vrot.slane %v1660_v10, %v299_v57 }
  0x22   : > { %v1023_v45 = vadd.f32 %v1007_v44, %v978_v32  ;;  %v462_v50 = vadd.f32 %v402_v47, %v304_v1  ;;  %v560_v51 = vsel %vm554_vm1, %v558_v39, %v559_v40  ;;  %v851_v7 = vmul.f32 %v1791_v42, %v1774_v29 }
  0x23   : > { %v853_v9 = vmul.f32 %v1791_v42, %v1788_v38  ;;  %v760_v52 = vrot.slane %v694_v48, 1  ;;  %v761_v55 = vrot.slane %v696_v6, 1  ;;  %v1008_v56 = vmul.f32 %v1794_v43, %v1802_v49 }
  0x24   : > { %v1180_v44 = vadd.f32 %v1118_v23, %v1023_v45  ;;  %v620_v59 = vadd.f32 %v560_v51, %v462_v50  ;;  %v917_v60 = vrot.slane %v851_v7, 2  ;;  %v1820_v25 = vrot.slane %v1715_v35, %v299_v57 }
  0x25   : > { %v918_v61 = vrot.slane %v853_v9, 2  ;;  %v762_v24 = vsel %vm396_vm0, %v760_v52, %v761_v55  ;;  %v1823_v23 = vrot.slane %v1725_v41, %v299_v57  ;;  %v1053_v1 = vmul.f32 %v1813_v62, %v1802_v49 }
  0x26   : > { %v1337_v63 = vadd.f32 %v1275_v3, %v1180_v44  ;;  %v665_v27 = vadd.f32 %v649_v5, %v620_v59  ;;  %v1055_v28 = vmul.f32 %v1813_v62, %v1816_v8  ;;  %v1210_v41 = vmul.f32 %v1820_v25, %v1802_v49 }
  0x27   : > { %v919_v10 = vsel %vm554_vm1, %v917_v60, %v918_v61  ;;  %v1212_v57 = vmul.f32 %v1820_v25, %v1816_v8  ;;  %v338_v2 = vmul.f32 %v1671_v12, %v1697_v22  ;;  %v1119_v30 = vrot.slane %v1053_v1, 1 }
  0x28   : > { %v1365_v35 = vadd.f32 %v1743_v54, %v1337_v63  ;;  %v822_v3 = vadd.f32 %v762_v24, %v665_v27  ;;  %v1120_v31 = vrot.slane %v1055_v28, 1  ;;  %v403_v5 = vrot.slane %v1758_v0, 1 }
  0x29   : > { %v1276_v32 = vrot.slane %v1210_v41, 2  ;;  %v1277_v33 = vrot.slane %v1212_v57, 2  ;;  %v404_v34 = vrot.slane %v338_v2, 1  ;;  %v494_v39 = vmul.f32 %v1674_v13, %v1694_v21  ;;  %v1856_v21 = vld [vmem:[%s1665_s8 + $0x60] sm:$0xff] }
  0x2a   : > { %1381 = vst [vmem:[%s1828_s19] sm:$0xff] %v1365_v35  ;;  %v979_v40 = vadd.f32 %v919_v10, %v822_v3  ;;  %v1121_v45 = vsel %vm396_vm0, %v1119_v30, %v1120_v31  ;;  %v496_v47 = vmul.f32 %v1674_v13, %v1697_v22  ;;  %v650_v48 = vmul.f32 %v1677_v14, %v1718_v36 }
  0x2b   : > { %v1278_v6 = vsel %vm554_vm1, %v1276_v32, %v1277_v33  ;;  %v405_v0 = vsel %vm396_vm0, %v403_v5, %v404_v34  ;;  %v561_v50 = vrot.slane %v494_v39, 2  ;;  %v697_v51 = vmul.f32 %v1682_v17, %v1718_v36 }
  0x2c   : > { %v1024_v7 = vadd.f32 %v1008_v56, %v979_v40  ;;  %v463_v9 = vadd.f32 %v405_v0, %v1748_v58  ;;  %v562_v44 = vrot.slane %v496_v47, 2  ;;  %v699_v22 = vmul.f32 %v1682_v17, %v1733_v46  ;;  %v1868_v56 = vld [vmem:[%s1665_s8 + $0x70] sm:$0x3] }
  0x2d   : > { %v763_v52 = vrot.slane %v697_v51, 1  ;;  %v854_v55 = vmul.f32 %v1685_v18, %v1718_v36  ;;  %v856_v59 = vmul.f32 %v1685_v18, %v1733_v46  ;;  %v1009_v60 = vmul.f32 %v1688_v19, %v1856_v21 }
  0x2e   : > { %v1181_v61 = vadd.f32 %v1121_v45, %v1024_v7  ;;  %v563_v63 = vsel %vm554_vm1, %v561_v50, %v562_v44  ;;  %v764_v58 = vrot.slane %v699_v22, 1  ;;  %v1056_v24 = vmul.f32 %v1691_v20, %v1856_v21 }
  0x2f   : > { %v621_v27 = vadd.f32 %v563_v63, %v463_v9  ;;  %v920_v10 = vrot.slane %v854_v55, 2  ;;  %v921_v1 = vrot.slane %v856_v59, 2  ;;  %v1058_v28 = vmul.f32 %v1691_v20, %v1868_v56 }
  0x30   : > { %v1338_v35 = vadd.f32 %v1278_v6, %v1181_v61  ;;  %v765_v41 = vsel %vm396_vm0, %v763_v52, %v764_v58  ;;  %v1122_v57 = vrot.slane %v1056_v24, 1  ;;  %v1213_v2 = vmul.f32 %v1740_v53, %v1856_v21  ;;  %v1907_v24 = vld [vmem:[%s1665_s8 + $0x68] sm:$0xff] }
  0x31   : > { %v666_v3 = vadd.f32 %v650_v48, %v621_v27  ;;  %v922_v30 = vsel %vm554_vm1, %v920_v10, %v921_v1  ;;  %v1123_v31 = vrot.slane %v1058_v28, 1  ;;  %v1215_v5 = vmul.f32 %v1740_v53, %v1868_v56 }
  0x32   : > { %v1366_v32 = vadd.f32 %v1823_v23, %v1338_v35  ;;  %v1279_v33 = vrot.slane %v1213_v2, 2  ;;  %v306_v34 = vmul.f32 %v1761_v4, %v1774_v29  ;;  %v337_v39 = vmul.f32 %v1764_v15, %v1774_v29 }
  0x33   : > { %v823_v40 = vadd.f32 %v765_v41, %v666_v3  ;;  %v1124_v45 = vsel %vm396_vm0, %v1122_v57, %v1123_v31  ;;  %v1280_v47 = vrot.slane %v1215_v5, 2  ;;  %v339_v48 = vmul.f32 %v1764_v15, %v1788_v38  ;;  %v1911_v41 = vld [vmem:[%s1665_s8 + $0x78] sm:$0x3] }
  0x34   : > { %1382 = vst [vmem:[%s1828_s19 + $0x8] sm:$0xff] %v1366_v32  ;;  %v406_v6 = vrot.slane %v337_v39, 1  ;;  %v495_v0 = vmul.f32 %v1767_v16, %v1774_v29  ;;  %v497_v50 = vmul.f32 %v1767_v16, %v1788_v38  ;;  %v651_v51 = vmul.f32 %v1771_v26, %v1802_v49 }
  0x35   : > { %v980_v7 = vadd.f32 %v922_v30, %v823_v40  ;;  %v1281_v9 = vsel %vm554_vm1, %v1279_v33, %v1280_v47  ;;  %v407_v44 = vrot.slane %v339_v48, 1  ;;  %v698_v22 = vmul.f32 %v1785_v37, %v1802_v49 }
  0x36   : > { %v564_v52 = vrot.slane %v495_v0, 2  ;;  %v565_v55 = vrot.slane %v497_v50, 2  ;;  %v700_v59 = vmul.f32 %v1785_v37, %v1816_v8  ;;  %v855_v29 = vmul.f32 %v1791_v42, %v1802_v49 }
  0x37   : > { %v1025_v38 = vadd.f32 %v1009_v60, %v980_v7  ;;  %v408_v61 = vsel %vm396_vm0, %v406_v6, %v407_v44  ;;  %v766_v63 = vrot.slane %v698_v22, 1  ;;  %v857_v58 = vmul.f32 %v1791_v42, %v1816_v8 }
  0x38   : > { %v464_v27 = vadd.f32 %v408_v61, %v306_v34  ;;  %v566_v10 = vsel %vm554_vm1, %v564_v52, %v565_v55  ;;  %v767_v1 = vrot.slane %v700_v59, 1  ;;  %v923_v28 = vrot.slane %v855_v29, 2 }
  0x39   : > { %v1182_v35 = vadd.f32 %v1124_v45, %v1025_v38  ;;  %v924_v57 = vrot.slane %v857_v58, 2  ;;  %v1010_v60 = vmul.f32 %v1794_v43, %v1907_v24  ;;  %v1057_v2 = vmul.f32 %v1813_v62, %v1907_v24 }
  0x3a   : > { %v622_v3 = vadd.f32 %v566_v10, %v464_v27  ;;  %v768_v30 = vsel %vm396_vm0, %v766_v63, %v767_v1  ;;  %v1059_v31 = vmul.f32 %v1813_v62, %v1911_v41  ;;  %v1214_v5 = vmul.f32 %v1820_v25, %v1907_v24 }
  0x3b   : > { %v1339_v32 = vadd.f32 %v1281_v9, %v1182_v35  ;;  %v925_v33 = vsel %vm554_vm1, %v923_v28, %v924_v57  ;;  %v1125_v34 = vrot.slane %v1057_v2, 1  ;;  %v1216_v39 = vmul.f32 %v1820_v25, %v1911_v41  ;;  %v1951_v28 = vld [vmem:[%s1665_s8 + $0x80] sm:$0xff] }
  0x3c   : > { %v667_v40 = vadd.f32 %v651_v51, %v622_v3  ;;  %v1126_v45 = vrot.slane %v1059_v31, 1  ;;  %v1282_v47 = vrot.slane %v1214_v5, 2  ;;  %v307_v48 = vmul.f32 %v1668_v11, %v1718_v36  ;;  %v1955_v3 = vld [vmem:[%s1665_s8 + $0x90] sm:$0x3] }
  0x3d   : > { %v1367_v6 = vadd.f32 %v1743_v54, %v1339_v32  ;;  %v1283_v0 = vrot.slane %v1216_v39, 2  ;;  %v340_v50 = vmul.f32 %v1671_v12, %v1718_v36  ;;  %v342_v7 = vmul.f32 %v1671_v12, %v1733_v46 }
  0x3e   : > { %v824_v9 = vadd.f32 %v768_v30, %v667_v40  ;;  %v1127_v44 = vsel %vm396_vm0, %v1125_v34, %v1126_v45  ;;  %v498_v51 = vmul.f32 %v1674_v13, %v1718_v36  ;;  %v500_v22 = vmul.f32 %v1674_v13, %v1733_v46 }
  0x3f   : > { %1383 = vst [vmem:[%s1828_s19 + $0x10] sm:$0xff] %v1367_v6  ;;  %v1284_v52 = vsel %vm554_vm1, %v1282_v47, %v1283_v0  ;;  %v409_v55 = vrot.slane %v340_v50, 1  ;;  %v410_v59 = vrot.slane %v342_v7, 1  ;;  %v652_v29 = vmul.f32 %v1677_v14, %v1856_v21 }
  0x40   : > { %v981_v38 = vadd.f32 %v925_v33, %v824_v9  ;;  %v567_v61 = vrot.slane %v498_v51, 2  ;;  %v568_v63 = vrot.slane %v500_v22, 2  ;;  %v701_v58 = vmul.f32 %v1682_v17, %v1856_v21 }
  0x41   : > { %v411_v36 = vsel %vm396_vm0, %v409_v55, %v410_v59  ;;  %v703_v46 = vmul.f32 %v1682_v17, %v1868_v56  ;;  %v858_v27 = vmul.f32 %v1685_v18, %v1856_v21  ;;  %v860_v10 = vmul.f32 %v1685_v18, %v1868_v56 }
  0x42   : > { %v1026_v1 = vadd.f32 %v1010_v60, %v981_v38  ;;  %v465_v35 = vadd.f32 %v411_v36, %v307_v48  ;;  %v569_v57 = vsel %vm554_vm1, %v567_v61, %v568_v63  ;;  %v769_v2 = vrot.slane %v701_v58, 1 }
  0x43   : > { %v770_v30 = vrot.slane %v703_v46, 1  ;;  %v926_v31 = vrot.slane %v858_v27, 2  ;;  %v927_v5 = vrot.slane %v860_v10, 2  ;;  %v1011_v32 = vmul.f32 %v1688_v19, %v1951_v28 }
  0x44   : > { %v1183_v33 = vadd.f32 %v1127_v44, %v1026_v1  ;;  %v623_v34 = vadd.f32 %v569_v57, %v465_v35  ;;  %v1060_v39 = vmul.f32 %v1691_v20, %v1951_v28  ;;  %v1062_v60 = vmul.f32 %v1691_v20, %v1955_v3 }
  0x45   : > { %v771_v40 = vsel %vm396_vm0, %v769_v2, %v770_v30  ;;  %v928_v45 = vsel %vm554_vm1, %v926_v31, %v927_v5  ;;  %v1217_v47 = vmul.f32 %v1740_v53, %v1951_v28  ;;  %v1219_v48 = vmul.f32 %v1740_v53, %v1955_v3  ;;  %v1995_v5 = vld [vmem:[%s1665_s8 + $0x88] sm:$0xff] }
  0x46   : > { %v1340_v6 = vadd.f32 %v1284_v52, %v1183_v33  ;;  %v668_v0 = vadd.f32 %v652_v29, %v623_v34  ;;  %v1128_v50 = vrot.slane %v1060_v39, 1  ;;  %v1129_v7 = vrot.slane %v1062_v60, 1 }
  0x47   : > { %v1285_v9 = vrot.slane %v1217_v47, 2  ;;  %v1286_v44 = vrot.slane %v1219_v48, 2  ;;  %v308_v51 = vmul.f32 %v1761_v4, %v1802_v49  ;;  %v341_v22 = vmul.f32 %v1764_v15, %v1802_v49 }
  0x48   : > { %v1368_v55 = vadd.f32 %v1823_v23, %v1340_v6  ;;  %v825_v59 = vadd.f32 %v771_v40, %v668_v0  ;;  %v1130_v38 = vsel %vm396_vm0, %v1128_v50, %v1129_v7  ;;  %v343_v52 = vmul.f32 %v1764_v15, %v1816_v8 }
  0x49   : > { %v1287_v29 = vsel %vm554_vm1, %v1285_v9, %v1286_v44  ;;  %v412_v61 = vrot.slane %v341_v22, 1  ;;  %v499_v63 = vmul.f32 %v1767_v16, %v1802_v49  ;;  %v501_v58 = vmul.f32 %v1767_v16, %v1816_v8 }
  0x4a   : > { %1384 = vst [vmem:[%s1828_s19 + $0x18] sm:$0xff] %v1368_v55  ;;  %v982_v36 = vadd.f32 %v928_v45, %v825_v59  ;;  %v413_v46 = vrot.slane %v343_v52, 1  ;;  %v653_v27 = vmul.f32 %v1771_v26, %v1907_v24  ;;  %v702_v10 = vmul.f32 %v1785_v37, %v1907_v24  ;;  %v1999_v45 = vld [vmem:[%s1665_s8 + $0x98] sm:$0x3] }
  0x4b   : > { %v570_v1 = vrot.slane %v499_v63, 2  ;;  %v571_v35 = vrot.slane %v501_v58, 2  ;;  %v704_v57 = vmul.f32 %v1785_v37, %v1911_v41  ;;  %v859_v49 = vmul.f32 %v1791_v42, %v1907_v24 }
  0x4c   : > { %v1027_v2 = vadd.f32 %v1011_v32, %v982_v36  ;;  %v414_v8 = vsel %vm396_vm0, %v412_v61, %v413_v46  ;;  %v772_v30 = vrot.slane %v702_v10, 1  ;;  %v861_v31 = vmul.f32 %v1791_v42, %v1911_v41 }
  0x4d   : > { %v466_v33 = vadd.f32 %v414_v8, %v308_v51  ;;  %v572_v34 = vsel %vm554_vm1, %v570_v1, %v571_v35  ;;  %v773_v39 = vrot.slane %v704_v57, 1  ;;  %v929_v60 = vrot.slane %v859_v49, 2 }
  0x4e   : > { %v1184_v40 = vadd.f32 %v1130_v38, %v1027_v2  ;;  %v930_v47 = vrot.slane %v861_v31, 2  ;;  %v1012_v32 = vmul.f32 %v1794_v43, %v1995_v5  ;;  %v1061_v48 = vmul.f32 %v1813_v62, %v1995_v5 }
  0x4f   : > { %v624_v6 = vadd.f32 %v572_v34, %v466_v33  ;;  %v774_v0 = vsel %vm396_vm0, %v772_v30, %v773_v39  ;;  %v1063_v50 = vmul.f32 %v1813_v62, %v1999_v45  ;;  %v1218_v7 = vmul.f32 %v1820_v25, %v1995_v5 }
  0x50   : > { %v1341_v9 = vadd.f32 %v1287_v29, %v1184_v40  ;;  %v931_v44 = vsel %vm554_vm1, %v929_v60, %v930_v47  ;;  %v1131_v51 = vrot.slane %v1061_v48, 1  ;;  %v1220_v22 = vmul.f32 %v1820_v25, %v1999_v45  ;;  %v2039_v60 = vld [vmem:[%s1665_s8 + $0xa0] sm:$0xff] }
  0x51   : > { %v669_v55 = vadd.f32 %v653_v27, %v624_v6  ;;  %v1132_v59 = vrot.slane %v1063_v50, 1  ;;  %v1288_v38 = vrot.slane %v1218_v7, 2  ;;  %v309_v52 = vmul.f32 %v1668_v11, %v1856_v21  ;;  %v2043_v6 = vld [vmem:[%s1665_s8 + $0xb0] sm:$0x3] }
  0x52   : > { %v1369_v61 = vadd.f32 %v1743_v54, %v1341_v9  ;;  %v1289_v63 = vrot.slane %v1220_v22, 2  ;;  %v344_v58 = vmul.f32 %v1671_v12, %v1856_v21  ;;  %v346_v29 = vmul.f32 %v1671_v12, %v1868_v56 }
  0x53   : > { %v826_v36 = vadd.f32 %v774_v0, %v669_v55  ;;  %v1133_v46 = vsel %vm396_vm0, %v1131_v51, %v1132_v59  ;;  %v502_v27 = vmul.f32 %v1674_v13, %v1856_v21  ;;  %v504_v10 = vmul.f32 %v1674_v13, %v1868_v56 }
  0x54   : > { %1385 = vst [vmem:[%s1828_s19 + $0x20] sm:$0xff] %v1369_v61  ;;  %v1290_v1 = vsel %vm554_vm1, %v1288_v38, %v1289_v63  ;;  %v415_v35 = vrot.slane %v344_v58, 1  ;;  %v416_v57 = vrot.slane %v346_v29, 1  ;;  %v654_v49 = vmul.f32 %v1677_v14, %v1951_v28 }
  0x55   : > { %v983_v2 = vadd.f32 %v931_v44, %v826_v36  ;;  %v573_v8 = vrot.slane %v502_v27, 2  ;;  %v574_v30 = vrot.slane %v504_v10, 2  ;;  %v705_v31 = vmul.f32 %v1682_v17, %v1951_v28 }
  0x56   : > { %v417_v21 = vsel %vm396_vm0, %v415_v35, %v416_v57  ;;  %v707_v56 = vmul.f32 %v1682_v17, %v1955_v3  ;;  %v862_v33 = vmul.f32 %v1685_v18, %v1951_v28  ;;  %v864_v34 = vmul.f32 %v1685_v18, %v1955_v3 }
  0x57   : > { %v1028_v39 = vadd.f32 %v1012_v32, %v983_v2  ;;  %v467_v40 = vadd.f32 %v417_v21, %v309_v52  ;;  %v575_v47 = vsel %vm554_vm1, %v573_v8, %v574_v30  ;;  %v775_v48 = vrot.slane %v705_v31, 1 }
  0x58   : > { %v776_v0 = vrot.slane %v707_v56, 1  ;;  %v932_v50 = vrot.slane %v862_v33, 2  ;;  %v933_v7 = vrot.slane %v864_v34, 2  ;;  %v1013_v9 = vmul.f32 %v1688_v19, %v2039_v60 }
  0x59   : > { %v1185_v44 = vadd.f32 %v1133_v46, %v1028_v39  ;;  %v625_v51 = vadd.f32 %v575_v47, %v467_v40  ;;  %v1064_v22 = vmul.f32 %v1691_v20, %v2039_v60  ;;  %v1066_v32 = vmul.f32 %v1691_v20, %v2043_v6 }
  0x5a   : > { %v777_v55 = vsel %vm396_vm0, %v775_v48, %v776_v0  ;;  %v934_v59 = vsel %vm554_vm1, %v932_v50, %v933_v7  ;;  %v1221_v38 = vmul.f32 %v1740_v53, %v2039_v60  ;;  %v1223_v52 = vmul.f32 %v1740_v53, %v2043_v6  ;;  %v2083_v7 = vld [vmem:[%s1665_s8 + $0xa8] sm:$0xff] }
  0x5b   : > { %v1342_v61 = vadd.f32 %v1290_v1, %v1185_v44  ;;  %v670_v63 = vadd.f32 %v654_v49, %v625_v51  ;;  %v1134_v58 = vrot.slane %v1064_v22, 1  ;;  %v1135_v29 = vrot.slane %v1066_v32, 1 }
  0x5c   : > { %v1291_v36 = vrot.slane %v1221_v38, 2  ;;  %v1292_v46 = vrot.slane %v1223_v52, 2  ;;  %v310_v27 = vmul.f32 %v1761_v4, %v1907_v24  ;;  %v345_v10 = vmul.f32 %v1764_v15, %v1907_v24 }
  0x5d   : > { %v1370_v35 = vadd.f32 %v1823_v23, %v1342_v61  ;;  %v827_v57 = vadd.f32 %v777_v55, %v670_v63  ;;  %v1136_v2 = vsel %vm396_vm0, %v1134_v58, %v1135_v29  ;;  %v347_v1 = vmul.f32 %v1764_v15, %v1911_v41 }
  0x5e   : > { %v1293_v49 = vsel %vm554_vm1, %v1291_v36, %v1292_v46  ;;  %v418_v8 = vrot.slane %v345_v10, 1  ;;  %v503_v30 = vmul.f32 %v1767_v16, %v1907_v24  ;;  %v505_v31 = vmul.f32 %v1767_v16, %v1911_v41 }
  0x5f   : > { %1386 = vst [vmem:[%s1828_s19 + $0x28] sm:$0xff] %v1370_v35  ;;  %v984_v21 = vadd.f32 %v934_v59, %v827_v57  ;;  %v419_v56 = vrot.slane %v347_v1, 1  ;;  %v655_v33 = vmul.f32 %v1771_v26, %v1995_v5  ;;  %v706_v34 = vmul.f32 %v1785_v37, %v1995_v5  ;;  %v2087_v59 = vld [vmem:[%s1665_s8 + $0xb8] sm:$0x3] }
  0x60   : > { %v576_v39 = vrot.slane %v503_v30, 2  ;;  %v577_v40 = vrot.slane %v505_v31, 2  ;;  %v708_v47 = vmul.f32 %v1785_v37, %v1999_v45  ;;  %v863_v24 = vmul.f32 %v1791_v42, %v1995_v5 }
  0x61   : > { %v1029_v48 = vadd.f32 %v1013_v9, %v984_v21  ;;  %v420_v41 = vsel %vm396_vm0, %v418_v8, %v419_v56  ;;  %v778_v0 = vrot.slane %v706_v34, 1  ;;  %v865_v50 = vmul.f32 %v1791_v42, %v1999_v45 }
  0x62   : > { %v468_v44 = vadd.f32 %v420_v41, %v310_v27  ;;  %v578_v51 = vsel %vm554_vm1, %v576_v39, %v577_v40  ;;  %v779_v22 = vrot.slane %v708_v47, 1  ;;  %v935_v32 = vrot.slane %v863_v24, 2 }
  0x63   : > { %v1186_v55 = vadd.f32 %v1136_v2, %v1029_v48  ;;  %v936_v38 = vrot.slane %v865_v50, 2  ;;  %v1014_v9 = vmul.f32 %v1794_v43, %v2083_v7  ;;  %v1065_v52 = vmul.f32 %v1813_v62, %v2083_v7 }
  0x64   : > { %v626_v61 = vadd.f32 %v578_v51, %v468_v44  ;;  %v780_v63 = vsel %vm396_vm0, %v778_v0, %v779_v22  ;;  %v1067_v58 = vmul.f32 %v1813_v62, %v2087_v59  ;;  %v1222_v29 = vmul.f32 %v1820_v25, %v2083_v7 }
  0x65   : > { %v1343_v36 = vadd.f32 %v1293_v49, %v1186_v55  ;;  %v937_v46 = vsel %vm554_vm1, %v935_v32, %v936_v38  ;;  %v1137_v27 = vrot.slane %v1065_v52, 1  ;;  %v1224_v10 = vmul.f32 %v1820_v25, %v2087_v59  ;;  %v2127_v32 = vld [vmem:[%s1665_s8 + $0xc0] sm:$0xff] }
  0x66   : > { %v671_v35 = vadd.f32 %v655_v33, %v626_v61  ;;  %v1138_v57 = vrot.slane %v1067_v58, 1  ;;  %v1294_v2 = vrot.slane %v1222_v29, 2  ;;  %v311_v1 = vmul.f32 %v1668_v11, %v1951_v28  ;;  %v2131_v61 = vld [vmem:[%s1665_s8 + $0xd0] sm:$0x3] }
  0x67   : > { %v1371_v8 = vadd.f32 %v1743_v54, %v1343_v36  ;;  %v1295_v30 = vrot.slane %v1224_v10, 2  ;;  %v348_v31 = vmul.f32 %v1671_v12, %v1951_v28  ;;  %v350_v49 = vmul.f32 %v1671_v12, %v1955_v3 }
  0x68   : > { %v828_v21 = vadd.f32 %v780_v63, %v671_v35  ;;  %v1139_v56 = vsel %vm396_vm0, %v1137_v27, %v1138_v57  ;;  %v506_v33 = vmul.f32 %v1674_v13, %v1951_v28  ;;  %v508_v34 = vmul.f32 %v1674_v13, %v1955_v3 }
  0x69   : > { %1387 = vst [vmem:[%s1828_s19 + $0x30] sm:$0xff] %v1371_v8  ;;  %v1296_v39 = vsel %vm554_vm1, %v1294_v2, %v1295_v30  ;;  %v421_v40 = vrot.slane %v348_v31, 1  ;;  %v422_v47 = vrot.slane %v350_v49, 1  ;;  %v656_v24 = vmul.f32 %v1677_v14, %v2039_v60 }
  0x6a   : > { %v985_v48 = vadd.f32 %v937_v46, %v828_v21  ;;  %v579_v41 = vrot.slane %v506_v33, 2  ;;  %v580_v0 = vrot.slane %v508_v34, 2  ;;  %v709_v50 = vmul.f32 %v1682_v17, %v2039_v60 }
  0x6b   : > { %v423_v28 = vsel %vm396_vm0, %v421_v40, %v422_v47  ;;  %v711_v3 = vmul.f32 %v1682_v17, %v2043_v6  ;;  %v866_v44 = vmul.f32 %v1685_v18, %v2039_v60  ;;  %v868_v51 = vmul.f32 %v1685_v18, %v2043_v6 }
  0x6c   : > { %v1030_v22 = vadd.f32 %v1014_v9, %v985_v48  ;;  %v469_v55 = vadd.f32 %v423_v28, %v311_v1  ;;  %v581_v38 = vsel %vm554_vm1, %v579_v41, %v580_v0  ;;  %v781_v52 = vrot.slane %v709_v50, 1 }
  0x6d   : > { %v782_v63 = vrot.slane %v711_v3, 1  ;;  %v938_v58 = vrot.slane %v866_v44, 2  ;;  %v939_v29 = vrot.slane %v868_v51, 2  ;;  %v1015_v36 = vmul.f32 %v1688_v19, %v2127_v32 }
  0x6e   : > { %v1187_v46 = vadd.f32 %v1139_v56, %v1030_v22  ;;  %v627_v27 = vadd.f32 %v581_v38, %v469_v55  ;;  %v1068_v10 = vmul.f32 %v1691_v20, %v2127_v32  ;;  %v1070_v9 = vmul.f32 %v1691_v20, %v2131_v61 }
  0x6f   : > { %v783_v35 = vsel %vm396_vm0, %v781_v52, %v782_v63  ;;  %v940_v57 = vsel %vm554_vm1, %v938_v58, %v939_v29  ;;  %v1225_v2 = vmul.f32 %v1740_v53, %v2127_v32  ;;  %v1227_v1 = vmul.f32 %v1740_v53, %v2131_v61  ;;  %v2171_v29 = vld [vmem:[%s1665_s8 + $0xc8] sm:$0xff] }
  0x70   : > { %v1344_v8 = vadd.f32 %v1296_v39, %v1187_v46  ;;  %v672_v30 = vadd.f32 %v656_v24, %v627_v27  ;;  %v1140_v31 = vrot.slane %v1068_v10, 1  ;;  %v1141_v49 = vrot.slane %v1070_v9, 1 }
  0x71   : > { %v1297_v21 = vrot.slane %v1225_v2, 2  ;;  %v1298_v56 = vrot.slane %v1227_v1, 2  ;;  %v312_v33 = vmul.f32 %v1761_v4, %v1995_v5  ;;  %v349_v34 = vmul.f32 %v1764_v15, %v1995_v5 }
  0x72   : > { %v1372_v40 = vadd.f32 %v1823_v23, %v1344_v8  ;;  %v829_v47 = vadd.f32 %v783_v35, %v672_v30  ;;  %v1142_v48 = vsel %vm396_vm0, %v1140_v31, %v1141_v49  ;;  %v351_v39 = vmul.f32 %v1764_v15, %v1999_v45 }
  0x73   : > { %v1299_v24 = vsel %vm554_vm1, %v1297_v21, %v1298_v56  ;;  %v424_v41 = vrot.slane %v349_v34, 1  ;;  %v507_v0 = vmul.f32 %v1767_v16, %v1995_v5  ;;  %v509_v50 = vmul.f32 %v1767_v16, %v1999_v45 }
  0x74   : > { %1388 = vst [vmem:[%s1828_s19 + $0x38] sm:$0xff] %v1372_v40  ;;  %v986_v28 = vadd.f32 %v940_v57, %v829_v47  ;;  %v425_v3 = vrot.slane %v351_v39, 1  ;;  %v657_v44 = vmul.f32 %v1771_v26, %v2083_v7  ;;  %v710_v51 = vmul.f32 %v1785_v37, %v2083_v7  ;;  %v2175_v57 = vld [vmem:[%s1665_s8 + $0xd8] sm:$0x3] }
  0x75   : > { %v582_v22 = vrot.slane %v507_v0, 2  ;;  %v583_v55 = vrot.slane %v509_v50, 2  ;;  %v712_v38 = vmul.f32 %v1785_v37, %v2087_v59  ;;  %v867_v5 = vmul.f32 %v1791_v42, %v2083_v7 }
  0x76   : > { %v1031_v52 = vadd.f32 %v1015_v36, %v986_v28  ;;  %v426_v45 = vsel %vm396_vm0, %v424_v41, %v425_v3  ;;  %v784_v63 = vrot.slane %v710_v51, 1  ;;  %v869_v58 = vmul.f32 %v1791_v42, %v2087_v59 }
  0x77   : > { %v470_v46 = vadd.f32 %v426_v45, %v312_v33  ;;  %v584_v27 = vsel %vm554_vm1, %v582_v22, %v583_v55  ;;  %v785_v10 = vrot.slane %v712_v38, 1  ;;  %v941_v9 = vrot.slane %v867_v5, 2 }
  0x78   : > { %v1188_v35 = vadd.f32 %v1142_v48, %v1031_v52  ;;  %v942_v2 = vrot.slane %v869_v58, 2  ;;  %v1016_v36 = vmul.f32 %v1794_v43, %v2171_v29  ;;  %v1069_v1 = vmul.f32 %v1813_v62, %v2171_v29 }
  0x79   : > { %v628_v8 = vadd.f32 %v584_v27, %v470_v46  ;;  %v786_v30 = vsel %vm396_vm0, %v784_v63, %v785_v10  ;;  %v1071_v31 = vmul.f32 %v1813_v62, %v2175_v57  ;;  %v1226_v49 = vmul.f32 %v1820_v25, %v2171_v29 }
  0x7a   : > { %v1345_v21 = vadd.f32 %v1299_v24, %v1188_v35  ;;  %v943_v56 = vsel %vm554_vm1, %v941_v9, %v942_v2  ;;  %v1143_v33 = vrot.slane %v1069_v1, 1  ;;  %v1228_v34 = vmul.f32 %v1820_v25, %v2175_v57  ;;  %v2215_v9 = vld [vmem:[%s1665_s8 + $0xe0] sm:$0xff] }
  0x7b   : > { %v673_v40 = vadd.f32 %v657_v44, %v628_v8  ;;  %v1144_v47 = vrot.slane %v1071_v31, 1  ;;  %v1300_v48 = vrot.slane %v1226_v49, 2  ;;  %v313_v39 = vmul.f32 %v1668_v11, %v2039_v60  ;;  %v2219_v8 = vld [vmem:[%s1665_s8 + $0xf0] sm:$0x3] }
  0x7c   : > { %v1373_v41 = vadd.f32 %v1743_v54, %v1345_v21  ;;  %v1301_v0 = vrot.slane %v1228_v34, 2  ;;  %v352_v50 = vmul.f32 %v1671_v12, %v2039_v60  ;;  %v354_v24 = vmul.f32 %v1671_v12, %v2043_v6 }
  0x7d   : > { %v830_v28 = vadd.f32 %v786_v30, %v673_v40  ;;  %v1145_v3 = vsel %vm396_vm0, %v1143_v33, %v1144_v47  ;;  %v510_v44 = vmul.f32 %v1674_v13, %v2039_v60  ;;  %v512_v51 = vmul.f32 %v1674_v13, %v2043_v6 }
  0x7e   : > { %1389 = vst [vmem:[%s1828_s19 + $0x40] sm:$0xff] %v1373_v41  ;;  %v1302_v22 = vsel %vm554_vm1, %v1300_v48, %v1301_v0  ;;  %v427_v55 = vrot.slane %v352_v50, 1  ;;  %v428_v38 = vrot.slane %v354_v24, 1  ;;  %v658_v5 = vmul.f32 %v1677_v14, %v2127_v32 }
  0x7f   : > { %v987_v52 = vadd.f32 %v943_v56, %v830_v28  ;;  %v585_v45 = vrot.slane %v510_v44, 2  ;;  %v586_v63 = vrot.slane %v512_v51, 2  ;;  %v713_v58 = vmul.f32 %v1682_v17, %v2127_v32 }
  0x80   : > { %v429_v60 = vsel %vm396_vm0, %v427_v55, %v428_v38  ;;  %v715_v6 = vmul.f32 %v1682_v17, %v2131_v61  ;;  %v870_v46 = vmul.f32 %v1685_v18, %v2127_v32  ;;  %v872_v27 = vmul.f32 %v1685_v18, %v2131_v61 }
  0x81   : > { %v1032_v10 = vadd.f32 %v1016_v36, %v987_v52  ;;  %v471_v35 = vadd.f32 %v429_v60, %v313_v39  ;;  %v587_v2 = vsel %vm554_vm1, %v585_v45, %v586_v63  ;;  %v787_v1 = vrot.slane %v713_v58, 1 }
  0x82   : > { %v788_v30 = vrot.slane %v715_v6, 1  ;;  %v944_v31 = vrot.slane %v870_v46, 2  ;;  %v945_v49 = vrot.slane %v872_v27, 2  ;;  %v1017_v21 = vmul.f32 %v1688_v19, %v2215_v9 }
  0x83   : > { %v1189_v56 = vadd.f32 %v1145_v3, %v1032_v10  ;;  %v629_v33 = vadd.f32 %v587_v2, %v471_v35  ;;  %v1072_v34 = vmul.f32 %v1691_v20, %v2215_v9  ;;  %v1074_v36 = vmul.f32 %v1691_v20, %v2219_v8 }
  0x84   : > { %v789_v40 = vsel %vm396_vm0, %v787_v1, %v788_v30  ;;  %v946_v47 = vsel %vm554_vm1, %v944_v31, %v945_v49  ;;  %v1229_v48 = vmul.f32 %v1740_v53, %v2215_v9  ;;  %v1231_v39 = vmul.f32 %v1740_v53, %v2219_v8  ;;  %v2259_v49 = vld [vmem:[%s1665_s8 + $0xe8] sm:$0xff] }
  0x85   : > { %v1346_v41 = vadd.f32 %v1302_v22, %v1189_v56  ;;  %v674_v0 = vadd.f32 %v658_v5, %v629_v33  ;;  %v1146_v50 = vrot.slane %v1072_v34, 1  ;;  %v1147_v24 = vrot.slane %v1074_v36, 1 }
  0x86   : > { %v1303_v28 = vrot.slane %v1229_v48, 2  ;;  %v1304_v3 = vrot.slane %v1231_v39, 2  ;;  %v314_v44 = vmul.f32 %v1761_v4, %v2083_v7  ;;  %v353_v51 = vmul.f32 %v1764_v15, %v2083_v7 }
  0x87   : > { %v1374_v55 = vadd.f32 %v1823_v23, %v1346_v41  ;;  %v831_v38 = vadd.f32 %v789_v40, %v674_v0  ;;  %v1148_v52 = vsel %vm396_vm0, %v1146_v50, %v1147_v24  ;;  %v355_v22 = vmul.f32 %v1764_v15, %v2087_v59 }
  0x88   : > { %v1305_v5 = vsel %vm554_vm1, %v1303_v28, %v1304_v3  ;;  %v430_v45 = vrot.slane %v353_v51, 1  ;;  %v511_v63 = vmul.f32 %v1767_v16, %v2083_v7  ;;  %v513_v58 = vmul.f32 %v1767_v16, %v2087_v59 }
  0x89   : > { %1390 = vst [vmem:[%s1828_s19 + $0x48] sm:$0xff] %v1374_v55  ;;  %v988_v60 = vadd.f32 %v946_v47, %v831_v38  ;;  %v431_v6 = vrot.slane %v355_v22, 1  ;;  %v659_v46 = vmul.f32 %v1771_v26, %v2171_v29  ;;  %v714_v27 = vmul.f32 %v1785_v37, %v2171_v29  ;;  %v2263_v47 = vld [vmem:[%s1665_s8 + $0xf8] sm:$0x3] }
  0x8a   : > { %v588_v10 = vrot.slane %v511_v63, 2  ;;  %v589_v35 = vrot.slane %v513_v58, 2  ;;  %v716_v2 = vmul.f32 %v1785_v37, %v2175_v57  ;;  %v871_v7 = vmul.f32 %v1791_v42, %v2171_v29 }
  0x8b   : > { %v1033_v1 = vadd.f32 %v1017_v21, %v988_v60  ;;  %v432_v59 = vsel %vm396_vm0, %v430_v45, %v431_v6  ;;  %v790_v30 = vrot.slane %v714_v27, 1  ;;  %v873_v31 = vmul.f32 %v1791_v42, %v2175_v57 }
  0x8c   : > { %v472_v56 = vadd.f32 %v432_v59, %v314_v44  ;;  %v590_v33 = vsel %vm554_vm1, %v588_v10, %v589_v35  ;;  %v791_v34 = vrot.slane %v716_v2, 1  ;;  %v947_v36 = vrot.slane %v871_v7, 2 }
  0x8d   : > { %v1190_v40 = vadd.f32 %v1148_v52, %v1033_v1  ;;  %v948_v48 = vrot.slane %v873_v31, 2  ;;  %v1018_v21 = vmul.f32 %v1794_v43, %v2259_v49  ;;  %v1073_v39 = vmul.f32 %v1813_v62, %v2259_v49 }
  0x8e   : > { %v630_v41 = vadd.f32 %v590_v33, %v472_v56  ;;  %v792_v0 = vsel %vm396_vm0, %v790_v30, %v791_v34  ;;  %v1075_v50 = vmul.f32 %v1813_v62, %v2263_v47  ;;  %v1230_v24 = vmul.f32 %v1820_v25, %v2259_v49 }
  0x8f   : > { %v1347_v28 = vadd.f32 %v1305_v5, %v1190_v40  ;;  %v949_v3 = vsel %vm554_vm1, %v947_v36, %v948_v48  ;;  %v1149_v44 = vrot.slane %v1073_v39, 1  ;;  %v1232_v51 = vmul.f32 %v1820_v25, %v2263_v47  ;;  %v2303_v36 = vld [vmem:[%s1665_s8 + $0x100] sm:$0xff] }
  0x90   : > { %v675_v55 = vadd.f32 %v659_v46, %v630_v41  ;;  %v1150_v38 = vrot.slane %v1075_v50, 1  ;;  %v1306_v52 = vrot.slane %v1230_v24, 2  ;;  %v315_v22 = vmul.f32 %v1668_v11, %v2127_v32  ;;  %v2307_v41 = vld [vmem:[%s1665_s8 + $0x110] sm:$0x3] }
  0x91   : > { %v1375_v45 = vadd.f32 %v1743_v54, %v1347_v28  ;;  %v1307_v63 = vrot.slane %v1232_v51, 2  ;;  %v356_v58 = vmul.f32 %v1671_v12, %v2127_v32  ;;  %v358_v5 = vmul.f32 %v1671_v12, %v2131_v61 }
  0x92   : > { %v832_v60 = vadd.f32 %v792_v0, %v675_v55  ;;  %v1151_v6 = vsel %vm396_vm0, %v1149_v44, %v1150_v38  ;;  %v514_v46 = vmul.f32 %v1674_v13, %v2127_v32  ;;  %v516_v27 = vmul.f32 %v1674_v13, %v2131_v61 }
  0x93   : > { %1391 = vst [vmem:[%s1828_s19 + $0x50] sm:$0xff] %v1375_v45  ;;  %v1308_v10 = vsel %vm554_vm1, %v1306_v52, %v1307_v63  ;;  %v433_v35 = vrot.slane %v356_v58, 1  ;;  %v434_v2 = vrot.slane %v358_v5, 1  ;;  %v660_v7 = vmul.f32 %v1677_v14, %v2215_v9 }
  0x94   : > { %v989_v1 = vadd.f32 %v949_v3, %v832_v60  ;;  %v591_v59 = vrot.slane %v514_v46, 2  ;;  %v592_v30 = vrot.slane %v516_v27, 2  ;;  %v717_v31 = vmul.f32 %v1682_v17, %v2215_v9 }
  0x95   : > { %v435_v32 = vsel %vm396_vm0, %v433_v35, %v434_v2  ;;  %v719_v61 = vmul.f32 %v1682_v17, %v2219_v8  ;;  %v874_v56 = vmul.f32 %v1685_v18, %v2215_v9  ;;  %v876_v33 = vmul.f32 %v1685_v18, %v2219_v8 }
  0x96   : > { %v1034_v34 = vadd.f32 %v1018_v21, %v989_v1  ;;  %v473_v40 = vadd.f32 %v435_v32, %v315_v22  ;;  %v593_v48 = vsel %vm554_vm1, %v591_v59, %v592_v30  ;;  %v793_v39 = vrot.slane %v717_v31, 1 }
  0x97   : > { %v794_v0 = vrot.slane %v719_v61, 1  ;;  %v950_v50 = vrot.slane %v874_v56, 2  ;;  %v951_v24 = vrot.slane %v876_v33, 2  ;;  %v1019_v28 = vmul.f32 %v1688_v19, %v2303_v36 }
  0x98   : > { %v1191_v3 = vadd.f32 %v1151_v6, %v1034_v34  ;;  %v631_v44 = vadd.f32 %v593_v48, %v473_v40  ;;  %v1076_v51 = vmul.f32 %v1691_v20, %v2303_v36  ;;  %v1078_v21 = vmul.f32 %v1691_v20, %v2307_v41 }
  0x99   : > { %v795_v55 = vsel %vm396_vm0, %v793_v39, %v794_v0  ;;  %v952_v38 = vsel %vm554_vm1, %v950_v50, %v951_v24  ;;  %v1233_v52 = vmul.f32 %v1740_v53, %v2303_v36  ;;  %v1235_v22 = vmul.f32 %v1740_v53, %v2307_v41  ;;  %v2347_v24 = vld [vmem:[%s1665_s8 + $0x108] sm:$0xff] }
  0x9a   : > { %v1348_v45 = vadd.f32 %v1308_v10, %v1191_v3  ;;  %v676_v63 = vadd.f32 %v660_v7, %v631_v44  ;;  %v1152_v58 = vrot.slane %v1076_v51, 1  ;;  %v1153_v5 = vrot.slane %v1078_v21, 1 }
  0x9b   : > { %v1309_v60 = vrot.slane %v1233_v52, 2  ;;  %v1310_v6 = vrot.slane %v1235_v22, 2  ;;  %v316_v46 = vmul.f32 %v1761_v4, %v2171_v29  ;;  %v357_v27 = vmul.f32 %v1764_v15, %v2171_v29 }
  0x9c   : > { %v1376_v35 = vadd.f32 %v1823_v23, %v1348_v45  ;;  %v833_v2 = vadd.f32 %v795_v55, %v676_v63  ;;  %v1154_v1 = vsel %vm396_vm0, %v1152_v58, %v1153_v5  ;;  %v359_v10 = vmul.f32 %v1764_v15, %v2175_v57 }
  0x9d   : > { %v1311_v7 = vsel %vm554_vm1, %v1309_v60, %v1310_v6  ;;  %v436_v59 = vrot.slane %v357_v27, 1  ;;  %v515_v30 = vmul.f32 %v1767_v16, %v2171_v29  ;;  %v517_v31 = vmul.f32 %v1767_v16, %v2175_v57 }
  0x9e   : > { %1392 = vst [vmem:[%s1828_s19 + $0x58] sm:$0xff] %v1376_v35  ;;  %v990_v32 = vadd.f32 %v952_v38, %v833_v2  ;;  %v437_v61 = vrot.slane %v359_v10, 1  ;;  %v661_v56 = vmul.f32 %v1771_v26, %v2259_v49  ;;  %v718_v33 = vmul.f32 %v1785_v37, %v2259_v49  ;;  %v2351_v38 = vld [vmem:[%s1665_s8 + $0x118] sm:$0x3] }
  0x9f   : > { %v594_v34 = vrot.slane %v515_v30, 2  ;;  %v595_v40 = vrot.slane %v517_v31, 2  ;;  %v720_v48 = vmul.f32 %v1785_v37, %v2263_v47  ;;  %v875_v29 = vmul.f32 %v1791_v42, %v2259_v49 }
  0xa0   : > { %v1035_v39 = vadd.f32 %v1019_v28, %v990_v32  ;;  %v438_v57 = vsel %vm396_vm0, %v436_v59, %v437_v61  ;;  %v796_v0 = vrot.slane %v718_v33, 1  ;;  %v877_v50 = vmul.f32 %v1791_v42, %v2263_v47 }
  0xa1   : > { %v474_v3 = vadd.f32 %v438_v57, %v316_v46  ;;  %v596_v44 = vsel %vm554_vm1, %v594_v34, %v595_v40  ;;  %v797_v51 = vrot.slane %v720_v48, 1  ;;  %v953_v21 = vrot.slane %v875_v29, 2  ;;  %v287_v57 = vld [vmem:[%s1665_s8 + $0x120] sm:$0xff] }
  0xa2   : > { %v1192_v55 = vadd.f32 %v1154_v1, %v1035_v39  ;;  %v954_v52 = vrot.slane %v877_v50, 2  ;;  %v1077_v28 = vmul.f32 %v1813_v62, %v2347_v24  ;;  %v1020_v45 = vmul.f32 %v1794_v43, %v2347_v24 }
  0xa3   : > { %v632_v22 = vadd.f32 %v596_v44, %v474_v3  ;;  %v1079_v63 = vmul.f32 %v1813_v62, %v2351_v38  ;;  %v1234_v58 = vmul.f32 %v1820_v25, %v2347_v24  ;;  %v798_v60 = vsel %vm396_vm0, %v796_v0, %v797_v51  ;;  %v289_v0 = vld [vmem:[%s1665_s8 + $0x130] sm:$0x3] }
  0xa4   : > { %v1349_v5 = vadd.f32 %v1311_v7, %v1192_v55  ;;  %v1155_v6 = vrot.slane %v1077_v28, 1  ;;  %v1236_v46 = vmul.f32 %v1820_v25, %v2351_v38  ;;  %v955_v35 = vsel %vm554_vm1, %v953_v21, %v954_v52 }
  0xa5   : > { %v677_v27 = vadd.f32 %v661_v56, %v632_v22  ;;  %v1156_v2 = vrot.slane %v1079_v63, 1  ;;  %v1312_v1 = vrot.slane %v1234_v58, 2  ;;  %v317_v59 = vmul.f32 %v1668_v11, %v2215_v9 }
  0xa6   : > { %v1377_v10 = vadd.f32 %v1743_v54, %v1349_v5  ;;  %v360_v7 = vmul.f32 %v1671_v12, %v2215_v9  ;;  %v362_v30 = vmul.f32 %v1671_v12, %v2219_v8  ;;  %v1313_v32 = vrot.slane %v1236_v46, 2 }
  0xa7   : > { %v834_v31 = vadd.f32 %v798_v60, %v677_v27  ;;  %v518_v61 = vmul.f32 %v1674_v13, %v2215_v9  ;;  %v520_v56 = vmul.f32 %v1674_v13, %v2219_v8  ;;  %v1157_v33 = vsel %vm396_vm0, %v1155_v6, %v1156_v2 }
  0xa8   : > { %1393 = vst [vmem:[%s1828_s19 + $0x60] sm:$0xff] %v1377_v10  ;;  %v439_v11 = vrot.slane %v360_v7, 1  ;;  %v440_v34 = vrot.slane %v362_v30, 1  ;;  %v662_v40 = vmul.f32 %v1677_v14, %v2303_v36  ;;  %v721_v12 = vmul.f32 %v1682_v17, %v2303_v36 }
  0xa9   : > { %v991_v48 = vadd.f32 %v955_v35, %v834_v31  ;;  %v597_v29 = vrot.slane %v518_v61, 2  ;;  %v598_v39 = vrot.slane %v520_v56, 2  ;;  %v723_v13 = vmul.f32 %v1682_v17, %v2307_v41 }
  0xaa   : > { %v441_v9 = vsel %vm396_vm0, %v439_v11, %v440_v34  ;;  %v878_v8 = vmul.f32 %v1685_v18, %v2303_v36  ;;  %v880_v50 = vmul.f32 %v1685_v18, %v2307_v41  ;;  %v799_v51 = vrot.slane %v721_v12, 1 }
  0xab   : > { %v1036_v14 = vadd.f32 %v1020_v45, %v991_v48  ;;  %v475_v3 = vadd.f32 %v441_v9, %v317_v59  ;;  %v599_v44 = vsel %vm554_vm1, %v597_v29, %v598_v39  ;;  %v1314_v21 = vsel %vm554_vm1, %v1312_v1, %v1313_v32  ;;  %v290_v48 = vld [vmem:[%s1665_s8 + $0x138] sm:$0x3] }
  0xac   : > { %v800_v55 = vrot.slane %v723_v13, 1  ;;  %v956_v52 = vrot.slane %v878_v8, 2  ;;  %v957_v28 = vrot.slane %v880_v50, 2  ;;  %v1080_v17 = vmul.f32 %v1691_v20, %v287_v57 }
  0xad   : > { %v1193_v22 = vadd.f32 %v1157_v33, %v1036_v14  ;;  %v633_v63 = vadd.f32 %v599_v44, %v475_v3  ;;  %v1082_v58 = vmul.f32 %v1691_v20, %v289_v0  ;;  %v1021_v18 = vmul.f32 %v1688_v19, %v287_v57  ;;  %v288_v33 = vld [vmem:[%s1665_s8 + $0x128] sm:$0xff] }
  0xae   : > { %v801_v36 = vsel %vm396_vm0, %v799_v51, %v800_v55  ;;  %v1237_v41 = vmul.f32 %v1740_v53, %v287_v57  ;;  %v1239_v45 = vmul.f32 %v1740_v53, %v289_v0  ;;  %v1158_v6 = vrot.slane %v1080_v17, 1 }
  0xaf   : > { %v1350_v5 = vadd.f32 %v1314_v21, %v1193_v22  ;;  %v678_v60 = vadd.f32 %v662_v40, %v633_v63  ;;  %v1159_v46 = vrot.slane %v1082_v58, 1  ;;  %v958_v27 = vsel %vm554_vm1, %v956_v52, %v957_v28 }
  0xb0   : > { %v1315_v35 = vrot.slane %v1237_v41, 2  ;;  %v1316_v2 = vrot.slane %v1239_v45, 2  ;;  %v361_v20 = vmul.f32 %v1764_v15, %v2259_v49  ;;  %v318_v10 = vmul.f32 %v1761_v4, %v2259_v49 }
  0xb1   : > { %v1378_v1 = vadd.f32 %v1823_v23, %v1350_v5  ;;  %v835_v19 = vadd.f32 %v801_v36, %v678_v60  ;;  %v363_v53 = vmul.f32 %v1764_v15, %v2263_v47  ;;  %v1160_v59 = vsel %vm396_vm0, %v1158_v6, %v1159_v46 }
  0xb2   : > { %v442_v7 = vrot.slane %v361_v20, 1  ;;  %v519_v30 = vmul.f32 %v1767_v16, %v2259_v49  ;;  %v521_v31 = vmul.f32 %v1767_v16, %v2263_v47  ;;  %v1317_v61 = vsel %vm554_vm1, %v1315_v35, %v1316_v2 }
  0xb3   : > { %1394 = vst [vmem:[%s1828_s19 + $0x68] sm:$0xff] %v1378_v1  ;;  %v992_v32 = vadd.f32 %v958_v27, %v835_v19  ;;  %v443_v56 = vrot.slane %v363_v53, 1  ;;  %v722_v4 = vmul.f32 %v1785_v37, %v2347_v24  ;;  %v724_v34 = vmul.f32 %v1785_v37, %v2351_v38 }
  0xb4   : > { %v600_v15 = vrot.slane %v519_v30, 2  ;;  %v601_v11 = vrot.slane %v521_v31, 2  ;;  %v879_v49 = vmul.f32 %v1791_v42, %v2347_v24  ;;  %v881_v29 = vmul.f32 %v1791_v42, %v2351_v38 }
  0xb5   : > { %v1037_v40 = vadd.f32 %v1021_v18, %v992_v32  ;;  %v444_v16 = vsel %vm396_vm0, %v442_v7, %v443_v56  ;;  %v802_v47 = vrot.slane %v722_v4, 1  ;;  %v663_v57 = vmul.f32 %v1771_v26, %v2347_v24 }
  0xb6   : > { %v476_v39 = vadd.f32 %v444_v16, %v318_v10  ;;  %v602_v12 = vsel %vm554_vm1, %v600_v15, %v601_v11  ;;  %v803_v0 = vrot.slane %v724_v34, 1  ;;  %v959_v37 = vrot.slane %v879_v49, 2 }
  0xb7   : > { %v1194_v9 = vadd.f32 %v1160_v59, %v1037_v40  ;;  %v960_v13 = vrot.slane %v881_v29, 2  ;;  %v1081_v8 = vmul.f32 %v1813_v62, %v288_v33  ;;  %v1083_v14 = vmul.f32 %v1813_v62, %v290_v48 }
  0xb8   : > { %v634_v50 = vadd.f32 %v602_v12, %v476_v39  ;;  %v804_v44 = vsel %vm396_vm0, %v802_v47, %v803_v0  ;;  %v1238_v42 = vmul.f32 %v1820_v25, %v288_v33  ;;  %v1240_v38 = vmul.f32 %v1820_v25, %v290_v48 }
  0xb9   : > { %v1351_v3 = vadd.f32 %v1317_v61, %v1194_v9  ;;  %v961_v24 = vsel %vm554_vm1, %v959_v37, %v960_v13  ;;  %v1161_v21 = vrot.slane %v1081_v8, 1  ;;  %v1162_v55 = vrot.slane %v1083_v14, 1 }
  0xba   : > { %v679_v51 = vadd.f32 %v663_v57, %v634_v50  ;;  %v1022_v28 = vmul.f32 %v1794_v43, %v288_v33  ;;  %v1318_v62 = vrot.slane %v1238_v42, 2  ;;  %v1319_v22 = vrot.slane %v1240_v38, 2 }
  0xbb   : > { %v1379_v26 = vadd.f32 %v1743_v54, %v1351_v3  ;;  %v1163_v17 = vsel %vm396_vm0, %v1161_v21, %v1162_v55 }
  0xbc   : > { %v836_v52 = vadd.f32 %v804_v44, %v679_v51  ;;  %v1320_v25 = vsel %vm554_vm1, %v1318_v62, %v1319_v22 }
  0xbd   : > { %1395 = vst [vmem:[%s1828_s19 + $0x70] sm:$0xff] %v1379_v26 }
  0xbe   : > { %v993_v63 = vadd.f32 %v961_v24, %v836_v52 }
  0xc0   : > { %v1038_v58 = vadd.f32 %v1022_v28, %v993_v63 }
  0xc2   : > { %v1195_v36 = vadd.f32 %v1163_v17, %v1038_v58 }
  0xc4   : > { %v1352_v18 = vadd.f32 %v1320_v25, %v1195_v36 }
  0xc6   : > { %v1380_v54 = vadd.f32 %v1823_v23, %v1352_v18 }
  0xc8   : > { %1396 = vst [vmem:[%s1828_s19 + $0x78] sm:$0xff] %v1380_v54 }
  0xc9 PF: > { %s13_s14 = sadd.s32 1, %s1579_s14   ;;  %s2454_s12 = smov %s1575_s13 }
  0xca   : > { %p10_p5 = scmp.ge.s32.totalorder %s13_s14, 4   ;;  %s2455_s13 = smov %s2457_s15 }
  0xcc   :  { %12 = sbr.rel (!%p10_p5) target bundleno = 2 (0x2), region = 76 }

// kernel: block_forward.11
= control target key start
LH: loop header
LB: loop body
LE: loop exit
PB: predicated region body
PF: predicated region fallthrough
CT: control target
= control target key end

     0   :  { %s910_s0 = inlined_call_operand.vmem [shape: f32[128,256], index: 0, kind: input, shape index: {}]   ;;  %s911_s1 = inlined_call_operand.vmem [shape: f32[256,64], index: 1, kind: input, shape index: {}]   ;;  %s912_s2 = inlined_call_operand.vmem [shape: f32[1,64], index: 2, kind: input, shape index: {}]   ;;  %s913_s3 = inlined_call_operand.vmem [shape: f32[128,64], index: 3, kind: input, shape index: {}]   ;;  %s914_s4 = inlined_call_operand.hbm [shape: f32[128,64], index: 4, kind: output, shape index: {}]  }
   0x1   :  { %v103_v0 = vld [vmem:[%s911_s1 + $0x80] sm:$0xff]  ;;  %v104_v1 = vld [vmem:[%s911_s1 + $0x88] sm:$0xff]  ;;  %v105_v5 = vld [vmem:[%s911_s1 + $0x90] sm:$0xff] }
   0x2   :  { %v87_v2 = vld [vmem:[%s911_s1] sm:$0xff]  ;;  %v484_v3 = vpack.c.bf16 %v104_v1, %v103_v0  ;;  %v88_v4 = vld [vmem:[%s911_s1 + $0x8] sm:$0xff]  ;;  %v106_v6 = vld [vmem:[%s911_s1 + $0x98] sm:$0xff] }
   0x3   :  { %v486_v7 = vpack.c.bf16 %v88_v4, %v87_v2  ;;  %v488_v8 = vpack.c.bf16 %v106_v6, %v105_v5  ;;  %v89_v9 = vld [vmem:[%s911_s1 + $0x10] sm:$0xff]  ;;  %v90_v10 = vld [vmem:[%s911_s1 + $0x18] sm:$0xff]  ;;  %v107_v11 = vld [vmem:[%s911_s1 + $0xa0] sm:$0xff] }
   0x4   :  { %485 = vmatprep.subr.bf16.mxu0 %v484_v3  ;;  %516 = vmatprep.subr.bf16.mxu1 %v484_v3  ;;  %v108_v12 = vld [vmem:[%s911_s1 + $0xa8] sm:$0xff]  ;;  %v490_v13 = vpack.c.bf16 %v90_v10, %v89_v9  ;;  %v91_v15 = vld [vmem:[%s911_s1 + $0x20] sm:$0xff]  ;;  %v109_v17 = vld [vmem:[%s911_s1 + $0xb0] sm:$0xff] }
   0x5   :  { %487 = vmatpush3.bf16.msra.mxu0 %v486_v7  ;;  %524 = vmatpush3.bf16.msra.mxu1 %v486_v7  ;;  %v492_v14 = vpack.c.bf16 %v108_v12, %v107_v11  ;;  %v92_v16 = vld [vmem:[%s911_s1 + $0x28] sm:$0xff]  ;;  %v110_v18 = vld [vmem:[%s911_s1 + $0xb8] sm:$0xff]  ;;  %v93_v21 = vld [vmem:[%s911_s1 + $0x30] sm:$0xff] }
   0x6   :  { %489 = vmatprep.subr.bf16.mxu0 %v488_v8  ;;  %517 = vmatprep.subr.bf16.mxu1 %v488_v8  ;;  %v494_v19 = vpack.c.bf16 %v92_v16, %v91_v15  ;;  %v496_v20 = vpack.c.bf16 %v110_v18, %v109_v17  ;;  %v94_v22 = vld [vmem:[%s911_s1 + $0x38] sm:$0xff]  ;;  %v111_v23 = vld [vmem:[%s911_s1 + $0xc0] sm:$0xff]  ;;  %v112_v24 = vld [vmem:[%s911_s1 + $0xc8] sm:$0xff] }
   0x7   :  { %v56_v25 = vld [vmem:[%s910_s0 + $0x8] sm:$0xff]  ;;  %v498_v27 = vpack.c.bf16 %v94_v22, %v93_v21  ;;  %v500_v28 = vpack.c.bf16 %v112_v24, %v111_v23  ;;  %v95_v29 = vld [vmem:[%s911_s1 + $0x40] sm:$0xff]  ;;  %v113_v31 = vld [vmem:[%s911_s1 + $0xd0] sm:$0xff] }
   0x8   :  { %183 = vmatprep.mubr.f32.mxu0 %v56_v25  ;;  %v72_v26 = vld [vmem:[%s910_s0 + $0x88] sm:$0xff]  ;;  %v114_v32 = vld [vmem:[%s911_s1 + $0xd8] sm:$0xff]  ;;  %v97_v35 = vld [vmem:[%s911_s1 + $0x50] sm:$0xff] }
   0x9   :  { %491 = vmatpush3.bf16.msra.mxu0 %v490_v13  ;;  %525 = vmatpush3.bf16.msra.mxu1 %v490_v13  ;;  %v96_v30 = vld [vmem:[%s911_s1 + $0x48] sm:$0xff]  ;;  %v504_v34 = vpack.c.bf16 %v114_v32, %v113_v31  ;;  %v98_v36 = vld [vmem:[%s911_s1 + $0x58] sm:$0xff]  ;;  %v115_v37 = vld [vmem:[%s911_s1 + $0xe0] sm:$0xff] }
   0xa   :  { %493 = vmatprep.subr.bf16.mxu0 %v492_v14  ;;  %518 = vmatprep.subr.bf16.mxu1 %v492_v14  ;;  %v502_v33 = vpack.c.bf16 %v96_v30, %v95_v29  ;;  %v116_v38 = vld [vmem:[%s911_s1 + $0xe8] sm:$0xff]  ;;  %v506_v39 = vpack.c.bf16 %v98_v36, %v97_v35  ;;  %v99_v41 = vld [vmem:[%s911_s1 + $0x60] sm:$0xff] }
   0xb   :  { %223 = vmatprep.mubr.f32.mxu1 %v72_v26  ;;  %v508_v40 = vpack.c.bf16 %v116_v38, %v115_v37  ;;  %v100_v42 = vld [vmem:[%s911_s1 + $0x68] sm:$0xff] }
   0xd   :  { %495 = vmatpush3.bf16.msra.mxu0 %v494_v19  ;;  %526 = vmatpush3.bf16.msra.mxu1 %v494_v19 }
   0xe   :  { %497 = vmatprep.subr.bf16.mxu0 %v496_v20  ;;  %519 = vmatprep.subr.bf16.mxu1 %v496_v20 }
  0x11   :  { %499 = vmatpush3.bf16.msra.mxu0 %v498_v27  ;;  %527 = vmatpush3.bf16.msra.mxu1 %v498_v27 }
  0x12   :  { %501 = vmatprep.subr.bf16.mxu0 %v500_v28  ;;  %520 = vmatprep.subr.bf16.mxu1 %v500_v28 }
  0x15   :  { %503 = vmatpush3.bf16.msra.mxu0 %v502_v33  ;;  %528 = vmatpush3.bf16.msra.mxu1 %v502_v33 }
  0x16   :  { %505 = vmatprep.subr.bf16.mxu0 %v504_v34  ;;  %521 = vmatprep.subr.bf16.mxu1 %v504_v34 }
  0x17   :  { %9 = vsyncpa [#allocation4], 0  ;;  %v117_v43 = vld [vmem:[%s911_s1 + $0xf0] sm:$0xff]  ;;  %v118_v44 = vld [vmem:[%s911_s1 + $0xf8] sm:$0xff]  ;;  %v510_v45 = vpack.c.bf16 %v100_v42, %v99_v41  ;;  %vm22_vm0 = vcmask 523264   ;;  %v560_v16 = vmov 0.0  }
  0x18   :  { %v512_v46 = vpack.c.bf16 %v118_v44, %v117_v43  ;;  %v101_v47 = vld [vmem:[%s911_s1 + $0x70] sm:$0xff]  ;;  %v102_v48 = vld [vmem:[%s911_s1 + $0x78] sm:$0xff]  ;;  %v55_v50 = vld [vmem:[%s910_s0] sm:$0xff]  ;;  %23 = vst.msk [vmem:[#allocation2] sm:$0xff] %vm22_vm0, %v560_v16  ;;  %s561_s12 = smov [#allocation3]  }
  0x19   :  { %507 = vmatpush3.bf16.msra.mxu0 %v506_v39  ;;  %529 = vmatpush3.bf16.msra.mxu1 %v506_v39  ;;  %v514_v49 = vpack.c.bf16 %v102_v48, %v101_v47  ;;  %v71_v51 = vld [vmem:[%s910_s0 + $0x80] sm:$0xff]  ;;  %v58_v52 = vld [vmem:[%s910_s0 + $0x18] sm:$0xff]  ;;  %v57_v54 = vld [vmem:[%s910_s0 + $0x10] sm:$0xff]  ;;  %24 = vst.msk [vmem:[#allocation2 + $0x8] sm:$0xff] %vm22_vm0, %v560_v16  ;;  %s392_s13 = sshll.u32 %s561_s12, 4  ;;  %s393_s13 = int_to_ptr.vmem [resolvable:$true] %s392_s13 }
  0x1a   :  { %509 = vmatprep.subr.bf16.mxu0 %v508_v40  ;;  %522 = vmatprep.subr.bf16.mxu1 %v508_v40  ;;  %v74_v53 = vld [vmem:[%s910_s0 + $0x98] sm:$0xff]  ;;  %v73_v55 = vld [vmem:[%s910_s0 + $0x90] sm:$0xff]  ;;  %v60_v56 = vld [vmem:[%s910_s0 + $0x28] sm:$0xff]  ;;  %25 = vst.msk [vmem:[#allocation2 + $0x10] sm:$0xff] %vm22_vm0, %v560_v16  ;;  %s536_s15 = scalar_lea.vmem %s393_s13, 2048  ;;  %p541_p1 = scmp.lt.s32.totalorder %s393_s13, %s393_s13 }
  0x1b   :  { %v76_v57 = vld [vmem:[%s910_s0 + $0xa8] sm:$0xff]  ;;  %v59_v58 = vld [vmem:[%s910_s0 + $0x20] sm:$0xff]  ;;  %v62_v60 = vld [vmem:[%s910_s0 + $0x38] sm:$0xff]  ;;  %26 = vst.msk [vmem:[#allocation2 + $0x18] sm:$0xff] %vm22_vm0, %v560_v16  ;;  %p537_p0 = scmp.ne.s32.totalorder %s393_s13, %s536_s15  ;;  %p542_p2 = scmp.lt.s32.totalorder %s536_s15, %s536_s15 }
  0x1c   :  { %v75_v59 = vld [vmem:[%s910_s0 + $0xa0] sm:$0xff]  ;;  %v78_v61 = vld [vmem:[%s910_s0 + $0xb8] sm:$0xff]  ;;  %v61_v62 = vld [vmem:[%s910_s0 + $0x30] sm:$0xff]  ;;  %27 = vst.msk [vmem:[#allocation2 + $0x20] sm:$0xff] %vm22_vm0, %v560_v16 }
  0x1d   :  { %511 = vmatpush3.bf16.msra.mxu0 %v510_v45  ;;  %530 = vmatpush3.bf16.msra.mxu1 %v510_v45  ;;  %v77_v63 = vld [vmem:[%s910_s0 + $0xb0] sm:$0xff]  ;;  %v64_v0 = vld [vmem:[%s910_s0 + $0x48] sm:$0xff]  ;;  %v63_v2 = vld [vmem:[%s910_s0 + $0x40] sm:$0xff]  ;;  %28 = vst.msk [vmem:[#allocation2 + $0x28] sm:$0xff] %vm22_vm0, %v560_v16  ;;  %p543_p3 = por %p542_p2, %p541_p1 }
  0x1e   :  { %513 = vmatprep.subr.bf16.mxu0 %v512_v46  ;;  %523 = vmatprep.subr.bf16.mxu1 %v512_v46  ;;  %v80_v1 = vld [vmem:[%s910_s0 + $0xc8] sm:$0xff]  ;;  %v79_v3 = vld [vmem:[%s910_s0 + $0xc0] sm:$0xff]  ;;  %v66_v4 = vld [vmem:[%s910_s0 + $0x58] sm:$0xff]  ;;  %29 = vst.msk [vmem:[#allocation2 + $0x30] sm:$0xff] %vm22_vm0, %v560_v16 }
  0x1f   :  { %v82_v5 = vld [vmem:[%s910_s0 + $0xd8] sm:$0xff]  ;;  %v65_v6 = vld [vmem:[%s910_s0 + $0x50] sm:$0xff]  ;;  %v68_v8 = vld [vmem:[%s910_s0 + $0x68] sm:$0xff]  ;;  %30 = vst.msk [vmem:[#allocation2 + $0x38] sm:$0xff] %vm22_vm0, %v560_v16  ;;  %p544_p4 = pnand %p543_p3, %p537_p0 }
  0x20   :  { %v81_v7 = vld [vmem:[%s910_s0 + $0xd0] sm:$0xff]  ;;  %v84_v9 = vld [vmem:[%s910_s0 + $0xe8] sm:$0xff]  ;;  %v67_v10 = vld [vmem:[%s910_s0 + $0x60] sm:$0xff]  ;;  %31 = vst.msk [vmem:[#allocation2 + $0x40] sm:$0xff] %vm22_vm0, %v560_v16 }
  0x21   :  { %515 = vmatpush3.bf16.msra.mxu0 %v514_v49  ;;  %531 = vmatpush3.bf16.msra.mxu1 %v514_v49  ;;  %v83_v11 = vld [vmem:[%s910_s0 + $0xe0] sm:$0xff]  ;;  %v70_v12 = vld [vmem:[%s910_s0 + $0x78] sm:$0xff]  ;;  %v69_v14 = vld [vmem:[%s910_s0 + $0x70] sm:$0xff]  ;;  %32 = vst.msk [vmem:[#allocation2 + $0x48] sm:$0xff] %vm22_vm0, %v560_v16 }
  0x22   :  { %v86_v13 = vld [vmem:[%s910_s0 + $0xf8] sm:$0xff]  ;;  %v85_v15 = vld [vmem:[%s910_s0 + $0xf0] sm:$0xff]  ;;  %33 = vst.msk [vmem:[#allocation2 + $0x50] sm:$0xff] %vm22_vm0, %v560_v16  ;;  %34 = vst.msk [vmem:[#allocation2 + $0x58] sm:$0xff] %vm22_vm0, %v560_v16 }
  0x23   :  { %35 = vst.msk [vmem:[#allocation2 + $0x60] sm:$0xff] %vm22_vm0, %v560_v16  ;;  %36 = vst.msk [vmem:[#allocation2 + $0x68] sm:$0xff] %vm22_vm0, %v560_v16  ;;  %v39_v19 = vld [vmem:[#allocation2] sm:$0xff]  ;;  %v40_v29 = vld [vmem:[#allocation2 + $0x8] sm:$0xff] }
  0x24   :  { %184 = vmatmul.mubr.f32.vlgmr.msra.gmra.mrb[0].mxu0 %v55_v50  ;;  %224 = vmatmul.mubr.f32.vlgmr.msra.gmra.mrb[0].mxu1 %v71_v51  ;;  %37 = vst.msk [vmem:[#allocation2 + $0x70] sm:$0xff] %vm22_vm0, %v560_v16  ;;  %38 = vst.msk [vmem:[#allocation2 + $0x78] sm:$0xff] %vm22_vm0, %v560_v16  ;;  %v41_v39 = vld [vmem:[#allocation2 + $0x10] sm:$0xff]  ;;  %v804_v45 = vld [vmem:[%s912_s2] ss:$0 sm:$0xff] }
  0x25   :  { %188 = vmatprep.mubr.f32.mxu0 %v58_v52  ;;  %228 = vmatprep.mubr.f32.mxu1 %v74_v53  ;;  %v339_v46 = vld [vmem:[%s913_s3] sm:$0xff]  ;;  %v42_v52 = vld [vmem:[#allocation2 + $0x18] sm:$0xff] }
  0x26   :  { %v347_v47 = vld [vmem:[%s913_s3 + $0x40] sm:$0xff] }
  0x27   :  { %v47_v21 = vld [vmem:[#allocation2 + $0x40] sm:$0xff] }
  0x28   :  { %189 = vmatmul.mubr.f32.gmra.mrb[2].mxu0 %v57_v54  ;;  %229 = vmatmul.mubr.f32.gmra.mrb[2].mxu1 %v73_v55  ;;  %v48_v31 = vld [vmem:[#allocation2 + $0x48] sm:$0xff] }
  0x29   :  { %193 = vmatprep.mubr.f32.mxu0 %v60_v56  ;;  %233 = vmatprep.mubr.f32.mxu1 %v76_v57  ;;  %v49_v41 = vld [vmem:[#allocation2 + $0x50] sm:$0xff]  ;;  %v50_v56 = vld [vmem:[#allocation2 + $0x58] sm:$0xff] }
  0x2c   :  { %194 = vmatmul.mubr.f32.gmra.mrb[4].mxu0 %v59_v58  ;;  %234 = vmatmul.mubr.f32.gmra.mrb[4].mxu1 %v75_v59 }
  0x2d   :  { %198 = vmatprep.mubr.f32.mxu0 %v62_v60  ;;  %238 = vmatprep.mubr.f32.mxu1 %v78_v61 }
  0x30   :  { %199 = vmatmul.mubr.f32.gmra.mrb[6].mxu0 %v61_v62  ;;  %239 = vmatmul.mubr.f32.gmra.mrb[6].mxu1 %v77_v63 }
  0x31   :  { %203 = vmatprep.mubr.f32.mxu0 %v64_v0  ;;  %243 = vmatprep.mubr.f32.mxu1 %v80_v1  ;;  %v340_v0 = vld [vmem:[%s913_s3 + $0x8] sm:$0xff] }
  0x32   :  { %v348_v1 = vld [vmem:[%s913_s3 + $0x48] sm:$0xff] }
  0x34   :  { %204 = vmatmul.mubr.f32.gmra.mrb[8].mxu0 %v63_v2  ;;  %244 = vmatmul.mubr.f32.gmra.mrb[8].mxu1 %v79_v3 }
  0x35   :  { %208 = vmatprep.mubr.f32.mxu0 %v66_v4  ;;  %248 = vmatprep.mubr.f32.mxu1 %v82_v5 }
  0x38   :  { %209 = vmatmul.mubr.f32.gmra.mrb[10].mxu0 %v65_v6  ;;  %249 = vmatmul.mubr.f32.gmra.mrb[10].mxu1 %v81_v7  ;;  %v43_v6 = vld [vmem:[#allocation2 + $0x20] sm:$0xff] }
  0x39   :  { %213 = vmatprep.mubr.f32.mxu0 %v68_v8  ;;  %253 = vmatprep.mubr.f32.mxu1 %v84_v9 }
  0x3c   :  { %214 = vmatmul.mubr.f32.gmra.mrb[12].mxu0 %v67_v10  ;;  %254 = vmatmul.mubr.f32.gmra.mrb[12].mxu1 %v83_v11  ;;  %v51_v10 = vld [vmem:[#allocation2 + $0x60] sm:$0xff] }
  0x3d   :  { %218 = vmatprep.mubr.f32.mxu0 %v70_v12  ;;  %258 = vmatprep.mubr.f32.mxu1 %v86_v13 }
  0x40   :  { %219 = vmatmul.mubr.f32.gmra.mrb[14].mxu0 %v69_v14  ;;  %259 = vmatmul.mubr.f32.gmra.mrb[14].mxu1 %v85_v15 }
  0xf7   :  { %v436_v17 = vpop.f32.mrb[0].mxu0  ;;  %v460_v18 = vpop.f32.mrb[0].mxu1 }
  0xf8   :  { %v437_v20 = vpop.f32.mrb[1].mxu0  ;;  %v461_v22 = vpop.f32.mrb[1].mxu1 }
  0xf9   :  { %v438_v23 = vadd.f32 %v437_v20, %v436_v17  ;;  %v462_v24 = vadd.f32 %v461_v22, %v460_v18  ;;  %v341_v18 = vld [vmem:[%s913_s3 + $0x10] sm:$0xff] }
  0xfb   :  { %v264_v25 = vadd.f32 %v438_v23, %v39_v19  ;;  %v272_v26 = vadd.f32 %v462_v24, %v47_v21  ;;  %v439_v27 = vpop.f32.mrb[2].mxu0  ;;  %v463_v28 = vpop.f32.mrb[2].mxu1  ;;  %v349_v19 = vld [vmem:[%s913_s3 + $0x50] sm:$0xff]  ;;  %v44_v24 = vld [vmem:[#allocation2 + $0x28] sm:$0xff] }
  0xfc   :  { %v440_v30 = vpop.f32.mrb[3].mxu0  ;;  %v464_v32 = vpop.f32.mrb[3].mxu1 }
  0xfd   :  { %281 = vst.msk [vmem:[#allocation2] sm:$0xff] %vm22_vm0, %v264_v25  ;;  %289 = vst.msk [vmem:[#allocation2 + $0x40] sm:$0xff] %vm22_vm0, %v272_v26  ;;  %v441_v33 = vadd.f32 %v440_v30, %v439_v27  ;;  %v465_v34 = vadd.f32 %v464_v32, %v463_v28  ;;  %v52_v28 = vld [vmem:[#allocation2 + $0x68] sm:$0xff] }
  0xff   :  { %v265_v35 = vadd.f32 %v441_v33, %v40_v29  ;;  %v273_v36 = vadd.f32 %v465_v34, %v48_v31  ;;  %v442_v37 = vpop.f32.mrb[4].mxu0  ;;  %v466_v38 = vpop.f32.mrb[4].mxu1 }
 0x100   :  { %v443_v40 = vpop.f32.mrb[5].mxu0  ;;  %v467_v42 = vpop.f32.mrb[5].mxu1 }
 0x101   :  { %282 = vst.msk [vmem:[#allocation2 + $0x8] sm:$0xff] %vm22_vm0, %v265_v35  ;;  %290 = vst.msk [vmem:[#allocation2 + $0x48] sm:$0xff] %vm22_vm0, %v273_v36  ;;  %v444_v43 = vadd.f32 %v443_v40, %v442_v37  ;;  %v468_v44 = vadd.f32 %v467_v42, %v466_v38  ;;  %v342_v36 = vld [vmem:[%s913_s3 + $0x18] sm:$0xff]  ;;  %v45_v42 = vld [vmem:[#allocation2 + $0x30] sm:$0xff] }
 0x102   :  { %v350_v37 = vld [vmem:[%s913_s3 + $0x58] sm:$0xff] }
 0x103   :  { %v266_v48 = vadd.f32 %v444_v43, %v41_v39  ;;  %v274_v49 = vadd.f32 %v468_v44, %v49_v41  ;;  %v445_v50 = vpop.f32.mrb[6].mxu0  ;;  %v469_v51 = vpop.f32.mrb[6].mxu1 }
 0x104   :  { %v300_v53 = vld [vmem:[#allocation2] sm:$0xff]  ;;  %v446_v55 = vpop.f32.mrb[7].mxu0  ;;  %v470_v57 = vpop.f32.mrb[7].mxu1 }
 0x105   :  { %v308_v54 = vld [vmem:[#allocation2 + $0x40] sm:$0xff]  ;;  %v323_v58 = vadd.f32 %v804_v45, %v300_v53  ;;  %283 = vst.msk [vmem:[#allocation2 + $0x10] sm:$0xff] %vm22_vm0, %v266_v48  ;;  %291 = vst.msk [vmem:[#allocation2 + $0x50] sm:$0xff] %vm22_vm0, %v274_v49  ;;  %v447_v60 = vadd.f32 %v446_v55, %v445_v50  ;;  %v471_v61 = vadd.f32 %v470_v57, %v469_v51 }
 0x106   :  { %v331_v59 = vadd.f32 %v804_v45, %v308_v54  ;;  %v343_v55 = vld [vmem:[%s913_s3 + $0x20] sm:$0xff] }
 0x107   :  { %v355_v62 = vadd.f32 %v339_v46, %v323_v58  ;;  %v267_v2 = vadd.f32 %v447_v60, %v42_v52  ;;  %v275_v3 = vadd.f32 %v471_v61, %v50_v56  ;;  %v448_v4 = vpop.f32.mrb[8].mxu0  ;;  %v472_v5 = vpop.f32.mrb[8].mxu1  ;;  %v351_v56 = vld [vmem:[%s913_s3 + $0x60] sm:$0xff]  ;;  %v46_v61 = vld [vmem:[#allocation2 + $0x38] sm:$0xff] }
 0x108   :  { %v363_v63 = vadd.f32 %v347_v47, %v331_v59  ;;  %v301_v7 = vld [vmem:[#allocation2 + $0x8] sm:$0xff]  ;;  %v449_v9 = vpop.f32.mrb[9].mxu0  ;;  %v473_v11 = vpop.f32.mrb[9].mxu1  ;;  %v53_v47 = vld [vmem:[#allocation2 + $0x70] sm:$0xff] }
 0x109   :  { %v309_v8 = vld [vmem:[#allocation2 + $0x48] sm:$0xff]  ;;  %371 = vst.msk [vmem:[#allocation3] sm:$0xff] %vm22_vm0, %v355_v62  ;;  %v324_v12 = vadd.f32 %v804_v45, %v301_v7  ;;  %284 = vst.msk [vmem:[#allocation2 + $0x18] sm:$0xff] %vm22_vm0, %v267_v2  ;;  %v450_v14 = vadd.f32 %v449_v9, %v448_v4  ;;  %v474_v15 = vadd.f32 %v473_v11, %v472_v5 }
 0x10a   :  { %379 = vst.msk [vmem:[#allocation3 + $0x40] sm:$0xff] %vm22_vm0, %v363_v63  ;;  %v332_v13 = vadd.f32 %v804_v45, %v309_v8  ;;  %292 = vst.msk [vmem:[#allocation2 + $0x58] sm:$0xff] %vm22_vm0, %v275_v3  ;;  %v344_v9 = vld [vmem:[%s913_s3 + $0x28] sm:$0xff] }
 0x10b   :  { %v356_v16 = vadd.f32 %v340_v0, %v324_v12  ;;  %v268_v20 = vadd.f32 %v450_v14, %v43_v6  ;;  %v276_v21 = vadd.f32 %v474_v15, %v51_v10  ;;  %v451_v22 = vpop.f32.mrb[10].mxu0  ;;  %v475_v23 = vpop.f32.mrb[10].mxu1  ;;  %v352_v14 = vld [vmem:[%s913_s3 + $0x68] sm:$0xff] }
 0x10c   :  { %v364_v17 = vadd.f32 %v348_v1, %v332_v13  ;;  %v302_v25 = vld [vmem:[#allocation2 + $0x10] sm:$0xff]  ;;  %v452_v27 = vpop.f32.mrb[11].mxu0  ;;  %v476_v29 = vpop.f32.mrb[11].mxu1  ;;  %v54_v1 = vld [vmem:[#allocation2 + $0x78] sm:$0xff] }
 0x10d   :  { %v310_v26 = vld [vmem:[#allocation2 + $0x50] sm:$0xff]  ;;  %372 = vst.msk [vmem:[#allocation3 + $0x8] sm:$0xff] %vm22_vm0, %v356_v16  ;;  %v325_v30 = vadd.f32 %v804_v45, %v302_v25  ;;  %285 = vst.msk [vmem:[#allocation2 + $0x20] sm:$0xff] %vm22_vm0, %v268_v20  ;;  %v453_v32 = vadd.f32 %v452_v27, %v451_v22  ;;  %v477_v33 = vadd.f32 %v476_v29, %v475_v23  ;;  %v346_v27 = vld [vmem:[%s913_s3 + $0x38] sm:$0xff] }
 0x10e   :  { %380 = vst.msk [vmem:[#allocation3 + $0x48] sm:$0xff] %vm22_vm0, %v364_v17  ;;  %v333_v31 = vadd.f32 %v804_v45, %v310_v26  ;;  %293 = vst.msk [vmem:[#allocation2 + $0x60] sm:$0xff] %vm22_vm0, %v276_v21  ;;  %v353_v22 = vld [vmem:[%s913_s3 + $0x70] sm:$0xff] }
 0x10f   :  { %v357_v34 = vadd.f32 %v341_v18, %v325_v30  ;;  %v269_v38 = vadd.f32 %v453_v32, %v44_v24  ;;  %v277_v39 = vadd.f32 %v477_v33, %v52_v28  ;;  %v454_v40 = vpop.f32.mrb[12].mxu0  ;;  %v478_v41 = vpop.f32.mrb[12].mxu1  ;;  %v354_v30 = vld [vmem:[%s913_s3 + $0x78] sm:$0xff] }
 0x110   :  { %v365_v35 = vadd.f32 %v349_v19, %v333_v31  ;;  %v303_v43 = vld [vmem:[#allocation2 + $0x18] sm:$0xff]  ;;  %v455_v46 = vpop.f32.mrb[13].mxu0  ;;  %v479_v48 = vpop.f32.mrb[13].mxu1  ;;  %v345_v19 = vld [vmem:[%s913_s3 + $0x30] sm:$0xff] }
 0x111   :  { %v311_v44 = vld [vmem:[#allocation2 + $0x58] sm:$0xff]  ;;  %373 = vst.msk [vmem:[#allocation3 + $0x10] sm:$0xff] %vm22_vm0, %v357_v34  ;;  %v326_v49 = vadd.f32 %v804_v45, %v303_v43  ;;  %286 = vst.msk [vmem:[#allocation2 + $0x28] sm:$0xff] %vm22_vm0, %v269_v38  ;;  %v456_v51 = vadd.f32 %v455_v46, %v454_v40  ;;  %v480_v52 = vadd.f32 %v479_v48, %v478_v41 }
 0x112   :  { %381 = vst.msk [vmem:[#allocation3 + $0x50] sm:$0xff] %vm22_vm0, %v365_v35  ;;  %v334_v50 = vadd.f32 %v804_v45, %v311_v44  ;;  %294 = vst.msk [vmem:[#allocation2 + $0x68] sm:$0xff] %vm22_vm0, %v277_v39 }
 0x113   :  { %v358_v53 = vadd.f32 %v342_v36, %v326_v49  ;;  %v270_v57 = vadd.f32 %v456_v51, %v45_v42  ;;  %v278_v58 = vadd.f32 %v480_v52, %v53_v47  ;;  %v457_v59 = vpop.f32.mrb[14].mxu0  ;;  %v481_v60 = vpop.f32.mrb[14].mxu1 }
 0x114   :  { %v366_v54 = vadd.f32 %v350_v37, %v334_v50  ;;  %v304_v62 = vld [vmem:[#allocation2 + $0x20] sm:$0xff]  ;;  %v458_v0 = vpop.f32.mrb[15].mxu0  ;;  %v482_v2 = vpop.f32.mrb[15].mxu1 }
 0x115   :  { %v312_v63 = vld [vmem:[#allocation2 + $0x60] sm:$0xff]  ;;  %374 = vst.msk [vmem:[#allocation3 + $0x18] sm:$0xff] %vm22_vm0, %v358_v53  ;;  %v327_v3 = vadd.f32 %v804_v45, %v304_v62  ;;  %287 = vst.msk [vmem:[#allocation2 + $0x30] sm:$0xff] %vm22_vm0, %v270_v57  ;;  %v459_v5 = vadd.f32 %v458_v0, %v457_v59  ;;  %v483_v6 = vadd.f32 %v482_v2, %v481_v60 }
 0x116   :  { %382 = vst.msk [vmem:[#allocation3 + $0x58] sm:$0xff] %vm22_vm0, %v366_v54  ;;  %v335_v4 = vadd.f32 %v804_v45, %v312_v63  ;;  %295 = vst.msk [vmem:[#allocation2 + $0x70] sm:$0xff] %vm22_vm0, %v278_v58 }
 0x117   :  { %v359_v7 = vadd.f32 %v343_v55, %v327_v3  ;;  %v271_v10 = vadd.f32 %v459_v5, %v46_v61  ;;  %v279_v11 = vadd.f32 %v483_v6, %v54_v1 }
 0x118   :  { %v367_v8 = vadd.f32 %v351_v56, %v335_v4  ;;  %v305_v12 = vld [vmem:[#allocation2 + $0x28] sm:$0xff] }
 0x119   :  { %v313_v13 = vld [vmem:[#allocation2 + $0x68] sm:$0xff]  ;;  %375 = vst.msk [vmem:[#allocation3 + $0x20] sm:$0xff] %vm22_vm0, %v359_v7  ;;  %v328_v15 = vadd.f32 %v804_v45, %v305_v12  ;;  %288 = vst.msk [vmem:[#allocation2 + $0x38] sm:$0xff] %vm22_vm0, %v271_v10 }
 0x11a   :  { %383 = vst.msk [vmem:[#allocation3 + $0x60] sm:$0xff] %vm22_vm0, %v367_v8  ;;  %v336_v16 = vadd.f32 %v804_v45, %v313_v13  ;;  %296 = vst.msk [vmem:[#allocation2 + $0x78] sm:$0xff] %vm22_vm0, %v279_v11 }
 0x11b   :  { %v360_v17 = vadd.f32 %v344_v9, %v328_v15 }
 0x11c   :  { %v368_v18 = vadd.f32 %v352_v14, %v336_v16  ;;  %v306_v20 = vld [vmem:[#allocation2 + $0x30] sm:$0xff] }
 0x11d   :  { %v314_v21 = vld [vmem:[#allocation2 + $0x70] sm:$0xff]  ;;  %376 = vst.msk [vmem:[#allocation3 + $0x28] sm:$0xff] %vm22_vm0, %v360_v17  ;;  %v329_v23 = vadd.f32 %v804_v45, %v306_v20 }
 0x11e   :  { %384 = vst.msk [vmem:[#allocation3 + $0x68] sm:$0xff] %vm22_vm0, %v368_v18  ;;  %v337_v24 = vadd.f32 %v804_v45, %v314_v21 }
 0x11f   :  { %v361_v25 = vadd.f32 %v345_v19, %v329_v23 }
 0x120   :  { %v369_v26 = vadd.f32 %v353_v22, %v337_v24  ;;  %v307_v28 = vld [vmem:[#allocation2 + $0x38] sm:$0xff] }
 0x121   :  { %v315_v29 = vld [vmem:[#allocation2 + $0x78] sm:$0xff]  ;;  %377 = vst.msk [vmem:[#allocation3 + $0x30] sm:$0xff] %vm22_vm0, %v361_v25  ;;  %v330_v31 = vadd.f32 %v804_v45, %v307_v28 }
 0x122   :  { %385 = vst.msk [vmem:[#allocation3 + $0x70] sm:$0xff] %vm22_vm0, %v369_v26  ;;  %v338_v32 = vadd.f32 %v804_v45, %v315_v29 }
 0x123   :  { %v362_v33 = vadd.f32 %v346_v27, %v330_v31 }
 0x124   :  { %v370_v34 = vadd.f32 %v354_v30, %v338_v32 }
 0x125   :  { %378 = vst.msk [vmem:[#allocation3 + $0x38] sm:$0xff] %vm22_vm0, %v362_v33 }
 0x126   :  { %386 = vst.msk [vmem:[#allocation3 + $0x78] sm:$0xff] %vm22_vm0, %v370_v34 }
 0x127   :  { %547 = shalt.err (!%p544_p4)
}
 0x128   :  { %s548_s17 = scalar_lea.hbm %s914_s4, 2048 }
 0x129   :  { %p549_p5 = scmp.ne.s32.totalorder %s914_s4, %s548_s17  ;;  %p552_p6 = scmp.lt.u32.totalorder %s548_s17, %s914_s4 }
 0x12b   :  { %p554_p7 = pnand %p552_p6, %p549_p5 }
 0x12d   :  { %557 = shalt.err (!%p554_p7)
}
 0x12e   :  { %s562_s22 = smov 128   ;;  %s563_s23 = smov 8  }
 0x12f   :  { %398 = dma.vmem_to_hbm [thread:$0]  %s393_s13, 2048, %s914_s4, [#allocation4], %s562_s22, %s562_s22, %s563_s23  }
 0x130   :  { %558 = dma.done.wait [#allocation4], 2048  }
 0x131   :  { %559 = vsyncadd [#allocation4], 4294965248 }
 0x132   :  { %402 = vsyncpa [#allocation4], 1 }

</bundles_post_ra>
